<compile_context>
chip_gen: v7x
topology: tpu7x:2x2x1
jax: 0.10.0
libtpu: 0.0.40
codegen_flags: <defaults>
</compile_context>

<pallas_src>
import functools

import jax
import jax.numpy as jnp
from jax import lax
from jax.experimental import pallas as pl
from jax.experimental.pallas import tpu as pltpu


def seq_encoder_kernel(emb_ref,      # (S, tB, Ep)   bf16
                       w_in_ref,     # (Ep, 8*Hp)    bf16  [fwd(i,f,o,g) | bwd(i,f,o,g)]
                       b_in_ref,     # (1, 8*Hp)     f32
                       whh_f_ref,    # (Hp, 4*Hp)    bf16
                       whh_b_ref,    # (Hp, 4*Hp)    bf16
                       out_ref,      # (tB, 2*Hp)    f32
                       xf_ref,       # VMEM scratch (S, tB, 4*Hp) f32
                       xb_ref):      # VMEM scratch (S, tB, 4*Hp) f32
    S, tB, Ep = emb_ref.shape
    Hp = whh_f_ref.shape[0]
    G = 4 * Hp

    # ---- input projection: one large bf16 MXU matmul over all timesteps ----
    x2d = emb_ref[...].reshape(S * tB, Ep)                       # leading-dim reshape: free
    proj = jnp.dot(x2d, w_in_ref[...],
                   preferred_element_type=jnp.float32) + b_in_ref[...]
    xf_ref[...] = proj[:, :G].reshape(S, tB, G)                  # fwd gates, all t
    xb_ref[...] = proj[:, G:].reshape(S, tB, G)                  # bwd gates, all t

    whh_f = whh_f_ref[...]
    whh_b = whh_b_ref[...]

    def cell(gates, c):
        sig = jax.nn.sigmoid(gates[:, :3 * Hp])                  # one EUP issue: i|f|o
        i_g = sig[:, 0 * Hp:1 * Hp]
        f_g = sig[:, 1 * Hp:2 * Hp]
        o_g = sig[:, 2 * Hp:3 * Hp]
        g_g = jnp.tanh(gates[:, 3 * Hp:4 * Hp])
        c = f_g * c + i_g * g_g
        h = o_g * jnp.tanh(c)
        return h, c

    def step(t, carry):
        # Fused fwd (time t) + bwd (time S-1-t) step: two independent chains
        # interleave their MXU pushes and EUP sigmoid/tanh work.
        h_f, c_f, m_f, h_b, c_b, m_b = carry
        gates_f = xf_ref[t] + jnp.dot(h_f.astype(jnp.bfloat16), whh_f,
                                      preferred_element_type=jnp.float32)
        gates_b = xb_ref[S - 1 - t] + jnp.dot(h_b.astype(jnp.bfloat16), whh_b,
                                              preferred_element_type=jnp.float32)
        h_f, c_f = cell(gates_f, c_f)
        h_b, c_b = cell(gates_b, c_b)
        m_f = jnp.maximum(m_f, h_f)                              # running max-pool over seq
        m_b = jnp.maximum(m_b, h_b)
        return h_f, c_f, m_f, h_b, c_b, m_b

    zero = jnp.zeros((tB, Hp), jnp.float32)
    ninf = jnp.full((tB, Hp), -jnp.inf, jnp.float32)
    carry = (zero, zero, ninf, zero, zero, ninf)
    _, _, m_f, _, _, m_b = lax.fori_loop(0, S, step, carry,
                                         unroll=True if S <= 16 else 4)

    out_ref[...] = jnp.tanh(jnp.concatenate([m_f, m_b], axis=-1))


def _round_up(x, m):
    return (x + m - 1) // m * m


def _reorder_pad_gate_cols(w, H, Hp):
    """PyTorch gate order (i, f, g, o) -> kernel order (i, f, o, g); pad each H block to Hp."""
    i, f, g, o = (w[:, k * H:(k + 1) * H] for k in range(4))
    pad = lambda blk: jnp.pad(blk, ((0, 0), (0, Hp - H)))
    return jnp.concatenate([pad(i), pad(f), pad(o), pad(g)], axis=1)


@functools.partial(jax.jit, static_argnames=("hidden_size",))
def seq_encoder_forward(token_ids, params, hidden_size):
    B, S = token_ids.shape
    E = params["embedding"].shape[1]
    H = hidden_size

    Ep = _round_up(E, 128)                      # lane-align contraction dim
    Hp = _round_up(H, 128)                      # lane-align gate blocks
    tile_b = min(_round_up(B, 16), 128)         # sublane-aligned batch tile
    B_pad = _round_up(B, tile_b)

    # Embedding gather directly in time-major order -> (S, B, E); pad + bf16.
    emb = params["embedding"][token_ids.T].astype(jnp.float32)
    emb = jnp.pad(emb, ((0, 0), (0, B_pad - B), (0, Ep - E))).astype(jnp.bfloat16)

    # Weight prep: gate reorder, pad, concat both directions' input weights.
    def prep_wih(w):                            # (E, 4H) -> (Ep, 4Hp)
        return _reorder_pad_gate_cols(jnp.pad(w, ((0, Ep - E), (0, 0))), H, Hp)

    def prep_whh(w):                            # (H, 4H) -> (Hp, 4Hp)
        return _reorder_pad_gate_cols(jnp.pad(w, ((0, Hp - H), (0, 0))), H, Hp)

    w_in = jnp.concatenate([prep_wih(params["wih_f"]),
                            prep_wih(params["wih_b"])], axis=1).astype(jnp.bfloat16)
    b_in = jnp.concatenate([_reorder_pad_gate_cols(params["b_f"], H, Hp),
                            _reorder_pad_gate_cols(params["b_b"], H, Hp)],
                           axis=1).astype(jnp.float32)
    whh_f = prep_whh(params["whh_f"]).astype(jnp.bfloat16)
    whh_b = prep_whh(params["whh_b"]).astype(jnp.bfloat16)

    num_tiles = B_pad // tile_b

    # Explicit VMEM budget (double-buffered inputs + resident f32 xproj scratch).
    vmem_bytes = int(
        2 * S * tile_b * Ep * 2 +               # emb tile (bf16), 2 buffers
        2 * Ep * 8 * Hp * 2 +                   # w_in (bf16)
        2 * 2 * Hp * 4 * Hp * 2 +               # whh_f / whh_b (bf16)
        2 * 8 * Hp * 4 +                        # bias (f32)
        2 * tile_b * 2 * Hp * 4 +               # out tile (f32), 2 buffers
        S * tile_b * 8 * Hp * 4)                # xf/xb scratch (f32)
    vmem_limit = int(min(100 * 2**20, max(32 * 2**20, 1.5 * vmem_bytes)))

    out = pl.pallas_call(
        seq_encoder_kernel,
        out_shape=jax.ShapeDtypeStruct((B_pad, 2 * Hp), jnp.float32),
        grid_spec=pltpu.PrefetchScalarGridSpec(
            num_scalar_prefetch=0,
            grid=(num_tiles,),
            in_specs=[
                pl.BlockSpec((S, tile_b, Ep), lambda b: (0, b, 0)),   # emb tile
                pl.BlockSpec((Ep, 8 * Hp), lambda b: (0, 0)),         # w_in (resident)
                pl.BlockSpec((1, 8 * Hp), lambda b: (0, 0)),          # bias (resident)
                pl.BlockSpec((Hp, 4 * Hp), lambda b: (0, 0)),         # whh_f (resident)
                pl.BlockSpec((Hp, 4 * Hp), lambda b: (0, 0)),         # whh_b (resident)
            ],
            out_specs=pl.BlockSpec((tile_b, 2 * Hp), lambda b: (b, 0)),
            scratch_shapes=[
                pltpu.VMEM((S, tile_b, 4 * Hp), jnp.float32),
                pltpu.VMEM((S, tile_b, 4 * Hp), jnp.float32),
            ]),
        compiler_params=pltpu.CompilerParams(
            dimension_semantics=("parallel",),
            vmem_limit_bytes=vmem_limit),
    )(emb, w_in, b_in, whh_f, whh_b)

    # Strip padding: real fwd cols [0:H], real bwd cols [Hp:Hp+H]; real rows [:B].
    return jnp.concatenate([out[:B, :H], out[:B, Hp:Hp + H]], axis=-1)


def init_params(key, vocab_size, emb_size, hidden_size):
    """Deterministic synthetic parameters (shapes match nn.Embedding + bi-LSTM,
    PyTorch gate order (i, f, g, o) along the 4H axis, b = b_ih + b_hh)."""
    ks = jax.random.split(key, 9)
    E, H = emb_size, hidden_size

    def xavier(k, shape):
        fan_out, fan_in = shape[1], shape[0]
        std = (2.0 / (fan_in + fan_out)) ** 0.5
        return std * jax.random.normal(k, shape, jnp.float32)

    embedding = jax.random.normal(ks[0], (vocab_size, E), jnp.float32)
    embedding = embedding.at[0].set(0.0)                        # padding_idx=0

    params = {
        "embedding": embedding,
        # forward direction
        "wih_f": xavier(ks[1], (E, 4 * H)),
        "whh_f": xavier(ks[2], (H, 4 * H)),
        "b_f": 0.1 * jax.random.normal(ks[3], (1, 4 * H), jnp.float32),
        # backward direction
        "wih_b": xavier(ks[4], (E, 4 * H)),
        "whh_b": xavier(ks[5], (H, 4 * H)),
        "b_b": 0.1 * jax.random.normal(ks[6], (1, 4 * H), jnp.float32),
    }
    return params


def seq_encoder_reference(token_ids, params, hidden_size):
    """Pure-JAX f32 reference of the PyTorch forward (eval mode)."""
    H = hidden_size
    emb = params["embedding"][token_ids].astype(jnp.float32)    # (B, S, E)
    B, S, E = emb.shape

    def run_dir(wih, whh, b, reverse):
        xs = jnp.transpose(emb, (1, 0, 2))                      # (S, B, E)
        if reverse:
            xs = xs[::-1]

        def step(carry, x_t):
            h, c = carry
            gates = x_t @ wih + h @ whh + b[0]
            i_g, f_g, g_g, o_g = jnp.split(gates, 4, axis=-1)
            i_g, f_g, o_g = jax.nn.sigmoid(i_g), jax.nn.sigmoid(f_g), jax.nn.sigmoid(o_g)
            g_g = jnp.tanh(g_g)
            c = f_g * c + i_g * g_g
            h = o_g * jnp.tanh(c)
            return (h, c), h

        h0 = jnp.zeros((B, H), jnp.float32)
        c0 = jnp.zeros((B, H), jnp.float32)
        _, hs = lax.scan(step, (h0, c0), xs)                    # (S, B, H)
        if reverse:
            hs = hs[::-1]
        return hs

    hf = run_dir(params["wih_f"], params["whh_f"], params["b_f"], reverse=False)
    hb = run_dir(params["wih_b"], params["whh_b"], params["b_b"], reverse=True)
    rnn_out = jnp.concatenate([hf, hb], axis=-1)                # (S, B, 2H)
    pooled = jnp.max(rnn_out, axis=0)                           # (B, 2H) == max_pool1d over seq
    return jnp.tanh(pooled)


if __name__ == "__main__":
    vocab_size, emb_size, hidden_size = 50, 32, 32
    batch, seq_len = 2, 8

    key = jax.random.PRNGKey(0)
    k_tok, k_par = jax.random.split(key)
    token_ids = jax.random.randint(k_tok, (batch, seq_len), 0, vocab_size, jnp.int32)
    params = init_params(k_par, vocab_size, emb_size, hidden_size)

    out = seq_encoder_forward(token_ids, params, hidden_size)
    out = jax.block_until_ready(out)

    ref = seq_encoder_reference(token_ids, params, hidden_size)
    assert out.shape == (batch, 2 * hidden_size), out.shape
    # bf16 matmul path -> relaxed tolerance vs f32 reference.
    max_err = float(jnp.max(jnp.abs(out - ref)))
    assert jnp.allclose(out, ref, atol=2e-2, rtol=2e-2), max_err

    print("KERNEL_OK")
</pallas_src>

<mosaic_0001>
module attributes {stable_mosaic.version = 11 : i64} {
  func.func @seq_encoder_kernel(%arg0: i32, %arg1: memref<8x16x128xbf16, #tpu.memory_space<vmem>>, %arg2: memref<128x1024xbf16, #tpu.memory_space<vmem>>, %arg3: memref<1x1024xf32, #tpu.memory_space<vmem>>, %arg4: memref<128x512xbf16, #tpu.memory_space<vmem>>, %arg5: memref<128x512xbf16, #tpu.memory_space<vmem>>, %arg6: memref<16x256xf32, #tpu.memory_space<vmem>>, %arg7: memref<8x16x512xf32, #tpu.memory_space<vmem>>, %arg8: memref<8x16x512xf32, #tpu.memory_space<vmem>>) attributes {dimension_semantics = [#tpu.dimension_semantics<parallel>], iteration_bounds = array<i64: 1>, scalar_prefetch = 0 : i64, scratch_operands = 2 : i64, tpu.core_type = #tpu.core_type<tc>, window_params = [{transform_indices = @transform_0, window_bounds = array<i64: 8, 16, 128>}, {pipeline_mode = #tpu.pipeline_mode<synchronous>, transform_indices = @transform_1, window_bounds = array<i64: 128, 1024>}, {pipeline_mode = #tpu.pipeline_mode<synchronous>, transform_indices = @transform_2, window_bounds = array<i64: 1, 1024>}, {pipeline_mode = #tpu.pipeline_mode<synchronous>, transform_indices = @transform_3, window_bounds = array<i64: 128, 512>}, {pipeline_mode = #tpu.pipeline_mode<synchronous>, transform_indices = @transform_4, window_bounds = array<i64: 128, 512>}, {transform_indices = @transform_5, window_bounds = array<i64: 16, 256>}]} {
    %c0 = arith.constant 0 : index
    %c0_0 = arith.constant 0 : index
    %c0_1 = arith.constant 0 : index
    %0 = vector.load %arg1[%c0, %c0_0, %c0_1] : memref<8x16x128xbf16, #tpu.memory_space<vmem>>, vector<8x16x128xbf16>
    %1 = vector.shape_cast %0 : vector<8x16x128xbf16> to vector<128x128xbf16>
    %c0_2 = arith.constant 0 : index
    %c0_3 = arith.constant 0 : index
    %2 = vector.load %arg2[%c0_2, %c0_3] : memref<128x1024xbf16, #tpu.memory_space<vmem>>, vector<128x1024xbf16>
    %cst = arith.constant dense<0.000000e+00> : vector<128x1024xf32>
    %3 = tpu.matmul %1, %2, %cst {dimension_numbers = #tpu.dot_dimension_numbers<[1], [0], [0], [1], [0, 0, 1, 1], [], []>} : vector<128x128xbf16>, vector<128x1024xbf16>, vector<128x1024xf32> -> vector<128x1024xf32>
    %c0_4 = arith.constant 0 : index
    %c0_5 = arith.constant 0 : index
    %4 = vector.load %arg3[%c0_4, %c0_5] : memref<1x1024xf32, #tpu.memory_space<vmem>>, vector<1x1024xf32>
    %5 = vector.broadcast %4 : vector<1x1024xf32> to vector<128x1024xf32>
    %6 = arith.addf %3, %5 : vector<128x1024xf32>
    %7 = vector.extract_strided_slice %6 {offsets = [0, 0], sizes = [128, 512], strides = [1, 1]} : vector<128x1024xf32> to vector<128x512xf32>
    %8 = vector.shape_cast %7 : vector<128x512xf32> to vector<8x16x512xf32>
    %c0_6 = arith.constant 0 : index
    %c0_7 = arith.constant 0 : index
    %c0_8 = arith.constant 0 : index
    %9 = vector.load %arg7[%c0_6, %c0_7, %c0_8] : memref<8x16x512xf32, #tpu.memory_space<vmem>>, vector<8x16x512xf32>
    tpu.vector_store %arg7[%c0_6, %c0_7, %c0_8], %8 {strides = array<i32>} : memref<8x16x512xf32, #tpu.memory_space<vmem>>, vector<8x16x512xf32>,
    %10 = vector.extract_strided_slice %6 {offsets = [0, 512], sizes = [128, 512], strides = [1, 1]} : vector<128x1024xf32> to vector<128x512xf32>
    %11 = vector.shape_cast %10 : vector<128x512xf32> to vector<8x16x512xf32>
    %c0_9 = arith.constant 0 : index
    %c0_10 = arith.constant 0 : index
    %c0_11 = arith.constant 0 : index
    %12 = vector.load %arg8[%c0_9, %c0_10, %c0_11] : memref<8x16x512xf32, #tpu.memory_space<vmem>>, vector<8x16x512xf32>
    tpu.vector_store %arg8[%c0_9, %c0_10, %c0_11], %11 {strides = array<i32>} : memref<8x16x512xf32, #tpu.memory_space<vmem>>, vector<8x16x512xf32>,
    %c0_12 = arith.constant 0 : index
    %c0_13 = arith.constant 0 : index
    %13 = vector.load %arg4[%c0_12, %c0_13] : memref<128x512xbf16, #tpu.memory_space<vmem>>, vector<128x512xbf16>
    %c0_14 = arith.constant 0 : index
    %c0_15 = arith.constant 0 : index
    %14 = vector.load %arg5[%c0_14, %c0_15] : memref<128x512xbf16, #tpu.memory_space<vmem>>, vector<128x512xbf16>
    %cst_16 = arith.constant 0.000000e+00 : f32
    %15 = vector.broadcast %cst_16 : f32 to vector<16x128xf32>
    %cst_17 = arith.constant 0xFF800000 : f32
    %16 = vector.broadcast %cst_17 : f32 to vector<16x128xf32>
    %c0_i32 = arith.constant 0 : i32
    %17 = arith.index_cast %c0_i32 : i32 to index
    %c0_18 = arith.constant 0 : index
    %c0_19 = arith.constant 0 : index
    %18 = vector.load %arg7[%17, %c0_18, %c0_19] : memref<8x16x512xf32, #tpu.memory_space<vmem>>, vector<1x16x512xf32>
    %19 = vector.shape_cast %18 : vector<1x16x512xf32> to vector<16x512xf32>
    %20 = arith.truncf %15 : vector<16x128xf32> to vector<16x128xbf16>
    %cst_20 = arith.constant dense<0.000000e+00> : vector<16x512xf32>
    %21 = tpu.matmul %20, %13, %cst_20 {dimension_numbers = #tpu.dot_dimension_numbers<[1], [0], [0], [1], [0, 0, 1, 1], [], []>} : vector<16x128xbf16>, vector<128x512xbf16>, vector<16x512xf32> -> vector<16x512xf32>
    %22 = arith.addf %19, %21 : vector<16x512xf32>
    %c7_i32 = arith.constant 7 : i32
    %23 = arith.subi %c7_i32, %c0_i32 : i32
    %24 = arith.index_cast %23 : i32 to index
    %c0_21 = arith.constant 0 : index
    %c0_22 = arith.constant 0 : index
    %25 = vector.load %arg8[%24, %c0_21, %c0_22] : memref<8x16x512xf32, #tpu.memory_space<vmem>>, vector<1x16x512xf32>
    %26 = vector.shape_cast %25 : vector<1x16x512xf32> to vector<16x512xf32>
    %27 = arith.truncf %15 : vector<16x128xf32> to vector<16x128xbf16>
    %cst_23 = arith.constant dense<0.000000e+00> : vector<16x512xf32>
    %28 = tpu.matmul %27, %14, %cst_23 {dimension_numbers = #tpu.dot_dimension_numbers<[1], [0], [0], [1], [0, 0, 1, 1], [], []>} : vector<16x128xbf16>, vector<128x512xbf16>, vector<16x512xf32> -> vector<16x512xf32>
    %29 = arith.addf %26, %28 : vector<16x512xf32>
    %30 = vector.extract_strided_slice %22 {offsets = [0, 0], sizes = [16, 384], strides = [1, 1]} : vector<16x512xf32> to vector<16x384xf32>
    %31 = arith.negf %30 : vector<16x384xf32>
    %32 = math.exp %31 : vector<16x384xf32>
    %cst_24 = arith.constant 1.000000e+00 : f32
    %33 = vector.broadcast %cst_24 : f32 to vector<16x384xf32>
    %34 = arith.addf %33, %32 : vector<16x384xf32>
    %35 = arith.divf %33, %34 : vector<16x384xf32>
    %36 = vector.extract_strided_slice %35 {offsets = [0, 0], sizes = [16, 128], strides = [1, 1]} : vector<16x384xf32> to vector<16x128xf32>
    %37 = vector.extract_strided_slice %35 {offsets = [0, 128], sizes = [16, 128], strides = [1, 1]} : vector<16x384xf32> to vector<16x128xf32>
    %38 = vector.extract_strided_slice %35 {offsets = [0, 256], sizes = [16, 128], strides = [1, 1]} : vector<16x384xf32> to vector<16x128xf32>
    %39 = vector.extract_strided_slice %22 {offsets = [0, 384], sizes = [16, 128], strides = [1, 1]} : vector<16x512xf32> to vector<16x128xf32>
    %40 = math.tanh %39 : vector<16x128xf32>
    %41 = arith.mulf %37, %15 : vector<16x128xf32>
    %42 = arith.mulf %36, %40 : vector<16x128xf32>
    %43 = arith.addf %41, %42 : vector<16x128xf32>
    %44 = math.tanh %43 : vector<16x128xf32>
    %45 = arith.mulf %38, %44 : vector<16x128xf32>
    %46 = vector.extract_strided_slice %29 {offsets = [0, 0], sizes = [16, 384], strides = [1, 1]} : vector<16x512xf32> to vector<16x384xf32>
    %47 = arith.negf %46 : vector<16x384xf32>
    %48 = math.exp %47 : vector<16x384xf32>
    %cst_25 = arith.constant 1.000000e+00 : f32
    %49 = vector.broadcast %cst_25 : f32 to vector<16x384xf32>
    %50 = arith.addf %49, %48 : vector<16x384xf32>
    %51 = arith.divf %49, %50 : vector<16x384xf32>
    %52 = vector.extract_strided_slice %51 {offsets = [0, 0], sizes = [16, 128], strides = [1, 1]} : vector<16x384xf32> to vector<16x128xf32>
    %53 = vector.extract_strided_slice %51 {offsets = [0, 128], sizes = [16, 128], strides = [1, 1]} : vector<16x384xf32> to vector<16x128xf32>
    %54 = vector.extract_strided_slice %51 {offsets = [0, 256], sizes = [16, 128], strides = [1, 1]} : vector<16x384xf32> to vector<16x128xf32>
    %55 = vector.extract_strided_slice %29 {offsets = [0, 384], sizes = [16, 128], strides = [1, 1]} : vector<16x512xf32> to vector<16x128xf32>
    %56 = math.tanh %55 : vector<16x128xf32>
    %57 = arith.mulf %53, %15 : vector<16x128xf32>
    %58 = arith.mulf %52, %56 : vector<16x128xf32>
    %59 = arith.addf %57, %58 : vector<16x128xf32>
    %60 = math.tanh %59 : vector<16x128xf32>
    %61 = arith.mulf %54, %60 : vector<16x128xf32>
    %62 = arith.maximumf %16, %45 : vector<16x128xf32>
    %63 = arith.maximumf %16, %61 : vector<16x128xf32>
    %c1_i32 = arith.constant 1 : i32
    %64 = arith.index_cast %c1_i32 : i32 to index
    %c0_26 = arith.constant 0 : index
    %c0_27 = arith.constant 0 : index
    %65 = vector.load %arg7[%64, %c0_26, %c0_27] : memref<8x16x512xf32, #tpu.memory_space<vmem>>, vector<1x16x512xf32>
    %66 = vector.shape_cast %65 : vector<1x16x512xf32> to vector<16x512xf32>
    %67 = arith.truncf %45 : vector<16x128xf32> to vector<16x128xbf16>
    %cst_28 = arith.constant dense<0.000000e+00> : vector<16x512xf32>
    %68 = tpu.matmul %67, %13, %cst_28 {dimension_numbers = #tpu.dot_dimension_numbers<[1], [0], [0], [1], [0, 0, 1, 1], [], []>} : vector<16x128xbf16>, vector<128x512xbf16>, vector<16x512xf32> -> vector<16x512xf32>
    %69 = arith.addf %66, %68 : vector<16x512xf32>
    %c7_i32_29 = arith.constant 7 : i32
    %70 = arith.subi %c7_i32_29, %c1_i32 : i32
    %71 = arith.index_cast %70 : i32 to index
    %c0_30 = arith.constant 0 : index
    %c0_31 = arith.constant 0 : index
    %72 = vector.load %arg8[%71, %c0_30, %c0_31] : memref<8x16x512xf32, #tpu.memory_space<vmem>>, vector<1x16x512xf32>
    %73 = vector.shape_cast %72 : vector<1x16x512xf32> to vector<16x512xf32>
    %74 = arith.truncf %61 : vector<16x128xf32> to vector<16x128xbf16>
    %cst_32 = arith.constant dense<0.000000e+00> : vector<16x512xf32>
    %75 = tpu.matmul %74, %14, %cst_32 {dimension_numbers = #tpu.dot_dimension_numbers<[1], [0], [0], [1], [0, 0, 1, 1], [], []>} : vector<16x128xbf16>, vector<128x512xbf16>, vector<16x512xf32> -> vector<16x512xf32>
    %76 = arith.addf %73, %75 : vector<16x512xf32>
    %77 = vector.extract_strided_slice %69 {offsets = [0, 0], sizes = [16, 384], strides = [1, 1]} : vector<16x512xf32> to vector<16x384xf32>
    %78 = arith.negf %77 : vector<16x384xf32>
    %79 = math.exp %78 : vector<16x384xf32>
    %cst_33 = arith.constant 1.000000e+00 : f32
    %80 = vector.broadcast %cst_33 : f32 to vector<16x384xf32>
    %81 = arith.addf %80, %79 : vector<16x384xf32>
    %82 = arith.divf %80, %81 : vector<16x384xf32>
    %83 = vector.extract_strided_slice %82 {offsets = [0, 0], sizes = [16, 128], strides = [1, 1]} : vector<16x384xf32> to vector<16x128xf32>
    %84 = vector.extract_strided_slice %82 {offsets = [0, 128], sizes = [16, 128], strides = [1, 1]} : vector<16x384xf32> to vector<16x128xf32>
    %85 = vector.extract_strided_slice %82 {offsets = [0, 256], sizes = [16, 128], strides = [1, 1]} : vector<16x384xf32> to vector<16x128xf32>
    %86 = vector.extract_strided_slice %69 {offsets = [0, 384], sizes = [16, 128], strides = [1, 1]} : vector<16x512xf32> to vector<16x128xf32>
    %87 = math.tanh %86 : vector<16x128xf32>
    %88 = arith.mulf %84, %43 : vector<16x128xf32>
    %89 = arith.mulf %83, %87 : vector<16x128xf32>
    %90 = arith.addf %88, %89 : vector<16x128xf32>
    %91 = math.tanh %90 : vector<16x128xf32>
    %92 = arith.mulf %85, %91 : vector<16x128xf32>
    %93 = vector.extract_strided_slice %76 {offsets = [0, 0], sizes = [16, 384], strides = [1, 1]} : vector<16x512xf32> to vector<16x384xf32>
    %94 = arith.negf %93 : vector<16x384xf32>
    %95 = math.exp %94 : vector<16x384xf32>
    %cst_34 = arith.constant 1.000000e+00 : f32
    %96 = vector.broadcast %cst_34 : f32 to vector<16x384xf32>
    %97 = arith.addf %96, %95 : vector<16x384xf32>
    %98 = arith.divf %96, %97 : vector<16x384xf32>
    %99 = vector.extract_strided_slice %98 {offsets = [0, 0], sizes = [16, 128], strides = [1, 1]} : vector<16x384xf32> to vector<16x128xf32>
    %100 = vector.extract_strided_slice %98 {offsets = [0, 128], sizes = [16, 128], strides = [1, 1]} : vector<16x384xf32> to vector<16x128xf32>
    %101 = vector.extract_strided_slice %98 {offsets = [0, 256], sizes = [16, 128], strides = [1, 1]} : vector<16x384xf32> to vector<16x128xf32>
    %102 = vector.extract_strided_slice %76 {offsets = [0, 384], sizes = [16, 128], strides = [1, 1]} : vector<16x512xf32> to vector<16x128xf32>
    %103 = math.tanh %102 : vector<16x128xf32>
    %104 = arith.mulf %100, %59 : vector<16x128xf32>
    %105 = arith.mulf %99, %103 : vector<16x128xf32>
    %106 = arith.addf %104, %105 : vector<16x128xf32>
    %107 = math.tanh %106 : vector<16x128xf32>
    %108 = arith.mulf %101, %107 : vector<16x128xf32>
    %109 = arith.maximumf %62, %92 : vector<16x128xf32>
    %110 = arith.maximumf %63, %108 : vector<16x128xf32>
    %c2_i32 = arith.constant 2 : i32
    %111 = arith.index_cast %c2_i32 : i32 to index
    %c0_35 = arith.constant 0 : index
    %c0_36 = arith.constant 0 : index
    %112 = vector.load %arg7[%111, %c0_35, %c0_36] : memref<8x16x512xf32, #tpu.memory_space<vmem>>, vector<1x16x512xf32>
    %113 = vector.shape_cast %112 : vector<1x16x512xf32> to vector<16x512xf32>
    %114 = arith.truncf %92 : vector<16x128xf32> to vector<16x128xbf16>
    %cst_37 = arith.constant dense<0.000000e+00> : vector<16x512xf32>
    %115 = tpu.matmul %114, %13, %cst_37 {dimension_numbers = #tpu.dot_dimension_numbers<[1], [0], [0], [1], [0, 0, 1, 1], [], []>} : vector<16x128xbf16>, vector<128x512xbf16>, vector<16x512xf32> -> vector<16x512xf32>
    %116 = arith.addf %113, %115 : vector<16x512xf32>
    %c7_i32_38 = arith.constant 7 : i32
    %117 = arith.subi %c7_i32_38, %c2_i32 : i32
    %118 = arith.index_cast %117 : i32 to index
    %c0_39 = arith.constant 0 : index
    %c0_40 = arith.constant 0 : index
    %119 = vector.load %arg8[%118, %c0_39, %c0_40] : memref<8x16x512xf32, #tpu.memory_space<vmem>>, vector<1x16x512xf32>
    %120 = vector.shape_cast %119 : vector<1x16x512xf32> to vector<16x512xf32>
    %121 = arith.truncf %108 : vector<16x128xf32> to vector<16x128xbf16>
    %cst_41 = arith.constant dense<0.000000e+00> : vector<16x512xf32>
    %122 = tpu.matmul %121, %14, %cst_41 {dimension_numbers = #tpu.dot_dimension_numbers<[1], [0], [0], [1], [0, 0, 1, 1], [], []>} : vector<16x128xbf16>, vector<128x512xbf16>, vector<16x512xf32> -> vector<16x512xf32>
    %123 = arith.addf %120, %122 : vector<16x512xf32>
    %124 = vector.extract_strided_slice %116 {offsets = [0, 0], sizes = [16, 384], strides = [1, 1]} : vector<16x512xf32> to vector<16x384xf32>
    %125 = arith.negf %124 : vector<16x384xf32>
    %126 = math.exp %125 : vector<16x384xf32>
    %cst_42 = arith.constant 1.000000e+00 : f32
    %127 = vector.broadcast %cst_42 : f32 to vector<16x384xf32>
    %128 = arith.addf %127, %126 : vector<16x384xf32>
    %129 = arith.divf %127, %128 : vector<16x384xf32>
    %130 = vector.extract_strided_slice %129 {offsets = [0, 0], sizes = [16, 128], strides = [1, 1]} : vector<16x384xf32> to vector<16x128xf32>
    %131 = vector.extract_strided_slice %129 {offsets = [0, 128], sizes = [16, 128], strides = [1, 1]} : vector<16x384xf32> to vector<16x128xf32>
    %132 = vector.extract_strided_slice %129 {offsets = [0, 256], sizes = [16, 128], strides = [1, 1]} : vector<16x384xf32> to vector<16x128xf32>
    %133 = vector.extract_strided_slice %116 {offsets = [0, 384], sizes = [16, 128], strides = [1, 1]} : vector<16x512xf32> to vector<16x128xf32>
    %134 = math.tanh %133 : vector<16x128xf32>
    %135 = arith.mulf %131, %90 : vector<16x128xf32>
    %136 = arith.mulf %130, %134 : vector<16x128xf32>
    %137 = arith.addf %135, %136 : vector<16x128xf32>
    %138 = math.tanh %137 : vector<16x128xf32>
    %139 = arith.mulf %132, %138 : vector<16x128xf32>
    %140 = vector.extract_strided_slice %123 {offsets = [0, 0], sizes = [16, 384], strides = [1, 1]} : vector<16x512xf32> to vector<16x384xf32>
    %141 = arith.negf %140 : vector<16x384xf32>
    %142 = math.exp %141 : vector<16x384xf32>
    %cst_43 = arith.constant 1.000000e+00 : f32
    %143 = vector.broadcast %cst_43 : f32 to vector<16x384xf32>
    %144 = arith.addf %143, %142 : vector<16x384xf32>
    %145 = arith.divf %143, %144 : vector<16x384xf32>
    %146 = vector.extract_strided_slice %145 {offsets = [0, 0], sizes = [16, 128], strides = [1, 1]} : vector<16x384xf32> to vector<16x128xf32>
    %147 = vector.extract_strided_slice %145 {offsets = [0, 128], sizes = [16, 128], strides = [1, 1]} : vector<16x384xf32> to vector<16x128xf32>
    %148 = vector.extract_strided_slice %145 {offsets = [0, 256], sizes = [16, 128], strides = [1, 1]} : vector<16x384xf32> to vector<16x128xf32>
    %149 = vector.extract_strided_slice %123 {offsets = [0, 384], sizes = [16, 128], strides = [1, 1]} : vector<16x512xf32> to vector<16x128xf32>
    %150 = math.tanh %149 : vector<16x128xf32>
    %151 = arith.mulf %147, %106 : vector<16x128xf32>
    %152 = arith.mulf %146, %150 : vector<16x128xf32>
    %153 = arith.addf %151, %152 : vector<16x128xf32>
    %154 = math.tanh %153 : vector<16x128xf32>
    %155 = arith.mulf %148, %154 : vector<16x128xf32>
    %156 = arith.maximumf %109, %139 : vector<16x128xf32>
    %157 = arith.maximumf %110, %155 : vector<16x128xf32>
    %c3_i32 = arith.constant 3 : i32
    %158 = arith.index_cast %c3_i32 : i32 to index
    %c0_44 = arith.constant 0 : index
    %c0_45 = arith.constant 0 : index
    %159 = vector.load %arg7[%158, %c0_44, %c0_45] : memref<8x16x512xf32, #tpu.memory_space<vmem>>, vector<1x16x512xf32>
    %160 = vector.shape_cast %159 : vector<1x16x512xf32> to vector<16x512xf32>
    %161 = arith.truncf %139 : vector<16x128xf32> to vector<16x128xbf16>
    %cst_46 = arith.constant dense<0.000000e+00> : vector<16x512xf32>
    %162 = tpu.matmul %161, %13, %cst_46 {dimension_numbers = #tpu.dot_dimension_numbers<[1], [0], [0], [1], [0, 0, 1, 1], [], []>} : vector<16x128xbf16>, vector<128x512xbf16>, vector<16x512xf32> -> vector<16x512xf32>
    %163 = arith.addf %160, %162 : vector<16x512xf32>
    %c7_i32_47 = arith.constant 7 : i32
    %164 = arith.subi %c7_i32_47, %c3_i32 : i32
    %165 = arith.index_cast %164 : i32 to index
    %c0_48 = arith.constant 0 : index
    %c0_49 = arith.constant 0 : index
    %166 = vector.load %arg8[%165, %c0_48, %c0_49] : memref<8x16x512xf32, #tpu.memory_space<vmem>>, vector<1x16x512xf32>
    %167 = vector.shape_cast %166 : vector<1x16x512xf32> to vector<16x512xf32>
    %168 = arith.truncf %155 : vector<16x128xf32> to vector<16x128xbf16>
    %cst_50 = arith.constant dense<0.000000e+00> : vector<16x512xf32>
    %169 = tpu.matmul %168, %14, %cst_50 {dimension_numbers = #tpu.dot_dimension_numbers<[1], [0], [0], [1], [0, 0, 1, 1], [], []>} : vector<16x128xbf16>, vector<128x512xbf16>, vector<16x512xf32> -> vector<16x512xf32>
    %170 = arith.addf %167, %169 : vector<16x512xf32>
    %171 = vector.extract_strided_slice %163 {offsets = [0, 0], sizes = [16, 384], strides = [1, 1]} : vector<16x512xf32> to vector<16x384xf32>
    %172 = arith.negf %171 : vector<16x384xf32>
    %173 = math.exp %172 : vector<16x384xf32>
    %cst_51 = arith.constant 1.000000e+00 : f32
    %174 = vector.broadcast %cst_51 : f32 to vector<16x384xf32>
    %175 = arith.addf %174, %173 : vector<16x384xf32>
    %176 = arith.divf %174, %175 : vector<16x384xf32>
    %177 = vector.extract_strided_slice %176 {offsets = [0, 0], sizes = [16, 128], strides = [1, 1]} : vector<16x384xf32> to vector<16x128xf32>
    %178 = vector.extract_strided_slice %176 {offsets = [0, 128], sizes = [16, 128], strides = [1, 1]} : vector<16x384xf32> to vector<16x128xf32>
    %179 = vector.extract_strided_slice %176 {offsets = [0, 256], sizes = [16, 128], strides = [1, 1]} : vector<16x384xf32> to vector<16x128xf32>
    %180 = vector.extract_strided_slice %163 {offsets = [0, 384], sizes = [16, 128], strides = [1, 1]} : vector<16x512xf32> to vector<16x128xf32>
    %181 = math.tanh %180 : vector<16x128xf32>
    %182 = arith.mulf %178, %137 : vector<16x128xf32>
    %183 = arith.mulf %177, %181 : vector<16x128xf32>
    %184 = arith.addf %182, %183 : vector<16x128xf32>
    %185 = math.tanh %184 : vector<16x128xf32>
    %186 = arith.mulf %179, %185 : vector<16x128xf32>
    %187 = vector.extract_strided_slice %170 {offsets = [0, 0], sizes = [16, 384], strides = [1, 1]} : vector<16x512xf32> to vector<16x384xf32>
    %188 = arith.negf %187 : vector<16x384xf32>
    %189 = math.exp %188 : vector<16x384xf32>
    %cst_52 = arith.constant 1.000000e+00 : f32
    %190 = vector.broadcast %cst_52 : f32 to vector<16x384xf32>
    %191 = arith.addf %190, %189 : vector<16x384xf32>
    %192 = arith.divf %190, %191 : vector<16x384xf32>
    %193 = vector.extract_strided_slice %192 {offsets = [0, 0], sizes = [16, 128], strides = [1, 1]} : vector<16x384xf32> to vector<16x128xf32>
    %194 = vector.extract_strided_slice %192 {offsets = [0, 128], sizes = [16, 128], strides = [1, 1]} : vector<16x384xf32> to vector<16x128xf32>
    %195 = vector.extract_strided_slice %192 {offsets = [0, 256], sizes = [16, 128], strides = [1, 1]} : vector<16x384xf32> to vector<16x128xf32>
    %196 = vector.extract_strided_slice %170 {offsets = [0, 384], sizes = [16, 128], strides = [1, 1]} : vector<16x512xf32> to vector<16x128xf32>
    %197 = math.tanh %196 : vector<16x128xf32>
    %198 = arith.mulf %194, %153 : vector<16x128xf32>
    %199 = arith.mulf %193, %197 : vector<16x128xf32>
    %200 = arith.addf %198, %199 : vector<16x128xf32>
    %201 = math.tanh %200 : vector<16x128xf32>
    %202 = arith.mulf %195, %201 : vector<16x128xf32>
    %203 = arith.maximumf %156, %186 : vector<16x128xf32>
    %204 = arith.maximumf %157, %202 : vector<16x128xf32>
    %c4_i32 = arith.constant 4 : i32
    %205 = arith.index_cast %c4_i32 : i32 to index
    %c0_53 = arith.constant 0 : index
    %c0_54 = arith.constant 0 : index
    %206 = vector.load %arg7[%205, %c0_53, %c0_54] : memref<8x16x512xf32, #tpu.memory_space<vmem>>, vector<1x16x512xf32>
    %207 = vector.shape_cast %206 : vector<1x16x512xf32> to vector<16x512xf32>
    %208 = arith.truncf %186 : vector<16x128xf32> to vector<16x128xbf16>
    %cst_55 = arith.constant dense<0.000000e+00> : vector<16x512xf32>
    %209 = tpu.matmul %208, %13, %cst_55 {dimension_numbers = #tpu.dot_dimension_numbers<[1], [0], [0], [1], [0, 0, 1, 1], [], []>} : vector<16x128xbf16>, vector<128x512xbf16>, vector<16x512xf32> -> vector<16x512xf32>
    %210 = arith.addf %207, %209 : vector<16x512xf32>
    %c7_i32_56 = arith.constant 7 : i32
    %211 = arith.subi %c7_i32_56, %c4_i32 : i32
    %212 = arith.index_cast %211 : i32 to index
    %c0_57 = arith.constant 0 : index
    %c0_58 = arith.constant 0 : index
    %213 = vector.load %arg8[%212, %c0_57, %c0_58] : memref<8x16x512xf32, #tpu.memory_space<vmem>>, vector<1x16x512xf32>
    %214 = vector.shape_cast %213 : vector<1x16x512xf32> to vector<16x512xf32>
    %215 = arith.truncf %202 : vector<16x128xf32> to vector<16x128xbf16>
    %cst_59 = arith.constant dense<0.000000e+00> : vector<16x512xf32>
    %216 = tpu.matmul %215, %14, %cst_59 {dimension_numbers = #tpu.dot_dimension_numbers<[1], [0], [0], [1], [0, 0, 1, 1], [], []>} : vector<16x128xbf16>, vector<128x512xbf16>, vector<16x512xf32> -> vector<16x512xf32>
    %217 = arith.addf %214, %216 : vector<16x512xf32>
    %218 = vector.extract_strided_slice %210 {offsets = [0, 0], sizes = [16, 384], strides = [1, 1]} : vector<16x512xf32> to vector<16x384xf32>
    %219 = arith.negf %218 : vector<16x384xf32>
    %220 = math.exp %219 : vector<16x384xf32>
    %cst_60 = arith.constant 1.000000e+00 : f32
    %221 = vector.broadcast %cst_60 : f32 to vector<16x384xf32>
    %222 = arith.addf %221, %220 : vector<16x384xf32>
    %223 = arith.divf %221, %222 : vector<16x384xf32>
    %224 = vector.extract_strided_slice %223 {offsets = [0, 0], sizes = [16, 128], strides = [1, 1]} : vector<16x384xf32> to vector<16x128xf32>
    %225 = vector.extract_strided_slice %223 {offsets = [0, 128], sizes = [16, 128], strides = [1, 1]} : vector<16x384xf32> to vector<16x128xf32>
    %226 = vector.extract_strided_slice %223 {offsets = [0, 256], sizes = [16, 128], strides = [1, 1]} : vector<16x384xf32> to vector<16x128xf32>
    %227 = vector.extract_strided_slice %210 {offsets = [0, 384], sizes = [16, 128], strides = [1, 1]} : vector<16x512xf32> to vector<16x128xf32>
    %228 = math.tanh %227 : vector<16x128xf32>
    %229 = arith.mulf %225, %184 : vector<16x128xf32>
    %230 = arith.mulf %224, %228 : vector<16x128xf32>
    %231 = arith.addf %229, %230 : vector<16x128xf32>
    %232 = math.tanh %231 : vector<16x128xf32>
    %233 = arith.mulf %226, %232 : vector<16x128xf32>
    %234 = vector.extract_strided_slice %217 {offsets = [0, 0], sizes = [16, 384], strides = [1, 1]} : vector<16x512xf32> to vector<16x384xf32>
    %235 = arith.negf %234 : vector<16x384xf32>
    %236 = math.exp %235 : vector<16x384xf32>
    %cst_61 = arith.constant 1.000000e+00 : f32
    %237 = vector.broadcast %cst_61 : f32 to vector<16x384xf32>
    %238 = arith.addf %237, %236 : vector<16x384xf32>
    %239 = arith.divf %237, %238 : vector<16x384xf32>
    %240 = vector.extract_strided_slice %239 {offsets = [0, 0], sizes = [16, 128], strides = [1, 1]} : vector<16x384xf32> to vector<16x128xf32>
    %241 = vector.extract_strided_slice %239 {offsets = [0, 128], sizes = [16, 128], strides = [1, 1]} : vector<16x384xf32> to vector<16x128xf32>
    %242 = vector.extract_strided_slice %239 {offsets = [0, 256], sizes = [16, 128], strides = [1, 1]} : vector<16x384xf32> to vector<16x128xf32>
    %243 = vector.extract_strided_slice %217 {offsets = [0, 384], sizes = [16, 128], strides = [1, 1]} : vector<16x512xf32> to vector<16x128xf32>
    %244 = math.tanh %243 : vector<16x128xf32>
    %245 = arith.mulf %241, %200 : vector<16x128xf32>
    %246 = arith.mulf %240, %244 : vector<16x128xf32>
    %247 = arith.addf %245, %246 : vector<16x128xf32>
    %248 = math.tanh %247 : vector<16x128xf32>
    %249 = arith.mulf %242, %248 : vector<16x128xf32>
    %250 = arith.maximumf %203, %233 : vector<16x128xf32>
    %251 = arith.maximumf %204, %249 : vector<16x128xf32>
    %c5_i32 = arith.constant 5 : i32
    %252 = arith.index_cast %c5_i32 : i32 to index
    %c0_62 = arith.constant 0 : index
    %c0_63 = arith.constant 0 : index
    %253 = vector.load %arg7[%252, %c0_62, %c0_63] : memref<8x16x512xf32, #tpu.memory_space<vmem>>, vector<1x16x512xf32>
    %254 = vector.shape_cast %253 : vector<1x16x512xf32> to vector<16x512xf32>
    %255 = arith.truncf %233 : vector<16x128xf32> to vector<16x128xbf16>
    %cst_64 = arith.constant dense<0.000000e+00> : vector<16x512xf32>
    %256 = tpu.matmul %255, %13, %cst_64 {dimension_numbers = #tpu.dot_dimension_numbers<[1], [0], [0], [1], [0, 0, 1, 1], [], []>} : vector<16x128xbf16>, vector<128x512xbf16>, vector<16x512xf32> -> vector<16x512xf32>
    %257 = arith.addf %254, %256 : vector<16x512xf32>
    %c7_i32_65 = arith.constant 7 : i32
    %258 = arith.subi %c7_i32_65, %c5_i32 : i32
    %259 = arith.index_cast %258 : i32 to index
    %c0_66 = arith.constant 0 : index
    %c0_67 = arith.constant 0 : index
    %260 = vector.load %arg8[%259, %c0_66, %c0_67] : memref<8x16x512xf32, #tpu.memory_space<vmem>>, vector<1x16x512xf32>
    %261 = vector.shape_cast %260 : vector<1x16x512xf32> to vector<16x512xf32>
    %262 = arith.truncf %249 : vector<16x128xf32> to vector<16x128xbf16>
    %cst_68 = arith.constant dense<0.000000e+00> : vector<16x512xf32>
    %263 = tpu.matmul %262, %14, %cst_68 {dimension_numbers = #tpu.dot_dimension_numbers<[1], [0], [0], [1], [0, 0, 1, 1], [], []>} : vector<16x128xbf16>, vector<128x512xbf16>, vector<16x512xf32> -> vector<16x512xf32>
    %264 = arith.addf %261, %263 : vector<16x512xf32>
    %265 = vector.extract_strided_slice %257 {offsets = [0, 0], sizes = [16, 384], strides = [1, 1]} : vector<16x512xf32> to vector<16x384xf32>
    %266 = arith.negf %265 : vector<16x384xf32>
    %267 = math.exp %266 : vector<16x384xf32>
    %cst_69 = arith.constant 1.000000e+00 : f32
    %268 = vector.broadcast %cst_69 : f32 to vector<16x384xf32>
    %269 = arith.addf %268, %267 : vector<16x384xf32>
    %270 = arith.divf %268, %269 : vector<16x384xf32>
    %271 = vector.extract_strided_slice %270 {offsets = [0, 0], sizes = [16, 128], strides = [1, 1]} : vector<16x384xf32> to vector<16x128xf32>
    %272 = vector.extract_strided_slice %270 {offsets = [0, 128], sizes = [16, 128], strides = [1, 1]} : vector<16x384xf32> to vector<16x128xf32>
    %273 = vector.extract_strided_slice %270 {offsets = [0, 256], sizes = [16, 128], strides = [1, 1]} : vector<16x384xf32> to vector<16x128xf32>
    %274 = vector.extract_strided_slice %257 {offsets = [0, 384], sizes = [16, 128], strides = [1, 1]} : vector<16x512xf32> to vector<16x128xf32>
    %275 = math.tanh %274 : vector<16x128xf32>
    %276 = arith.mulf %272, %231 : vector<16x128xf32>
    %277 = arith.mulf %271, %275 : vector<16x128xf32>
    %278 = arith.addf %276, %277 : vector<16x128xf32>
    %279 = math.tanh %278 : vector<16x128xf32>
    %280 = arith.mulf %273, %279 : vector<16x128xf32>
    %281 = vector.extract_strided_slice %264 {offsets = [0, 0], sizes = [16, 384], strides = [1, 1]} : vector<16x512xf32> to vector<16x384xf32>
    %282 = arith.negf %281 : vector<16x384xf32>
    %283 = math.exp %282 : vector<16x384xf32>
    %cst_70 = arith.constant 1.000000e+00 : f32
    %284 = vector.broadcast %cst_70 : f32 to vector<16x384xf32>
    %285 = arith.addf %284, %283 : vector<16x384xf32>
    %286 = arith.divf %284, %285 : vector<16x384xf32>
    %287 = vector.extract_strided_slice %286 {offsets = [0, 0], sizes = [16, 128], strides = [1, 1]} : vector<16x384xf32> to vector<16x128xf32>
    %288 = vector.extract_strided_slice %286 {offsets = [0, 128], sizes = [16, 128], strides = [1, 1]} : vector<16x384xf32> to vector<16x128xf32>
    %289 = vector.extract_strided_slice %286 {offsets = [0, 256], sizes = [16, 128], strides = [1, 1]} : vector<16x384xf32> to vector<16x128xf32>
    %290 = vector.extract_strided_slice %264 {offsets = [0, 384], sizes = [16, 128], strides = [1, 1]} : vector<16x512xf32> to vector<16x128xf32>
    %291 = math.tanh %290 : vector<16x128xf32>
    %292 = arith.mulf %288, %247 : vector<16x128xf32>
    %293 = arith.mulf %287, %291 : vector<16x128xf32>
    %294 = arith.addf %292, %293 : vector<16x128xf32>
    %295 = math.tanh %294 : vector<16x128xf32>
    %296 = arith.mulf %289, %295 : vector<16x128xf32>
    %297 = arith.maximumf %250, %280 : vector<16x128xf32>
    %298 = arith.maximumf %251, %296 : vector<16x128xf32>
    %c6_i32 = arith.constant 6 : i32
    %299 = arith.index_cast %c6_i32 : i32 to index
    %c0_71 = arith.constant 0 : index
    %c0_72 = arith.constant 0 : index
    %300 = vector.load %arg7[%299, %c0_71, %c0_72] : memref<8x16x512xf32, #tpu.memory_space<vmem>>, vector<1x16x512xf32>
    %301 = vector.shape_cast %300 : vector<1x16x512xf32> to vector<16x512xf32>
    %302 = arith.truncf %280 : vector<16x128xf32> to vector<16x128xbf16>
    %cst_73 = arith.constant dense<0.000000e+00> : vector<16x512xf32>
    %303 = tpu.matmul %302, %13, %cst_73 {dimension_numbers = #tpu.dot_dimension_numbers<[1], [0], [0], [1], [0, 0, 1, 1], [], []>} : vector<16x128xbf16>, vector<128x512xbf16>, vector<16x512xf32> -> vector<16x512xf32>
    %304 = arith.addf %301, %303 : vector<16x512xf32>
    %c7_i32_74 = arith.constant 7 : i32
    %305 = arith.subi %c7_i32_74, %c6_i32 : i32
    %306 = arith.index_cast %305 : i32 to index
    %c0_75 = arith.constant 0 : index
    %c0_76 = arith.constant 0 : index
    %307 = vector.load %arg8[%306, %c0_75, %c0_76] : memref<8x16x512xf32, #tpu.memory_space<vmem>>, vector<1x16x512xf32>
    %308 = vector.shape_cast %307 : vector<1x16x512xf32> to vector<16x512xf32>
    %309 = arith.truncf %296 : vector<16x128xf32> to vector<16x128xbf16>
    %cst_77 = arith.constant dense<0.000000e+00> : vector<16x512xf32>
    %310 = tpu.matmul %309, %14, %cst_77 {dimension_numbers = #tpu.dot_dimension_numbers<[1], [0], [0], [1], [0, 0, 1, 1], [], []>} : vector<16x128xbf16>, vector<128x512xbf16>, vector<16x512xf32> -> vector<16x512xf32>
    %311 = arith.addf %308, %310 : vector<16x512xf32>
    %312 = vector.extract_strided_slice %304 {offsets = [0, 0], sizes = [16, 384], strides = [1, 1]} : vector<16x512xf32> to vector<16x384xf32>
    %313 = arith.negf %312 : vector<16x384xf32>
    %314 = math.exp %313 : vector<16x384xf32>
    %cst_78 = arith.constant 1.000000e+00 : f32
    %315 = vector.broadcast %cst_78 : f32 to vector<16x384xf32>
    %316 = arith.addf %315, %314 : vector<16x384xf32>
    %317 = arith.divf %315, %316 : vector<16x384xf32>
    %318 = vector.extract_strided_slice %317 {offsets = [0, 0], sizes = [16, 128], strides = [1, 1]} : vector<16x384xf32> to vector<16x128xf32>
    %319 = vector.extract_strided_slice %317 {offsets = [0, 128], sizes = [16, 128], strides = [1, 1]} : vector<16x384xf32> to vector<16x128xf32>
    %320 = vector.extract_strided_slice %317 {offsets = [0, 256], sizes = [16, 128], strides = [1, 1]} : vector<16x384xf32> to vector<16x128xf32>
    %321 = vector.extract_strided_slice %304 {offsets = [0, 384], sizes = [16, 128], strides = [1, 1]} : vector<16x512xf32> to vector<16x128xf32>
    %322 = math.tanh %321 : vector<16x128xf32>
    %323 = arith.mulf %319, %278 : vector<16x128xf32>
    %324 = arith.mulf %318, %322 : vector<16x128xf32>
    %325 = arith.addf %323, %324 : vector<16x128xf32>
    %326 = math.tanh %325 : vector<16x128xf32>
    %327 = arith.mulf %320, %326 : vector<16x128xf32>
    %328 = vector.extract_strided_slice %311 {offsets = [0, 0], sizes = [16, 384], strides = [1, 1]} : vector<16x512xf32> to vector<16x384xf32>
    %329 = arith.negf %328 : vector<16x384xf32>
    %330 = math.exp %329 : vector<16x384xf32>
    %cst_79 = arith.constant 1.000000e+00 : f32
    %331 = vector.broadcast %cst_79 : f32 to vector<16x384xf32>
    %332 = arith.addf %331, %330 : vector<16x384xf32>
    %333 = arith.divf %331, %332 : vector<16x384xf32>
    %334 = vector.extract_strided_slice %333 {offsets = [0, 0], sizes = [16, 128], strides = [1, 1]} : vector<16x384xf32> to vector<16x128xf32>
    %335 = vector.extract_strided_slice %333 {offsets = [0, 128], sizes = [16, 128], strides = [1, 1]} : vector<16x384xf32> to vector<16x128xf32>
    %336 = vector.extract_strided_slice %333 {offsets = [0, 256], sizes = [16, 128], strides = [1, 1]} : vector<16x384xf32> to vector<16x128xf32>
    %337 = vector.extract_strided_slice %311 {offsets = [0, 384], sizes = [16, 128], strides = [1, 1]} : vector<16x512xf32> to vector<16x128xf32>
    %338 = math.tanh %337 : vector<16x128xf32>
    %339 = arith.mulf %335, %294 : vector<16x128xf32>
    %340 = arith.mulf %334, %338 : vector<16x128xf32>
    %341 = arith.addf %339, %340 : vector<16x128xf32>
    %342 = math.tanh %341 : vector<16x128xf32>
    %343 = arith.mulf %336, %342 : vector<16x128xf32>
    %344 = arith.maximumf %297, %327 : vector<16x128xf32>
    %345 = arith.maximumf %298, %343 : vector<16x128xf32>
    %c7_i32_80 = arith.constant 7 : i32
    %346 = arith.index_cast %c7_i32_80 : i32 to index
    %c0_81 = arith.constant 0 : index
    %c0_82 = arith.constant 0 : index
    %347 = vector.load %arg7[%346, %c0_81, %c0_82] : memref<8x16x512xf32, #tpu.memory_space<vmem>>, vector<1x16x512xf32>
    %348 = vector.shape_cast %347 : vector<1x16x512xf32> to vector<16x512xf32>
    %349 = arith.truncf %327 : vector<16x128xf32> to vector<16x128xbf16>
    %cst_83 = arith.constant dense<0.000000e+00> : vector<16x512xf32>
    %350 = tpu.matmul %349, %13, %cst_83 {dimension_numbers = #tpu.dot_dimension_numbers<[1], [0], [0], [1], [0, 0, 1, 1], [], []>} : vector<16x128xbf16>, vector<128x512xbf16>, vector<16x512xf32> -> vector<16x512xf32>
    %351 = arith.addf %348, %350 : vector<16x512xf32>
    %c7_i32_84 = arith.constant 7 : i32
    %352 = arith.subi %c7_i32_84, %c7_i32_80 : i32
    %353 = arith.index_cast %352 : i32 to index
    %c0_85 = arith.constant 0 : index
    %c0_86 = arith.constant 0 : index
    %354 = vector.load %arg8[%353, %c0_85, %c0_86] : memref<8x16x512xf32, #tpu.memory_space<vmem>>, vector<1x16x512xf32>
    %355 = vector.shape_cast %354 : vector<1x16x512xf32> to vector<16x512xf32>
    %356 = arith.truncf %343 : vector<16x128xf32> to vector<16x128xbf16>
    %cst_87 = arith.constant dense<0.000000e+00> : vector<16x512xf32>
    %357 = tpu.matmul %356, %14, %cst_87 {dimension_numbers = #tpu.dot_dimension_numbers<[1], [0], [0], [1], [0, 0, 1, 1], [], []>} : vector<16x128xbf16>, vector<128x512xbf16>, vector<16x512xf32> -> vector<16x512xf32>
    %358 = arith.addf %355, %357 : vector<16x512xf32>
    %359 = vector.extract_strided_slice %351 {offsets = [0, 0], sizes = [16, 384], strides = [1, 1]} : vector<16x512xf32> to vector<16x384xf32>
    %360 = arith.negf %359 : vector<16x384xf32>
    %361 = math.exp %360 : vector<16x384xf32>
    %cst_88 = arith.constant 1.000000e+00 : f32
    %362 = vector.broadcast %cst_88 : f32 to vector<16x384xf32>
    %363 = arith.addf %362, %361 : vector<16x384xf32>
    %364 = arith.divf %362, %363 : vector<16x384xf32>
    %365 = vector.extract_strided_slice %364 {offsets = [0, 0], sizes = [16, 128], strides = [1, 1]} : vector<16x384xf32> to vector<16x128xf32>
    %366 = vector.extract_strided_slice %364 {offsets = [0, 128], sizes = [16, 128], strides = [1, 1]} : vector<16x384xf32> to vector<16x128xf32>
    %367 = vector.extract_strided_slice %364 {offsets = [0, 256], sizes = [16, 128], strides = [1, 1]} : vector<16x384xf32> to vector<16x128xf32>
    %368 = vector.extract_strided_slice %351 {offsets = [0, 384], sizes = [16, 128], strides = [1, 1]} : vector<16x512xf32> to vector<16x128xf32>
    %369 = math.tanh %368 : vector<16x128xf32>
    %370 = arith.mulf %366, %325 : vector<16x128xf32>
    %371 = arith.mulf %365, %369 : vector<16x128xf32>
    %372 = arith.addf %370, %371 : vector<16x128xf32>
    %373 = math.tanh %372 : vector<16x128xf32>
    %374 = arith.mulf %367, %373 : vector<16x128xf32>
    %375 = vector.extract_strided_slice %358 {offsets = [0, 0], sizes = [16, 384], strides = [1, 1]} : vector<16x512xf32> to vector<16x384xf32>
    %376 = arith.negf %375 : vector<16x384xf32>
    %377 = math.exp %376 : vector<16x384xf32>
    %cst_89 = arith.constant 1.000000e+00 : f32
    %378 = vector.broadcast %cst_89 : f32 to vector<16x384xf32>
    %379 = arith.addf %378, %377 : vector<16x384xf32>
    %380 = arith.divf %378, %379 : vector<16x384xf32>
    %381 = vector.extract_strided_slice %380 {offsets = [0, 0], sizes = [16, 128], strides = [1, 1]} : vector<16x384xf32> to vector<16x128xf32>
    %382 = vector.extract_strided_slice %380 {offsets = [0, 128], sizes = [16, 128], strides = [1, 1]} : vector<16x384xf32> to vector<16x128xf32>
    %383 = vector.extract_strided_slice %380 {offsets = [0, 256], sizes = [16, 128], strides = [1, 1]} : vector<16x384xf32> to vector<16x128xf32>
    %384 = vector.extract_strided_slice %358 {offsets = [0, 384], sizes = [16, 128], strides = [1, 1]} : vector<16x512xf32> to vector<16x128xf32>
    %385 = math.tanh %384 : vector<16x128xf32>
    %386 = arith.mulf %382, %341 : vector<16x128xf32>
    %387 = arith.mulf %381, %385 : vector<16x128xf32>
    %388 = arith.addf %386, %387 : vector<16x128xf32>
    %389 = math.tanh %388 : vector<16x128xf32>
    %390 = arith.mulf %383, %389 : vector<16x128xf32>
    %391 = arith.maximumf %344, %374 : vector<16x128xf32>
    %392 = arith.maximumf %345, %390 : vector<16x128xf32>
    %c8_i32 = arith.constant 8 : i32
    %393 = tpu.concatenate %391, %392 in 1 : vector<16x128xf32>, vector<16x128xf32> -> vector<16x256xf32>
    %394 = math.tanh %393 : vector<16x256xf32>
    %c0_90 = arith.constant 0 : index
    %c0_91 = arith.constant 0 : index
    %395 = vector.load %arg6[%c0_90, %c0_91] : memref<16x256xf32, #tpu.memory_space<vmem>>, vector<16x256xf32>
    tpu.vector_store %arg6[%c0_90, %c0_91], %394 {strides = array<i32>} : memref<16x256xf32, #tpu.memory_space<vmem>>, vector<16x256xf32>,
    return
  }
  func.func @transform_0(%arg0: i32) -> (i32, i32, i32) {
    %c0_i32 = arith.constant 0 : i32
    %c0_i32_0 = arith.constant 0 : i32
    %c0_i32_1 = arith.constant 0 : i32
    return %c0_i32, %arg0, %c0_i32_0 : i32, i32, i32
  }
  func.func @transform_1(%arg0: i32) -> (i32, i32) {
    %c0_i32 = arith.constant 0 : i32
    %c0_i32_0 = arith.constant 0 : i32
    %c0_i32_1 = arith.constant 0 : i32
    return %c0_i32, %c0_i32_0 : i32, i32
  }
  func.func @transform_2(%arg0: i32) -> (i32, i32) {
    %c0_i32 = arith.constant 0 : i32
    %c0_i32_0 = arith.constant 0 : i32
    %c0_i32_1 = arith.constant 0 : i32
    return %c0_i32, %c0_i32_0 : i32, i32
  }
  func.func @transform_3(%arg0: i32) -> (i32, i32) {
    %c0_i32 = arith.constant 0 : i32
    %c0_i32_0 = arith.constant 0 : i32
    %c0_i32_1 = arith.constant 0 : i32
    return %c0_i32, %c0_i32_0 : i32, i32
  }
  func.func @transform_4(%arg0: i32) -> (i32, i32) {
    %c0_i32 = arith.constant 0 : i32
    %c0_i32_0 = arith.constant 0 : i32
    %c0_i32_1 = arith.constant 0 : i32
    return %c0_i32, %c0_i32_0 : i32, i32
  }
  func.func @transform_5(%arg0: i32) -> (i32, i32) {
    %c0_i32 = arith.constant 0 : i32
    %c0_i32_0 = arith.constant 0 : i32
    return %arg0, %c0_i32 : i32, i32
  }
}

</mosaic_0001>

<bundles_post_ra>
// kernel: seq_encoder_forward.1
= control target key start
LH: loop header
LB: loop body
LE: loop exit
PB: predicated region body
PF: predicated region fallthrough
CT: control target
= control target key end

     0   :  { %v7440_v3 = vmov 0   ;;  %s7434_s1 = inlined_call_operand.vmem [shape: bf16[128,1024], index: 1, kind: input, shape index: {}]   ;;  %s7435_s0 = inlined_call_operand.vmem [shape: bf16[8,16,128], index: 0, kind: input, shape index: {}]   ;;  %s7436_s3 = inlined_call_operand.vmem [shape: bf16[128,512], index: 3, kind: input, shape index: {}]   ;;  %s7437_s4 = inlined_call_operand.vmem [shape: bf16[128,512], index: 4, kind: input, shape index: {}]   ;;  %s7438_s2 = inlined_call_operand.vmem [shape: f32[1,1024], index: 2, kind: input, shape index: {}]   ;;  %s7439_s5 = inlined_call_operand.vmem [shape: f32[16,256], index: 5, kind: output, shape index: {}]  }
   0x1   :  { %v37_v0 = vld [vmem:[%s7434_s1] sm:$0xff]  ;;  %v38_v2 = vld [vmem:[%s7434_s1 + $0x8] sm:$0xff]  ;;  %543 = vmatprep.mubr.bf16.mxu0 %v7440_v3  ;;  %656 = vmatprep.mubr.bf16.mxu1 %v7440_v3  ;;  %v39_v62 = vld [vmem:[%s7434_s1 + $0x10] sm:$0xff] }
   0x2   :  { %v41_v1 = vld [vmem:[%s7434_s1 + $0x20] sm:$0xff]  ;;  %v42_v5 = vld [vmem:[%s7434_s1 + $0x28] sm:$0xff] }
   0x3   :  { %v3952_v4 = vcombine.high %v37_v0, %v41_v1  ;;  %v3951_v6 = vcombine.low %v37_v0, %v41_v1  ;;  %v45_v7 = vld [vmem:[%s7434_s1 + $0x40] sm:$0xff]  ;;  %v3954_v9 = vcombine.high %v38_v2, %v42_v5  ;;  %v3953_v10 = vcombine.low %v38_v2, %v42_v5  ;;  %v46_v12 = vld [vmem:[%s7434_s1 + $0x48] sm:$0xff]  ;;  %v43_v0 = vld [vmem:[%s7434_s1 + $0x30] sm:$0xff] }
   0x4   :  { %v49_v8 = vld [vmem:[%s7434_s1 + $0x60] sm:$0xff]  ;;  %v50_v13 = vld [vmem:[%s7434_s1 + $0x68] sm:$0xff]  ;;  %v40_v1 = vld [vmem:[%s7434_s1 + $0x18] sm:$0xff] }
   0x5   :  { %v3960_v11 = vcombine.high %v45_v7, %v49_v8  ;;  %v53_v14 = vld [vmem:[%s7434_s1 + $0x80] sm:$0xff]  ;;  %511 = vmatprep.subr.bf16.mxu0 %v3952_v4  ;;  %v3962_v15 = vcombine.high %v46_v12, %v50_v13  ;;  %v54_v17 = vld [vmem:[%s7434_s1 + $0x88] sm:$0xff]  ;;  %624 = vmatprep.subr.bf16.mxu1 %v3954_v9  ;;  %v3959_v19 = vcombine.low %v45_v7, %v49_v8  ;;  %v44_v2 = vld [vmem:[%s7434_s1 + $0x38] sm:$0xff] }
   0x6   :  { %v57_v16 = vld [vmem:[%s7434_s1 + $0xa0] sm:$0xff]  ;;  %v58_v18 = vld [vmem:[%s7434_s1 + $0xa8] sm:$0xff]  ;;  %512 = vmatpush1.bf16.msra.mxu0 %v3951_v6  ;;  %625 = vmatpush1.bf16.msra.mxu1 %v3953_v10  ;;  %v3961_v20 = vcombine.low %v46_v12, %v50_v13  ;;  %v3956_v6 = vcombine.high %v39_v62, %v43_v0  ;;  %v47_v8 = vld [vmem:[%s7434_s1 + $0x50] sm:$0xff]  ;;  %v3958_v9 = vcombine.high %v40_v1, %v44_v2 }
   0x7   :  { %513 = vmatprep.subr.bf16.mxu0 %v3960_v11  ;;  %v3968_v21 = vcombine.high %v53_v14, %v57_v16  ;;  %626 = vmatprep.subr.bf16.mxu1 %v3962_v15  ;;  %v3970_v22 = vcombine.high %v54_v17, %v58_v18  ;;  %v61_v23 = vld [vmem:[%s7434_s1 + $0xc0] sm:$0xff]  ;;  %v62_v25 = vld [vmem:[%s7434_s1 + $0xc8] sm:$0xff]  ;;  %v3967_v27 = vcombine.low %v53_v14, %v57_v16  ;;  %v51_v10 = vld [vmem:[%s7434_s1 + $0x70] sm:$0xff] }
   0x8   :  { %v65_v24 = vld [vmem:[%s7434_s1 + $0xe0] sm:$0xff]  ;;  %v66_v26 = vld [vmem:[%s7434_s1 + $0xe8] sm:$0xff]  ;;  %v3969_v28 = vcombine.low %v54_v17, %v58_v18  ;;  %v48_v11 = vld [vmem:[%s7434_s1 + $0x58] sm:$0xff]  ;;  %v3955_v12 = vcombine.low %v39_v62, %v43_v0  ;;  %v3964_v14 = vcombine.high %v47_v8, %v51_v10  ;;  %v3957_v15 = vcombine.low %v40_v1, %v44_v2 }
   0x9   :  { %v3976_v29 = vcombine.high %v61_v23, %v65_v24  ;;  %v3978_v30 = vcombine.high %v62_v25, %v66_v26  ;;  %v69_v31 = vld [vmem:[%s7434_s1 + $0x100] sm:$0xff]  ;;  %v70_v33 = vld [vmem:[%s7434_s1 + $0x108] sm:$0xff]  ;;  %v3975_v35 = vcombine.low %v61_v23, %v65_v24  ;;  %v3977_v36 = vcombine.low %v62_v25, %v66_v26  ;;  %v52_v13 = vld [vmem:[%s7434_s1 + $0x78] sm:$0xff] }
   0xa   :  { %514 = vmatpush1.bf16.msra.mxu0 %v3959_v19  ;;  %627 = vmatpush1.bf16.msra.mxu1 %v3961_v20  ;;  %v73_v32 = vld [vmem:[%s7434_s1 + $0x120] sm:$0xff]  ;;  %v74_v34 = vld [vmem:[%s7434_s1 + $0x128] sm:$0xff]  ;;  %v55_v16 = vld [vmem:[%s7434_s1 + $0x90] sm:$0xff]  ;;  %v3966_v18 = vcombine.high %v48_v11, %v52_v13  ;;  %v3963_v19 = vcombine.low %v47_v8, %v51_v10  ;;  %v3965_v24 = vcombine.low %v48_v11, %v52_v13 }
   0xb   :  { %515 = vmatprep.subr.bf16.mxu0 %v3968_v21  ;;  %628 = vmatprep.subr.bf16.mxu1 %v3970_v22  ;;  %v3984_v37 = vcombine.high %v69_v31, %v73_v32  ;;  %v3986_v38 = vcombine.high %v70_v33, %v74_v34  ;;  %v77_v39 = vld [vmem:[%s7434_s1 + $0x140] sm:$0xff]  ;;  %v78_v41 = vld [vmem:[%s7434_s1 + $0x148] sm:$0xff]  ;;  %v3983_v43 = vcombine.low %v69_v31, %v73_v32  ;;  %v59_v17 = vld [vmem:[%s7434_s1 + $0xb0] sm:$0xff] }
   0xc   :  { %v81_v40 = vld [vmem:[%s7434_s1 + $0x160] sm:$0xff]  ;;  %v82_v42 = vld [vmem:[%s7434_s1 + $0x168] sm:$0xff]  ;;  %v3985_v44 = vcombine.low %v70_v33, %v74_v34  ;;  %v56_v20 = vld [vmem:[%s7434_s1 + $0x98] sm:$0xff]  ;;  %v3972_v22 = vcombine.high %v55_v16, %v59_v17 }
   0xd   :  { %v3992_v45 = vcombine.high %v77_v39, %v81_v40  ;;  %v3994_v46 = vcombine.high %v78_v41, %v82_v42  ;;  %v85_v47 = vld [vmem:[%s7434_s1 + $0x180] sm:$0xff]  ;;  %v86_v49 = vld [vmem:[%s7434_s1 + $0x188] sm:$0xff]  ;;  %v3991_v51 = vcombine.low %v77_v39, %v81_v40  ;;  %v3993_v52 = vcombine.low %v78_v41, %v82_v42  ;;  %v60_v21 = vld [vmem:[%s7434_s1 + $0xb8] sm:$0xff] }
   0xe   :  { %516 = vmatpush1.bf16.msra.mxu0 %v3967_v27  ;;  %629 = vmatpush1.bf16.msra.mxu1 %v3969_v28  ;;  %v89_v48 = vld [vmem:[%s7434_s1 + $0x1a0] sm:$0xff]  ;;  %v90_v50 = vld [vmem:[%s7434_s1 + $0x1a8] sm:$0xff]  ;;  %v63_v25 = vld [vmem:[%s7434_s1 + $0xd0] sm:$0xff]  ;;  %v3974_v27 = vcombine.high %v56_v20, %v60_v21  ;;  %v3973_v32 = vcombine.low %v56_v20, %v60_v21 }
   0xf   :  { %517 = vmatprep.subr.bf16.mxu0 %v3976_v29  ;;  %630 = vmatprep.subr.bf16.mxu1 %v3978_v30  ;;  %v4000_v53 = vcombine.high %v85_v47, %v89_v48  ;;  %v4002_v54 = vcombine.high %v86_v49, %v90_v50  ;;  %v93_v55 = vld [vmem:[%s7434_s1 + $0x1c0] sm:$0xff]  ;;  %v94_v57 = vld [vmem:[%s7434_s1 + $0x1c8] sm:$0xff]  ;;  %v3999_v59 = vcombine.low %v85_v47, %v89_v48  ;;  %v67_v26 = vld [vmem:[%s7434_s1 + $0xf0] sm:$0xff] }
  0x10   :  { %v97_v56 = vld [vmem:[%s7434_s1 + $0x1e0] sm:$0xff]  ;;  %v98_v58 = vld [vmem:[%s7434_s1 + $0x1e8] sm:$0xff]  ;;  %v4001_v60 = vcombine.low %v86_v49, %v90_v50  ;;  %v64_v28 = vld [vmem:[%s7434_s1 + $0xd8] sm:$0xff]  ;;  %v3971_v30 = vcombine.low %v55_v16, %v59_v17  ;;  %v3980_v31 = vcombine.high %v63_v25, %v67_v26 }
  0x11   :  { %v4008_v61 = vcombine.high %v93_v55, %v97_v56  ;;  %v4010_v63 = vcombine.high %v94_v57, %v98_v58  ;;  %v4007_v4 = vcombine.low %v93_v55, %v97_v56  ;;  %v4009_v5 = vcombine.low %v94_v57, %v98_v58  ;;  %v5328_v7 = vld [vmem:[%s7435_s0] sm:$0xff]   ;;  %v5361_v23 = vld [vmem:[%s7435_s0 + $0x8] sm:$0xff]   ;;  %v68_v29 = vld [vmem:[%s7434_s1 + $0xf8] sm:$0xff] }
  0x12   :  { %518 = vmatpush1.bf16.msra.mxu0 %v3975_v35  ;;  %631 = vmatpush1.bf16.msra.mxu1 %v3977_v36  ;;  %v71_v33 = vld [vmem:[%s7434_s1 + $0x110] sm:$0xff]  ;;  %v3982_v35 = vcombine.high %v64_v28, %v68_v29  ;;  %v72_v36 = vld [vmem:[%s7434_s1 + $0x118] sm:$0xff]  ;;  %v3981_v41 = vcombine.low %v64_v28, %v68_v29  ;;  %v5469_v11 = vld [vmem:[%s7435_s0 + $0x28] sm:$0xff]  }
  0x13   :  { %519 = vmatprep.subr.bf16.mxu0 %v3984_v37  ;;  %632 = vmatprep.subr.bf16.mxu1 %v3986_v38  ;;  %v75_v34 = vld [vmem:[%s7434_s1 + $0x130] sm:$0xff]  ;;  %v76_v37 = vld [vmem:[%s7434_s1 + $0x138] sm:$0xff]  ;;  %v3979_v38 = vcombine.low %v63_v25, %v67_v26 }
  0x14   :  { %v5394_v39 = vld [vmem:[%s7435_s0 + $0x10] sm:$0xff]   ;;  %v3988_v40 = vcombine.high %v71_v33, %v75_v34  ;;  %v3987_v47 = vcombine.low %v71_v33, %v75_v34  ;;  %v3989_v49 = vcombine.low %v72_v36, %v76_v37  ;;  %v5427_v56 = vld [vmem:[%s7435_s0 + $0x18] sm:$0xff]  }
  0x15   :  { %v79_v42 = vld [vmem:[%s7434_s1 + $0x150] sm:$0xff]  ;;  %v96_v62 = vld [vmem:[%s7434_s1 + $0x1d8] sm:$0xff] }
  0x16   :  { %520 = vmatpush1.bf16.msra.mxu0 %v3983_v43  ;;  %633 = vmatpush1.bf16.msra.mxu1 %v3985_v44  ;;  %v83_v43 = vld [vmem:[%s7434_s1 + $0x170] sm:$0xff]  ;;  %v3990_v44 = vcombine.high %v72_v36, %v76_v37  ;;  %v5458_v10 = vld [vmem:[%s7436_s3 + $0xc] ss:$16 sps:$4 sm:$0xff]   ;;  %v5506_v16 = vld [vmem:[%s7436_s3 + $0x8] ss:$16 sps:$4 sm:$0xff]  }
  0x17   :  { %521 = vmatprep.subr.bf16.mxu0 %v3992_v45  ;;  %634 = vmatprep.subr.bf16.mxu1 %v3994_v46  ;;  %v80_v45 = vld [vmem:[%s7434_s1 + $0x158] sm:$0xff]  ;;  %v3996_v48 = vcombine.high %v79_v42, %v83_v43  ;;  %v87_v50 = vld [vmem:[%s7434_s1 + $0x190] sm:$0xff]  ;;  %v3995_v55 = vcombine.low %v79_v42, %v83_v43 }
  0x18   :  { %v84_v46 = vld [vmem:[%s7434_s1 + $0x178] sm:$0xff]  ;;  %v5448_v8 = vld [vmem:[%s7436_s3 + $0x4] ss:$16 sps:$4 sm:$0xff]   ;;  %v5546_v21 = vld [vmem:[%s7436_s3 + $0x40] ss:$16 sps:$4 sm:$0xff]  }
  0x19   :  { %v3997_v58 = vcombine.low %v80_v45, %v84_v46  ;;  %v5487_v13 = vld [vmem:[%s7435_s0 + $0x38] sm:$0xff]   ;;  %7574 = vst [vmem:[#allocation6_spill] sm:$0xff] %v5546_v21  ;;  %v5573_v26 = vld [vmem:[%s7436_s3 + $0x60] ss:$16 sps:$4 sm:$0xff]   ;;  %v5631_v34 = vld [vmem:[%s7436_s3 + $0xc4] ss:$16 sps:$4 sm:$0xff]  }
  0x1a   :  { %522 = vmatpush1.bf16.msra.mxu0 %v3991_v51  ;;  %635 = vmatpush1.bf16.msra.mxu1 %v3993_v52  ;;  %v91_v51 = vld [vmem:[%s7434_s1 + $0x1b0] sm:$0xff]  ;;  %v3998_v52 = vcombine.high %v80_v45, %v84_v46  ;;  %v5512_v17 = vld [vmem:[%s7436_s3 + $0x2c] ss:$16 sps:$4 sm:$0xff]   ;;  %7578 = vst [vmem:[#allocation10_spill] sm:$0xff] %v5573_v26  ;;  %7587 = vst [vmem:[#allocation19_spill] sm:$0xff] %v5631_v34 }
  0x1b   :  { %523 = vmatprep.subr.bf16.mxu0 %v4000_v53  ;;  %636 = vmatprep.subr.bf16.mxu1 %v4002_v54  ;;  %v88_v53 = vld [vmem:[%s7434_s1 + $0x198] sm:$0xff]  ;;  %v4004_v57 = vcombine.high %v87_v50, %v91_v51  ;;  %v4003_v0 = vcombine.low %v87_v50, %v91_v51  ;;  %v5597_v29 = vld [vmem:[%s7436_s3 + $0x80] ss:$16 sps:$4 sm:$0xff]   ;;  %v5689_v43 = vld [vmem:[%s7437_s4 + $0x4] ss:$16 sps:$4 sm:$0xff]  }
  0x1c   :  { %v92_v54 = vld [vmem:[%s7434_s1 + $0x1b8] sm:$0xff]  ;;  %7582 = vst [vmem:[#allocation14_spill] sm:$0xff] %v5597_v29  ;;  %v5625_v33 = vld [vmem:[%s7436_s3 + $0xa0] ss:$16 sps:$4 sm:$0xff]   ;;  %7596 = vst [vmem:[#allocation28_spill] sm:$0xff] %v5689_v43 }
  0x1d   :  { %v4005_v2 = vcombine.low %v88_v53, %v92_v54  ;;  %v5539_v20 = vld [vmem:[%s7436_s3 + $0x4c] ss:$16 sps:$4 sm:$0xff]   ;;  %7586 = vst [vmem:[#allocation18_spill] sm:$0xff] %v5625_v33  ;;  %v5649_v37 = vld [vmem:[%s7436_s3 + $0xc0] ss:$16 sps:$4 sm:$0xff]  }
  0x1e   :  { %524 = vmatpush1.bf16.msra.mxu0 %v3999_v59  ;;  %637 = vmatpush1.bf16.msra.mxu1 %v4001_v60  ;;  %v95_v59 = vld [vmem:[%s7434_s1 + $0x1d0] sm:$0xff]  ;;  %7573 = vst [vmem:[#allocation5_spill] sm:$0xff] %v5539_v20  ;;  %v5564_v25 = vld [vmem:[%s7436_s3 + $0x6c] ss:$16 sps:$4 sm:$0xff]   ;;  %7590 = vst [vmem:[#allocation22_spill] sm:$0xff] %v5649_v37 }
  0x1f   :  { %525 = vmatprep.subr.bf16.mxu0 %v4008_v61  ;;  %638 = vmatprep.subr.bf16.mxu1 %v4010_v63  ;;  %v99_v60 = vld [vmem:[%s7434_s1 + $0x1f0] sm:$0xff]  ;;  %v4006_v61 = vcombine.high %v88_v53, %v92_v54  ;;  %v100_v63 = vld [vmem:[%s7434_s1 + $0x1f8] sm:$0xff]  ;;  %7577 = vst [vmem:[#allocation9_spill] sm:$0xff] %v5564_v25 }
  0x20   :  { %v4012_v1 = vcombine.high %v95_v59, %v99_v60  ;;  %v5591_v28 = vld [vmem:[%s7436_s3 + $0x8c] ss:$16 sps:$4 sm:$0xff]   ;;  %v5684_v42 = vld [vmem:[%s7436_s3 + $0xe8] ss:$16 sps:$4 sm:$0xff]   ;;  %v5720_v45 = vld [vmem:[%s7437_s4] ss:$16 sps:$4 sm:$0xff]  }
  0x21   :  { %7581 = vst [vmem:[#allocation13_spill] sm:$0xff] %v5591_v28  ;;  %v5643_v36 = vld [vmem:[%s7436_s3 + $0xcc] ss:$16 sps:$4 sm:$0xff]   ;;  %7595 = vst [vmem:[#allocation27_spill] sm:$0xff] %v5684_v42  ;;  %v5725_v46 = vld [vmem:[%s7437_s4 + $0x8] ss:$16 sps:$4 sm:$0xff]  }
  0x22   :  { %526 = vmatpush1.bf16.msra.mxu0 %v4007_v4  ;;  %639 = vmatpush1.bf16.msra.mxu1 %v4009_v5  ;;  %v4014_v4 = vcombine.high %v96_v62, %v100_v63  ;;  %v4011_v5 = vcombine.low %v95_v59, %v99_v60  ;;  %7589 = vst [vmem:[#allocation21_spill] sm:$0xff] %v5643_v36  ;;  %v5750_v50 = vld [vmem:[%s7437_s4 + $0x28] ss:$16 sps:$4 sm:$0xff]   ;;  %v5755_v51 = vld [vmem:[%s7437_s4 + $0x44] ss:$16 sps:$4 sm:$0xff]  }
  0x23   :  { %737 = vmatprep.subr.bf16.mxu0 %v3956_v6  ;;  %850 = vmatprep.subr.bf16.mxu1 %v3958_v9  ;;  %v4013_v6 = vcombine.low %v96_v62, %v100_v63  ;;  %v5453_v9 = vld [vmem:[%s7435_s0 + $0x20] sm:$0xff]   ;;  %v5776_v54 = vld [vmem:[%s7437_s4 + $0x48] ss:$16 sps:$4 sm:$0xff]   ;;  %v5811_v60 = vld [vmem:[%s7437_s4 + $0x8c] ss:$16 sps:$4 sm:$0xff]  }
  0x24   :  { %v5769_v53 = vld [vmem:[%s7437_s4 + $0x40] ss:$16 sps:$4 sm:$0xff]   ;;  %v5805_v59 = vld [vmem:[%s7437_s4 + $0x84] ss:$16 sps:$4 sm:$0xff]   ;;  %v5824_v62 = vld [vmem:[%s7437_s4 + $0x88] ss:$16 sps:$4 sm:$0xff]  }
  0x25   :  { %544 = vmatmul.mubr.bf16.vlgmr.msra.gmra.mrb[0].mxu0 %v5328_v7  ;;  %657 = vmatmul.mubr.bf16.vlgmr.msra.gmra.mrb[0].mxu1 %v5328_v7  ;;  %v5829_v63 = vld [vmem:[%s7437_s4 + $0xa4] ss:$16 sps:$4 sm:$0xff]  }
  0x26   :  { %738 = vmatpush1.bf16.msra.mxu0 %v3955_v12  ;;  %553 = vmatprep.mubr.bf16.mxu0 %v7440_v3  ;;  %v5478_v12 = vld [vmem:[%s7435_s0 + $0x30] sm:$0xff]  }
  0x27   :  { %666 = vmatprep.mubr.bf16.mxu1 %v7440_v3  ;;  %739 = vmatprep.subr.bf16.mxu0 %v3964_v14  ;;  %v5496_v14 = vld [vmem:[%s7436_s3] ss:$16 sps:$4 sm:$0xff]  }
  0x28   :  { %851 = vmatpush1.bf16.msra.mxu1 %v3957_v15  ;;  %v5501_v15 = vld [vmem:[%s7436_s3 + $0x24] ss:$16 sps:$4 sm:$0xff]  }
  0x29   :  { %852 = vmatprep.subr.bf16.mxu1 %v3966_v18  ;;  %v5519_v18 = vld [vmem:[%s7436_s3 + $0x20] ss:$16 sps:$4 sm:$0xff]  }
  0x2a   :  { %740 = vmatpush1.bf16.msra.mxu0 %v3963_v19  ;;  %v5526_v19 = vld [vmem:[%s7436_s3 + $0x44] ss:$16 sps:$4 sm:$0xff]  }
  0x2b   :  { %741 = vmatprep.subr.bf16.mxu0 %v3972_v22  ;;  %7572 = vst [vmem:[#allocation4_spill] sm:$0xff] %v5526_v19  ;;  %v5551_v22 = vld [vmem:[%s7436_s3 + $0x64] ss:$16 sps:$4 sm:$0xff]  }
  0x2c   :  { %853 = vmatpush1.bf16.msra.mxu1 %v3965_v24  ;;  %7575 = vst [vmem:[#allocation7_spill] sm:$0xff] %v5551_v22  ;;  %v5557_v24 = vld [vmem:[%s7436_s3 + $0x48] ss:$16 sps:$4 sm:$0xff]  }
  0x2d   :  { %554 = vmatmul.mubr.bf16.gmra.mrb[4].mxu0 %v5361_v23  ;;  %854 = vmatprep.subr.bf16.mxu1 %v3974_v27  ;;  %7576 = vst [vmem:[#allocation8_spill] sm:$0xff] %v5557_v24  ;;  %v5579_v27 = vld [vmem:[%s7436_s3 + $0x84] ss:$16 sps:$4 sm:$0xff]  }
  0x2e   :  { %667 = vmatmul.mubr.bf16.gmra.mrb[4].mxu1 %v5361_v23  ;;  %563 = vmatprep.mubr.bf16.mxu0 %v7440_v3  ;;  %7579 = vst [vmem:[#allocation11_spill] sm:$0xff] %v5579_v27 }
  0x2f   :  { %676 = vmatprep.mubr.bf16.mxu1 %v7440_v3  ;;  %742 = vmatpush1.bf16.msra.mxu0 %v3971_v30  ;;  %v5603_v30 = vld [vmem:[%s7436_s3 + $0xa4] ss:$16 sps:$4 sm:$0xff]  }
  0x30   :  { %743 = vmatprep.subr.bf16.mxu0 %v3980_v31  ;;  %855 = vmatpush1.bf16.msra.mxu1 %v3973_v32  ;;  %7583 = vst [vmem:[#allocation15_spill] sm:$0xff] %v5603_v30  ;;  %v5609_v31 = vld [vmem:[%s7436_s3 + $0x88] ss:$16 sps:$4 sm:$0xff]   ;;  %v5616_v32 = vld [vmem:[%s7436_s3 + $0xac] ss:$16 sps:$4 sm:$0xff]  }
  0x31   :  { %856 = vmatprep.subr.bf16.mxu1 %v3982_v35  ;;  %7584 = vst [vmem:[#allocation16_spill] sm:$0xff] %v5609_v31  ;;  %7585 = vst [vmem:[#allocation17_spill] sm:$0xff] %v5616_v32  ;;  %v5637_v35 = vld [vmem:[%s7436_s3 + $0xa8] ss:$16 sps:$4 sm:$0xff]  }
  0x32   :  { %7588 = vst [vmem:[#allocation20_spill] sm:$0xff] %v5637_v35 }
  0x33   :  { %744 = vmatpush1.bf16.msra.mxu0 %v3979_v38  ;;  %v5656_v38 = vld [vmem:[%s7436_s3 + $0xe4] ss:$16 sps:$4 sm:$0xff]  }
  0x34   :  { %745 = vmatprep.subr.bf16.mxu0 %v3988_v40  ;;  %857 = vmatpush1.bf16.msra.mxu1 %v3981_v41  ;;  %7591 = vst [vmem:[#allocation23_spill] sm:$0xff] %v5656_v38  ;;  %v5668_v40 = vld [vmem:[%s7436_s3 + $0xec] ss:$16 sps:$4 sm:$0xff]   ;;  %v5677_v41 = vld [vmem:[%s7436_s3 + $0xe0] ss:$16 sps:$4 sm:$0xff]  }
  0x35   :  { %564 = vmatmul.mubr.bf16.gmra.mrb[8].mxu0 %v5394_v39  ;;  %858 = vmatprep.subr.bf16.mxu1 %v3990_v44  ;;  %7593 = vst [vmem:[#allocation25_spill] sm:$0xff] %v5668_v40  ;;  %7594 = vst [vmem:[#allocation26_spill] sm:$0xff] %v5677_v41  ;;  %v5695_v44 = vld [vmem:[%s7437_s4 + $0xc] ss:$16 sps:$4 sm:$0xff]  }
  0x36   :  { %677 = vmatmul.mubr.bf16.gmra.mrb[8].mxu1 %v5394_v39  ;;  %573 = vmatprep.mubr.bf16.mxu0 %v7440_v3  ;;  %7597 = vst [vmem:[#allocation29_spill] sm:$0xff] %v5695_v44 }
  0x37   :  { %686 = vmatprep.mubr.bf16.mxu1 %v7440_v3  ;;  %746 = vmatpush1.bf16.msra.mxu0 %v3987_v47  ;;  %v5730_v47 = vld [vmem:[%s7437_s4 + $0x24] ss:$16 sps:$4 sm:$0xff]  }
  0x38   :  { %747 = vmatprep.subr.bf16.mxu0 %v3996_v48  ;;  %859 = vmatpush1.bf16.msra.mxu1 %v3989_v49  ;;  %v5735_v48 = vld [vmem:[%s7437_s4 + $0x2c] ss:$16 sps:$4 sm:$0xff]   ;;  %v5743_v49 = vld [vmem:[%s7437_s4 + $0x20] ss:$16 sps:$4 sm:$0xff]  }
  0x39   :  { %860 = vmatprep.subr.bf16.mxu1 %v3998_v52  ;;  %v5761_v52 = vld [vmem:[%s7437_s4 + $0x4c] ss:$16 sps:$4 sm:$0xff]  }
  0x3b   :  { %748 = vmatpush1.bf16.msra.mxu0 %v3995_v55  ;;  %v5781_v55 = vld [vmem:[%s7437_s4 + $0x64] ss:$16 sps:$4 sm:$0xff]  }
  0x3c   :  { %749 = vmatprep.subr.bf16.mxu0 %v4004_v57  ;;  %861 = vmatpush1.bf16.msra.mxu1 %v3997_v58  ;;  %v5793_v57 = vld [vmem:[%s7437_s4 + $0x60] ss:$16 sps:$4 sm:$0xff]   ;;  %v5800_v58 = vld [vmem:[%s7437_s4 + $0x68] ss:$16 sps:$4 sm:$0xff]  }
  0x3d   :  { %574 = vmatmul.mubr.bf16.gmra.mrb[12].mxu0 %v5427_v56  ;;  %862 = vmatprep.subr.bf16.mxu1 %v4006_v61  ;;  %v5817_v61 = vld [vmem:[%s7437_s4 + $0x80] ss:$16 sps:$4 sm:$0xff]  }
  0x3e   :  { %687 = vmatmul.mubr.bf16.gmra.mrb[12].mxu1 %v5427_v56  ;;  %583 = vmatprep.mubr.bf16.mxu0 %v7440_v3 }
  0x3f   :  { %696 = vmatprep.mubr.bf16.mxu1 %v7440_v3  ;;  %750 = vmatpush1.bf16.msra.mxu0 %v4003_v0  ;;  %v5835_v0 = vld [vmem:[%s7437_s4 + $0xac] ss:$16 sps:$4 sm:$0xff]  }
  0x40   :  { %751 = vmatprep.subr.bf16.mxu0 %v4012_v1  ;;  %863 = vmatpush1.bf16.msra.mxu1 %v4005_v2  ;;  %v5841_v1 = vld [vmem:[%s7437_s4 + $0xa0] ss:$16 sps:$4 sm:$0xff]   ;;  %v5848_v2 = vld [vmem:[%s7437_s4 + $0xa8] ss:$16 sps:$4 sm:$0xff]  }
  0x41   :  { %864 = vmatprep.subr.bf16.mxu1 %v4014_v4  ;;  %v5853_v4 = vld [vmem:[%s7437_s4 + $0xc4] ss:$16 sps:$4 sm:$0xff]  }
  0x43   :  { %752 = vmatpush1.bf16.msra.mxu0 %v4011_v5  ;;  %v5859_v5 = vld [vmem:[%s7437_s4 + $0xcc] ss:$16 sps:$4 sm:$0xff]  }
  0x44   :  { %865 = vmatpush1.bf16.msra.mxu1 %v4013_v6  ;;  %1323 = vmatprep.subr.bf16.mxu0 %v5448_v8  ;;  %v5865_v6 = vld [vmem:[%s7437_s4 + $0xc0] ss:$16 sps:$4 sm:$0xff]  }
  0x45   :  { %584 = vmatmul.mubr.bf16.gmra.mrb[16].mxu0 %v5453_v9  ;;  %1366 = vmatprep.subr.bf16.mxu1 %v5458_v10  ;;  %7598 = vst [vmem:[#allocation30_spill] sm:$0xff] %v5865_v6 }
  0x46   :  { %697 = vmatmul.mubr.bf16.gmra.mrb[16].mxu1 %v5453_v9  ;;  %593 = vmatprep.mubr.bf16.mxu0 %v7440_v3 }
  0x47   :  { %706 = vmatprep.mubr.bf16.mxu1 %v7440_v3 }
  0x4d   :  { %594 = vmatmul.mubr.bf16.gmra.mrb[20].mxu0 %v5469_v11 }
  0x4e   :  { %707 = vmatmul.mubr.bf16.gmra.mrb[20].mxu1 %v5469_v11  ;;  %603 = vmatprep.mubr.bf16.mxu0 %v7440_v3 }
  0x4f   :  { %716 = vmatprep.mubr.bf16.mxu1 %v7440_v3 }
  0x55   :  { %604 = vmatmul.mubr.bf16.gmra.mrb[24].mxu0 %v5478_v12 }
  0x56   :  { %717 = vmatmul.mubr.bf16.gmra.mrb[24].mxu1 %v5478_v12  ;;  %613 = vmatprep.mubr.bf16.mxu0 %v7440_v3 }
  0x57   :  { %726 = vmatprep.mubr.bf16.mxu1 %v7440_v3 }
  0x5d   :  { %614 = vmatmul.mubr.bf16.gmra.mrb[28].mxu0 %v5487_v13 }
  0x5e   :  { %727 = vmatmul.mubr.bf16.gmra.mrb[28].mxu1 %v5487_v13  ;;  %769 = vmatprep.mubr.bf16.mxu0 %v7440_v3 }
  0x5f   :  { %882 = vmatprep.mubr.bf16.mxu1 %v7440_v3 }
  0x65   :  { %770 = vmatmul.mubr.bf16.vlgmr.msra.gmra.mrb[32].mxu0 %v5328_v7 }
  0x66   :  { %883 = vmatmul.mubr.bf16.vlgmr.msra.gmra.mrb[32].mxu1 %v5328_v7  ;;  %1324 = vmatpush1.bf16.msra.mxu0 %v5496_v14  ;;  %v5533_v7 = vld [vmem:[%s7436_s3 + $0x28] ss:$16 sps:$4 sm:$0xff]  }
  0x67   :  { %779 = vmatprep.mubr.bf16.mxu0 %v7440_v3  ;;  %892 = vmatprep.mubr.bf16.mxu1 %v7440_v3 }
  0x68   :  { %1325 = vmatprep.subr.bf16.mxu0 %v5501_v15  ;;  %1367 = vmatpush1.bf16.msra.mxu1 %v5506_v16 }
  0x69   :  { %1368 = vmatprep.subr.bf16.mxu1 %v5512_v17 }
  0x6a   :  { %1326 = vmatpush1.bf16.msra.mxu0 %v5519_v18 }
  0x6b   :  { %1327 = vmatprep.subr.bf16.mxu0 %v5526_v19 }
  0x6c   :  { %1369 = vmatpush1.bf16.msra.mxu1 %v5533_v7 }
  0x6d   :  { %780 = vmatmul.mubr.bf16.gmra.mrb[36].mxu0 %v5361_v23  ;;  %1370 = vmatprep.subr.bf16.mxu1 %v5539_v20 }
  0x6e   :  { %893 = vmatmul.mubr.bf16.gmra.mrb[36].mxu1 %v5361_v23  ;;  %789 = vmatprep.mubr.bf16.mxu0 %v7440_v3  ;;  %v5585_v23 = vld [vmem:[%s7436_s3 + $0x68] ss:$16 sps:$4 sm:$0xff]  }
  0x6f   :  { %902 = vmatprep.mubr.bf16.mxu1 %v7440_v3  ;;  %1328 = vmatpush1.bf16.msra.mxu0 %v5546_v21  ;;  %7580 = vst [vmem:[#allocation12_spill] sm:$0xff] %v5585_v23 }
  0x70   :  { %1329 = vmatprep.subr.bf16.mxu0 %v5551_v22  ;;  %1371 = vmatpush1.bf16.msra.mxu1 %v5557_v24 }
  0x71   :  { %1372 = vmatprep.subr.bf16.mxu1 %v5564_v25 }
  0x73   :  { %1330 = vmatpush1.bf16.msra.mxu0 %v5573_v26 }
  0x74   :  { %1331 = vmatprep.subr.bf16.mxu0 %v5579_v27  ;;  %1373 = vmatpush1.bf16.msra.mxu1 %v5585_v23 }
  0x75   :  { %790 = vmatmul.mubr.bf16.gmra.mrb[40].mxu0 %v5394_v39  ;;  %1374 = vmatprep.subr.bf16.mxu1 %v5591_v28 }
  0x76   :  { %903 = vmatmul.mubr.bf16.gmra.mrb[40].mxu1 %v5394_v39  ;;  %799 = vmatprep.mubr.bf16.mxu0 %v7440_v3  ;;  %v5661_v39 = vld [vmem:[%s7436_s3 + $0xc8] ss:$16 sps:$4 sm:$0xff]  }
  0x77   :  { %912 = vmatprep.mubr.bf16.mxu1 %v7440_v3  ;;  %1332 = vmatpush1.bf16.msra.mxu0 %v5597_v29  ;;  %7592 = vst [vmem:[#allocation24_spill] sm:$0xff] %v5661_v39 }
  0x78   :  { %1333 = vmatprep.subr.bf16.mxu0 %v5603_v30  ;;  %1375 = vmatpush1.bf16.msra.mxu1 %v5609_v31 }
  0x79   :  { %1376 = vmatprep.subr.bf16.mxu1 %v5616_v32 }
  0x7b   :  { %1334 = vmatpush1.bf16.msra.mxu0 %v5625_v33 }
  0x7c   :  { %1335 = vmatprep.subr.bf16.mxu0 %v5631_v34  ;;  %1377 = vmatpush1.bf16.msra.mxu1 %v5637_v35 }
  0x7d   :  { %800 = vmatmul.mubr.bf16.gmra.mrb[44].mxu0 %v5427_v56  ;;  %1378 = vmatprep.subr.bf16.mxu1 %v5643_v36 }
  0x7e   :  { %913 = vmatmul.mubr.bf16.gmra.mrb[44].mxu1 %v5427_v56  ;;  %809 = vmatprep.mubr.bf16.mxu0 %v7440_v3  ;;  %v5787_v56 = vld [vmem:[%s7437_s4 + $0x6c] ss:$16 sps:$4 sm:$0xff]  }
  0x7f   :  { %922 = vmatprep.mubr.bf16.mxu1 %v7440_v3  ;;  %1336 = vmatpush1.bf16.msra.mxu0 %v5649_v37 }
  0x80   :  { %1337 = vmatprep.subr.bf16.mxu0 %v5656_v38  ;;  %1379 = vmatpush1.bf16.msra.mxu1 %v5661_v39 }
  0x81   :  { %1380 = vmatprep.subr.bf16.mxu1 %v5668_v40 }
  0x83   :  { %1338 = vmatpush1.bf16.msra.mxu0 %v5677_v41 }
  0x84   :  { %1381 = vmatpush1.bf16.msra.mxu1 %v5684_v42  ;;  %1586 = vmatprep.subr.bf16.mxu0 %v5689_v43 }
  0x85   :  { %810 = vmatmul.mubr.bf16.gmra.mrb[48].mxu0 %v5453_v9  ;;  %1629 = vmatprep.subr.bf16.mxu1 %v5695_v44 }
  0x86   :  { %923 = vmatmul.mubr.bf16.gmra.mrb[48].mxu1 %v5453_v9  ;;  %819 = vmatprep.mubr.bf16.mxu0 %v7440_v3  ;;  %v5872_v9 = vld [vmem:[%s7437_s4 + $0xc8] ss:$16 sps:$4 sm:$0xff]  }
  0x87   :  { %932 = vmatprep.mubr.bf16.mxu1 %v7440_v3 }
  0x8d   :  { %820 = vmatmul.mubr.bf16.gmra.mrb[52].mxu0 %v5469_v11 }
  0x8e   :  { %933 = vmatmul.mubr.bf16.gmra.mrb[52].mxu1 %v5469_v11  ;;  %829 = vmatprep.mubr.bf16.mxu0 %v7440_v3  ;;  %v5877_v11 = vld [vmem:[%s7437_s4 + $0xe4] ss:$16 sps:$4 sm:$0xff]  }
  0x8f   :  { %942 = vmatprep.mubr.bf16.mxu1 %v7440_v3 }
  0x95   :  { %830 = vmatmul.mubr.bf16.gmra.mrb[56].mxu0 %v5478_v12 }
  0x96   :  { %943 = vmatmul.mubr.bf16.gmra.mrb[56].mxu1 %v5478_v12  ;;  %839 = vmatprep.mubr.bf16.mxu0 %v7440_v3  ;;  %v5883_v12 = vld [vmem:[%s7437_s4 + $0xec] ss:$16 sps:$4 sm:$0xff]  }
  0x97   :  { %952 = vmatprep.mubr.bf16.mxu1 %v7440_v3 }
  0x9d   :  { %840 = vmatmul.mubr.bf16.gmra.mrb[60].mxu0 %v5487_v13 }
  0x9e   :  { %953 = vmatmul.mubr.bf16.gmra.mrb[60].mxu1 %v5487_v13  ;;  %1355 = vmatprep.mubr.bf16.mxu0 %v7440_v3  ;;  %v5889_v13 = vld [vmem:[%s7437_s4 + $0xe0] ss:$16 sps:$4 sm:$0xff]  }
  0x9f   :  { %1398 = vmatprep.mubr.bf16.mxu1 %v7440_v3 }
  0xa5   :  { %1356 = vmatmul.mubr.bf16.vlgmr.msra.gmra.mrb[0].mxu0 %v7440_v3 }
  0xa6   :  { %1399 = vmatmul.mubr.bf16.vlgmr.msra.gmra.mrb[0].mxu1 %v7440_v3  ;;  %1587 = vmatpush1.bf16.msra.mxu0 %v5720_v45 }
  0xa7   :  { %1630 = vmatpush1.bf16.msra.mxu1 %v5725_v46  ;;  %1588 = vmatprep.subr.bf16.mxu0 %v5730_v47 }
  0xa8   :  { %1631 = vmatprep.subr.bf16.mxu1 %v5735_v48  ;;  %1618 = vmatprep.mubr.bf16.mxu0 %v7440_v3 }
  0xa9   :  { %1661 = vmatprep.mubr.bf16.mxu1 %v7440_v3  ;;  %v5896_v3 = vld [vmem:[%s7437_s4 + $0xe8] ss:$16 sps:$4 sm:$0xff]  }
  0xaa   :  { %1589 = vmatpush1.bf16.msra.mxu0 %v5743_v49 }
  0xab   :  { %1632 = vmatpush1.bf16.msra.mxu1 %v5750_v50  ;;  %1590 = vmatprep.subr.bf16.mxu0 %v5755_v51 }
  0xac   :  { %1633 = vmatprep.subr.bf16.mxu1 %v5761_v52 }
  0xae   :  { %1591 = vmatpush1.bf16.msra.mxu0 %v5769_v53 }
  0xaf   :  { %1634 = vmatpush1.bf16.msra.mxu1 %v5776_v54  ;;  %1592 = vmatprep.subr.bf16.mxu0 %v5781_v55 }
  0xb0   :  { %1635 = vmatprep.subr.bf16.mxu1 %v5787_v56 }
  0xb2   :  { %1593 = vmatpush1.bf16.msra.mxu0 %v5793_v57 }
  0xb3   :  { %1636 = vmatpush1.bf16.msra.mxu1 %v5800_v58  ;;  %1594 = vmatprep.subr.bf16.mxu0 %v5805_v59 }
  0xb4   :  { %1637 = vmatprep.subr.bf16.mxu1 %v5811_v60 }
  0xb6   :  { %1595 = vmatpush1.bf16.msra.mxu0 %v5817_v61 }
  0xb7   :  { %1638 = vmatpush1.bf16.msra.mxu1 %v5824_v62  ;;  %1596 = vmatprep.subr.bf16.mxu0 %v5829_v63 }
  0xb8   :  { %1639 = vmatprep.subr.bf16.mxu1 %v5835_v0 }
  0xba   :  { %1597 = vmatpush1.bf16.msra.mxu0 %v5841_v1 }
  0xbb   :  { %1640 = vmatpush1.bf16.msra.mxu1 %v5848_v2  ;;  %1598 = vmatprep.subr.bf16.mxu0 %v5853_v4 }
  0xbc   :  { %1641 = vmatprep.subr.bf16.mxu1 %v5859_v5 }
  0xbe   :  { %1599 = vmatpush1.bf16.msra.mxu0 %v5865_v6  ;;  %v7599_v6 = vmov 0  }
  0xbf   :  { %1642 = vmatpush1.bf16.msra.mxu1 %v5872_v9  ;;  %1600 = vmatprep.subr.bf16.mxu0 %v5877_v11 }
  0xc0   :  { %1643 = vmatprep.subr.bf16.mxu1 %v5883_v12 }
  0xc2   :  { %1601 = vmatpush1.bf16.msra.mxu0 %v5889_v13 }
  0xc3   :  { %1644 = vmatpush1.bf16.msra.mxu1 %v5896_v3  ;;  %1786 = vmatprep.subr.bf16.mxu0 %v5448_v8 }
  0xc4   :  { %1829 = vmatprep.subr.bf16.mxu1 %v5458_v10 }
  0xc5   :  { %1619 = vmatmul.mubr.bf16.vlgmr.msra.gmra.mrb[60].mxu0 %v7599_v6 }
  0xc6   :  { %1662 = vmatmul.mubr.bf16.vlgmr.msra.gmra.mrb[60].mxu1 %v7599_v6  ;;  %1787 = vmatpush1.bf16.msra.mxu0 %v5496_v14 }
  0xc7   :  { %1830 = vmatpush1.bf16.msra.mxu1 %v5506_v16  ;;  %1788 = vmatprep.subr.bf16.mxu0 %v5501_v15 }
  0xc8   :  { %1831 = vmatprep.subr.bf16.mxu1 %v5512_v17  ;;  %1818 = vmatprep.mubr.bf16.mxu0 %v7599_v6 }
  0xc9   :  { %1861 = vmatprep.mubr.bf16.mxu1 %v7599_v6 }
  0xca   :  { %1789 = vmatpush1.bf16.msra.mxu0 %v5519_v18 }
  0xcb   :  { %1832 = vmatpush1.bf16.msra.mxu1 %v5533_v7  ;;  %1790 = vmatprep.subr.bf16.mxu0 %v5526_v19 }
  0xcc   :  { %1833 = vmatprep.subr.bf16.mxu1 %v5539_v20 }
  0xce   :  { %1791 = vmatpush1.bf16.msra.mxu0 %v5546_v21 }
  0xcf   :  { %1834 = vmatpush1.bf16.msra.mxu1 %v5557_v24  ;;  %1792 = vmatprep.subr.bf16.mxu0 %v5551_v22 }
  0xd0   :  { %1835 = vmatprep.subr.bf16.mxu1 %v5564_v25 }
  0xd2   :  { %1793 = vmatpush1.bf16.msra.mxu0 %v5573_v26 }
  0xd3   :  { %1836 = vmatpush1.bf16.msra.mxu1 %v5585_v23  ;;  %1794 = vmatprep.subr.bf16.mxu0 %v5579_v27 }
  0xd4   :  { %1837 = vmatprep.subr.bf16.mxu1 %v5591_v28 }
  0xd6   :  { %1795 = vmatpush1.bf16.msra.mxu0 %v5597_v29 }
  0xd7   :  { %1838 = vmatpush1.bf16.msra.mxu1 %v5609_v31  ;;  %1796 = vmatprep.subr.bf16.mxu0 %v5603_v30 }
  0xd8   :  { %1839 = vmatprep.subr.bf16.mxu1 %v5616_v32 }
  0xda   :  { %1797 = vmatpush1.bf16.msra.mxu0 %v5625_v33 }
  0xdb   :  { %1840 = vmatpush1.bf16.msra.mxu1 %v5637_v35  ;;  %1798 = vmatprep.subr.bf16.mxu0 %v5631_v34  ;;  %v103_v35 = vlaneseq }
  0xdc   :  { %1841 = vmatprep.subr.bf16.mxu1 %v5643_v36 }
  0xdd   :  { %v5939_v34 = vshrl.u32 %v103_v35, 7 }
  0xde   :  { %1799 = vmatpush1.bf16.msra.mxu0 %v5649_v37 }
  0xdf   :  { %1842 = vmatpush1.bf16.msra.mxu1 %v5661_v39  ;;  %1800 = vmatprep.subr.bf16.mxu0 %v5656_v38  ;;  %v105_v36 = vsub.s32 0, %v5939_v34  ;;  %v5945_v39 = vld [vmem:[%s7438_s2] sm:$0xff] }
  0xe0   :  { %1843 = vmatprep.subr.bf16.mxu1 %v5668_v40  ;;  %v109_v40 = vsub.s32 1, %v5939_v34 }
  0xe2   :  { %1801 = vmatpush1.bf16.msra.mxu0 %v5677_v41  ;;  %v5949_v41 = vrot.slane %v5945_v39, %v105_v36 }
  0xe3   :  { %1844 = vmatpush1.bf16.msra.mxu1 %v5684_v42  ;;  %1890 = vmatprep.subr.bf16.mxu0 %v5689_v43  ;;  %v5952_v42 = vrot.slane %v5945_v39, %v109_v40 }
  0xe4   :  { %1933 = vmatprep.subr.bf16.mxu1 %v5695_v44  ;;  %7600 = vst [vmem:[#allocation31_spill] sm:$0xff] %v5949_v41  ;;  %v113_v44 = vsub.s32 2, %v5939_v34 }
  0xe5   :  { %7601 = vst [vmem:[#allocation32_spill] sm:$0xff] %v5952_v42 }
  0xe6   :  { %v5959_v27 = vrot.slane %v5945_v39, %v113_v44 }
  0xe8   :  { %7602 = vst [vmem:[#allocation33_spill] sm:$0xff] %v5959_v27 }
 0x178   :  { %v1357_v43 = vpop.f32.mrb[0].mxu0 }
 0x179   :  { %v4175_v35 = vadd.f32 %v1357_v43, %v5949_v41  ;;  %v1400_v38 = vpop.f32.mrb[0].mxu1  ;;  %v1359_v37 = vpop.f32.mrb[1].mxu0  ;;  %v117_v43 = vsub.s32 3, %v5939_v34 }
 0x17a   :  { %v4176_v33 = vadd.f32 %v1359_v37, %v5952_v42  ;;  %v1402_v32 = vpop.f32.mrb[1].mxu1  ;;  %v1361_v30 = vpop.f32.mrb[2].mxu0  ;;  %v4207_v22 = vadd.f32 %v1400_v38, %v5959_v27 }
 0x17b   :  { %v4079_v31 = vmul.f32 -1.442695, %v4175_v35  ;;  %v4177_v29 = vadd.f32 %v1361_v30, %v5949_v41  ;;  %v1404_v28 = vpop.f32.mrb[2].mxu1  ;;  %v1363_v36 = vpop.f32.mrb[3].mxu0  ;;  %v5965_v35 = vrot.slane %v5945_v39, %v117_v43  ;;  %v125_v43 = vsub.s32 5, %v5939_v34 }
 0x17c   :  { %v4080_v40 = vmul.f32 -1.442695, %v4176_v33  ;;  %v4178_v23 = vadd.f32 %v1363_v36, %v5952_v42  ;;  %v1406_v26 = vpop.f32.mrb[3].mxu1  ;;  %v4209_v30 = vadd.f32 %v1404_v28, %v5959_v27  ;;  %v4081_v44 = vmul.f32 -1.442695, %v4207_v22 }
 0x17d   :  { %4536 = vpow2.f32 %v4079_v31  ;;  %v4082_v25 = vmul.f32 -1.442695, %v4177_v29  ;;  %7603 = vst [vmem:[#allocation34_spill] sm:$0xff] %v5965_v35  ;;  %v4208_v33 = vadd.f32 %v1402_v32, %v5965_v35  ;;  %v121_v28 = vsub.s32 4, %v5939_v34 }
 0x17e   :  { %4538 = vpow2.f32 %v4080_v40  ;;  %v4083_v37 = vmul.f32 -1.442695, %v4178_v23  ;;  %v4084_v42 = vmul.f32 -1.442695, %v4209_v30  ;;  %v4210_v23 = vadd.f32 %v1406_v26, %v5965_v35 }
 0x17f   :  { %4540 = vpow2.f32 %v4082_v25 }
 0x180   :  { %4542 = vpow2.f32 %v4083_v37 }
 0x181   :  { %4544 = vpow2.f32 %v4081_v44 }
 0x182   :  { %4546 = vtanh.f32 %v4208_v33  ;;  %v5976_v33 = vrot.slane %v5945_v39, %v125_v43 }
 0x184   :  { %7605 = vst [vmem:[#allocation36_spill] sm:$0xff] %v5976_v33 }
 0x187   :  { %v4537_v36 = vpop.eup %4536 }
 0x188   :  { %v1698_v31 = vadd.f32 1.0, %v4537_v36  ;;  %v4539_v41 = vpop.eup %4538 }
 0x189   :  { %v1699_v29 = vadd.f32 1.0, %v4539_v41  ;;  %v4541_v38 = vpop.eup %4540  ;;  %v5973_v41 = vrot.slane %v5945_v39, %v121_v28 }
 0x18a   :  { %4548 = vrcp.f32 %v1698_v31  ;;  %v1701_v25 = vadd.f32 1.0, %v4541_v38  ;;  %v4543_v40 = vpop.eup %4542 }
 0x18b   :  { %4550 = vpow2.f32 %v4084_v42  ;;  %v1702_v22 = vadd.f32 1.0, %v4543_v40  ;;  %v4545_v32 = vpop.eup %4544  ;;  %7604 = vst [vmem:[#allocation35_spill] sm:$0xff] %v5973_v41 }
 0x18c   :  { %4552 = vrcp.f32 %v1699_v29  ;;  %v4547_v37 = vpop.eup %4546  ;;  %v1700_v31 = vadd.f32 1.0, %v4545_v32  ;;  %v129_v32 = vsub.s32 6, %v5939_v34 }
 0x18d   :  { %4554 = vtanh.f32 %v4210_v23 }
 0x18e   :  { %4556 = vrcp.f32 %v1701_v25 }
 0x18f   :  { %4558 = vrcp.f32 %v1702_v22 }
 0x190   :  { %4560 = vrcp.f32 %v1700_v31 }
 0x194   :  { %v4549_v30 = vpop.eup %4548 }
 0x195   :  { %v4551_v44 = vpop.eup %4550  ;;  %v1720_v26 = vmul.f32 %v4549_v30, %v4547_v37 }
 0x196   :  { %v4553_v42 = vpop.eup %4552  ;;  %v1703_v30 = vadd.f32 1.0, %v4551_v44 }
 0x197   :  { %v4555_v36 = vpop.eup %4554  ;;  %v1718_v23 = vmul.f32 0.0, %v4553_v42 }
 0x198   :  { %v4557_v29 = vpop.eup %4556  ;;  %v1620_v38 = vpop.f32.mrb[60].mxu0 }
 0x199   :  { %v5978_v25 = vadd.f32 %v1720_v26, %v1718_v23  ;;  %v1721_v40 = vmul.f32 %v4557_v29, %v4555_v36  ;;  %v4267_v22 = vadd.f32 %v1620_v38, %v5973_v41  ;;  %v1663_v35 = vpop.f32.mrb[60].mxu1  ;;  %v1622_v27 = vpop.f32.mrb[61].mxu0  ;;  %v5991_v38 = vrot.slane %v5945_v39, %v129_v32 }
 0x19a   :  { %v4559_v37 = vpop.eup %4558  ;;  %v4268_v28 = vadd.f32 %v1622_v27, %v5976_v33  ;;  %v1665_v24 = vpop.f32.mrb[61].mxu1  ;;  %v133_v27 = vsub.s32 7, %v5939_v34 }
 0x19b   :  { %v1624_v21 = vpop.f32.mrb[62].mxu0  ;;  %v1719_v43 = vmul.f32 0.0, %v4559_v37  ;;  %v4085_v20 = vmul.f32 -1.442695, %v4267_v22  ;;  %v1667_v42 = vpop.f32.mrb[62].mxu1  ;;  %4562 = vtanh.f32 %v5978_v25 }
 0x19c   :  { %v1626_v19 = vpop.f32.mrb[63].mxu0  ;;  %v4086_v26 = vmul.f32 -1.442695, %v4268_v28  ;;  %v4269_v36 = vadd.f32 %v1624_v21, %v5973_v41  ;;  %v1669_v23 = vpop.f32.mrb[63].mxu1  ;;  %v5994_v37 = vrot.slane %v5945_v39, %v133_v27  ;;  %v4299_v21 = vadd.f32 %v1663_v35, %v5991_v38 }
 0x19d   :  { %v5985_v29 = vadd.f32 %v1721_v40, %v1719_v43  ;;  %4564 = vpow2.f32 %v4085_v20  ;;  %v4270_v44 = vadd.f32 %v1626_v19, %v5976_v33  ;;  %v4301_v20 = vadd.f32 %v1667_v42, %v5991_v38  ;;  %v4561_v34 = vpop.eup %4560 }
 0x19e   :  { %4566 = vrcp.f32 %v1703_v30  ;;  %v4088_v31 = vmul.f32 -1.442695, %v4269_v36  ;;  %v4300_v19 = vadd.f32 %v1665_v24, %v5994_v37  ;;  %v4087_v28 = vmul.f32 -1.442695, %v4299_v21 }
 0x19f   :  { %4568 = vtanh.f32 %v5985_v29  ;;  %v4089_v22 = vmul.f32 -1.442695, %v4270_v44  ;;  %v4090_v36 = vmul.f32 -1.442695, %v4301_v20  ;;  %v4302_v39 = vadd.f32 %v1669_v23, %v5994_v37 }
 0x1a0   :  { %4570 = vpow2.f32 %v4086_v26 }
 0x1a1   :  { %4572 = vpow2.f32 %v4088_v31 }
 0x1a2   :  { %4574 = vpow2.f32 %v4089_v22 }
 0x1a3   :  { %4576 = vtanh.f32 %v4300_v19 }
 0x1a5   :  { %v4563_v40 = vpop.eup %4562 }
 0x1a6   :  { %v6000_v27 = vmul.f32 %v4563_v40, %v4561_v34 }
 0x1a7   :  { %v4565_v30 = vpop.eup %4564 }
 0x1a8   :  { %v4567_v43 = vpop.eup %4566  ;;  %v1746_v32 = vadd.f32 1.0, %v4565_v30 }
 0x1a9   :  { %v4569_v26 = vpop.eup %4568 }
 0x1aa   :  { %v4571_v44 = vpop.eup %4570  ;;  %4578 = vrcp.f32 %v1746_v32  ;;  %v6002_v35 = vmul.f32 %v4569_v26, %v4567_v43 }
 0x1ab   :  { %4580 = vpow2.f32 %v4087_v28  ;;  %v1747_v42 = vadd.f32 1.0, %v4571_v44  ;;  %v4573_v31 = vpop.eup %4572 }
 0x1ac   :  { %7606 = vst [vmem:[#allocation37_spill] sm:$0xff] %v6002_v35  ;;  %4582 = vpow2.f32 %v4090_v36  ;;  %v1785_v24 = vpack.c.bf16 %v6002_v35, %v6000_v27  ;;  %v1749_v22 = vadd.f32 1.0, %v4573_v31  ;;  %v4575_v21 = vpop.eup %4574 }
 0x1ad   :  { %4584 = vrcp.f32 %v1747_v42  ;;  %v1750_v20 = vadd.f32 1.0, %v4575_v21  ;;  %v4577_v23 = vpop.eup %4576 }
 0x1ae   :  { %4586 = vtanh.f32 %v4302_v39  ;;  %1819 = vmatmul.mubr.bf16.vlgmr.msra.gmra.mrb[4].mxu0 %v1785_v24  ;;  %1862 = vmatmul.mubr.bf16.vlgmr.msra.gmra.mrb[4].mxu1 %v1785_v24 }
 0x1af   :  { %4588 = vrcp.f32 %v1749_v22  ;;  %1891 = vmatpush1.bf16.msra.mxu0 %v5720_v45  ;;  %1934 = vmatpush1.bf16.msra.mxu1 %v5725_v46 }
 0x1b0   :  { %1892 = vmatprep.subr.bf16.mxu0 %v5730_v47  ;;  %1935 = vmatprep.subr.bf16.mxu1 %v5735_v48  ;;  %4590 = vrcp.f32 %v1750_v20  ;;  %v7607_v20 = vld [vmem:[#allocation30_spill] sm:$0xff] }
 0x1b1   :  { %1922 = vmatprep.mubr.bf16.mxu0 %v7599_v6  ;;  %1965 = vmatprep.mubr.bf16.mxu1 %v7599_v6 }
 0x1b3   :  { %1893 = vmatpush1.bf16.msra.mxu0 %v5743_v49  ;;  %1936 = vmatpush1.bf16.msra.mxu1 %v5750_v50 }
 0x1b4   :  { %v4579_v34 = vpop.eup %4578  ;;  %1894 = vmatprep.subr.bf16.mxu0 %v5755_v51  ;;  %1937 = vmatprep.subr.bf16.mxu1 %v5761_v52 }
 0x1b5   :  { %v4581_v19 = vpop.eup %4580  ;;  %v1768_v40 = vmul.f32 %v4579_v34, %v4577_v23 }
 0x1b6   :  { %v4583_v30 = vpop.eup %4582  ;;  %v1748_v26 = vadd.f32 1.0, %v4581_v19 }
 0x1b7   :  { %v4585_v28 = vpop.eup %4584  ;;  %1895 = vmatpush1.bf16.msra.mxu0 %v5769_v53  ;;  %1938 = vmatpush1.bf16.msra.mxu1 %v5776_v54  ;;  %v1751_v31 = vadd.f32 1.0, %v4583_v30 }
 0x1b8   :  { %v4587_v43 = vpop.eup %4586  ;;  %v1766_v32 = vmul.f32 0.0, %v4585_v28  ;;  %1896 = vmatprep.subr.bf16.mxu0 %v5781_v55  ;;  %1939 = vmatprep.subr.bf16.mxu1 %v5787_v56  ;;  %4592 = vrcp.f32 %v1748_v26  ;;  %v7621_v26 = vld [vmem:[#allocation16_spill] sm:$0xff] }
 0x1b9   :  { %v4589_v36 = vpop.eup %4588 }
 0x1ba   :  { %v6020_v44 = vadd.f32 %v1768_v40, %v1766_v32  ;;  %v1769_v39 = vmul.f32 %v4589_v36, %v4587_v43  ;;  %v4591_v42 = vpop.eup %4590  ;;  %v7612_v43 = vld [vmem:[#allocation6_spill] sm:$0xff]  ;;  %v7617_v32 = vld [vmem:[#allocation12_spill] sm:$0xff]  ;;  %v7618_v36 = vld [vmem:[#allocation11_spill] sm:$0xff] }
 0x1bb   :  { %1897 = vmatpush1.bf16.msra.mxu0 %v5793_v57  ;;  %1940 = vmatpush1.bf16.msra.mxu1 %v5800_v58  ;;  %v1767_v24 = vmul.f32 0.0, %v4591_v42  ;;  %v7623_v42 = vld [vmem:[#allocation17_spill] sm:$0xff] }
 0x1bc   :  { %1898 = vmatprep.subr.bf16.mxu0 %v5805_v59  ;;  %1941 = vmatprep.subr.bf16.mxu1 %v5811_v60  ;;  %4594 = vtanh.f32 %v6020_v44 }
 0x1bd   :  { %v6027_v22 = vadd.f32 %v1769_v39, %v1767_v24  ;;  %4596 = vrcp.f32 %v1751_v31  ;;  %v7622_v39 = vld [vmem:[#allocation15_spill] sm:$0xff]  ;;  %v7624_v31 = vld [vmem:[#allocation18_spill] sm:$0xff]  ;;  %v7625_v24 = vld [vmem:[#allocation20_spill] sm:$0xff] }
 0x1bf   :  { %1899 = vmatpush1.bf16.msra.mxu0 %v5817_v61  ;;  %1942 = vmatpush1.bf16.msra.mxu1 %v5824_v62  ;;  %4598 = vtanh.f32 %v6027_v22 }
 0x1c0   :  { %1900 = vmatprep.subr.bf16.mxu0 %v5829_v63  ;;  %1943 = vmatprep.subr.bf16.mxu1 %v5835_v0 }
 0x1c2   :  { %v4593_v21 = vpop.eup %4592 }
 0x1c3   :  { %1901 = vmatpush1.bf16.msra.mxu0 %v5841_v1  ;;  %1944 = vmatpush1.bf16.msra.mxu1 %v5848_v2 }
 0x1c4   :  { %1902 = vmatprep.subr.bf16.mxu0 %v5853_v4  ;;  %1945 = vmatprep.subr.bf16.mxu1 %v5859_v5 }
 0x1c6   :  { %v4595_v23 = vpop.eup %4594 }
 0x1c7   :  { %1903 = vmatpush1.bf16.msra.mxu0 %v7607_v20  ;;  %1946 = vmatpush1.bf16.msra.mxu1 %v5872_v9  ;;  %v4597_v34 = vpop.eup %4596  ;;  %v6044_v40 = vmul.f32 %v4595_v23, %v4593_v21  ;;  %v7626_v21 = vld [vmem:[#allocation19_spill] sm:$0xff]  ;;  %v7627_v23 = vld [vmem:[#allocation21_spill] sm:$0xff] }
 0x1c8   :  { %1904 = vmatprep.subr.bf16.mxu0 %v5877_v11  ;;  %1947 = vmatprep.subr.bf16.mxu1 %v5883_v12 }
 0x1c9   :  { %v4599_v19 = vpop.eup %4598  ;;  %7608 = vst [vmem:[#allocation30_spill] sm:$0xff] %v6044_v40 }
 0x1ca   :  { %v6046_v30 = vmul.f32 %v4599_v19, %v4597_v34  ;;  %v7628_v34 = vld [vmem:[#allocation22_spill] sm:$0xff]  ;;  %v7629_v19 = vld [vmem:[#allocation24_spill] sm:$0xff] }
 0x1cb   :  { %1905 = vmatpush1.bf16.msra.mxu0 %v5889_v13  ;;  %1948 = vmatpush1.bf16.msra.mxu1 %v5896_v3 }
 0x1cc   :  { %7609 = vst [vmem:[#allocation38_spill] sm:$0xff] %v6046_v30  ;;  %2094 = vmatprep.subr.bf16.mxu0 %v5448_v8  ;;  %2137 = vmatprep.subr.bf16.mxu1 %v5458_v10  ;;  %v1889_v28 = vpack.c.bf16 %v6046_v30, %v6044_v40  ;;  %v7610_v8 = vld [vmem:[#allocation4_spill] sm:$0xff]  ;;  %v7611_v10 = vld [vmem:[#allocation5_spill] sm:$0xff] }
 0x1ce   :  { %1923 = vmatmul.mubr.bf16.vlgmr.msra.gmra.mrb[56].mxu0 %v1889_v28  ;;  %1966 = vmatmul.mubr.bf16.vlgmr.msra.gmra.mrb[56].mxu1 %v1889_v28  ;;  %v7630_v28 = vld [vmem:[#allocation23_spill] sm:$0xff] }
 0x1cf   :  { %2095 = vmatpush1.bf16.msra.mxu0 %v5496_v14  ;;  %2138 = vmatpush1.bf16.msra.mxu1 %v5506_v16  ;;  %v7613_v14 = vld [vmem:[#allocation8_spill] sm:$0xff]  ;;  %v7614_v16 = vld [vmem:[#allocation7_spill] sm:$0xff] }
 0x1d0   :  { %2096 = vmatprep.subr.bf16.mxu0 %v5501_v15  ;;  %2139 = vmatprep.subr.bf16.mxu1 %v5512_v17  ;;  %v7615_v15 = vld [vmem:[#allocation9_spill] sm:$0xff]  ;;  %v7616_v17 = vld [vmem:[#allocation10_spill] sm:$0xff] }
 0x1d1   :  { %2126 = vmatprep.mubr.bf16.mxu0 %v7599_v6  ;;  %2169 = vmatprep.mubr.bf16.mxu1 %v7599_v6 }
 0x1d3   :  { %2097 = vmatpush1.bf16.msra.mxu0 %v5519_v18  ;;  %2140 = vmatpush1.bf16.msra.mxu1 %v5533_v7  ;;  %v7619_v18 = vld [vmem:[#allocation13_spill] sm:$0xff]  ;;  %v7620_v7 = vld [vmem:[#allocation14_spill] sm:$0xff] }
 0x1d4   :  { %2098 = vmatprep.subr.bf16.mxu0 %v7610_v8  ;;  %2141 = vmatprep.subr.bf16.mxu1 %v7611_v10  ;;  %v7631_v8 = vld [vmem:[#allocation25_spill] sm:$0xff]  ;;  %v7632_v10 = vld [vmem:[#allocation26_spill] sm:$0xff] }
 0x1d7   :  { %2099 = vmatpush1.bf16.msra.mxu0 %v7612_v43  ;;  %2142 = vmatpush1.bf16.msra.mxu1 %v7613_v14  ;;  %v7633_v43 = vld [vmem:[#allocation27_spill] sm:$0xff]  ;;  %v7634_v14 = vld [vmem:[#allocation28_spill] sm:$0xff] }
 0x1d8   :  { %2100 = vmatprep.subr.bf16.mxu0 %v7614_v16  ;;  %2143 = vmatprep.subr.bf16.mxu1 %v7615_v15  ;;  %v7635_v16 = vld [vmem:[#allocation29_spill] sm:$0xff] }
 0x1db   :  { %2101 = vmatpush1.bf16.msra.mxu0 %v7616_v17  ;;  %2144 = vmatpush1.bf16.msra.mxu1 %v7617_v32  ;;  %v7636_v32 = vld [vmem:[#allocation31_spill] sm:$0xff] }
 0x1dc   :  { %2102 = vmatprep.subr.bf16.mxu0 %v7618_v36  ;;  %2145 = vmatprep.subr.bf16.mxu1 %v7619_v18 }
 0x1df   :  { %2103 = vmatpush1.bf16.msra.mxu0 %v7620_v7  ;;  %2146 = vmatpush1.bf16.msra.mxu1 %v7621_v26  ;;  %v7637_v26 = vld [vmem:[#allocation32_spill] sm:$0xff] }
 0x1e0   :  { %2104 = vmatprep.subr.bf16.mxu0 %v7622_v39  ;;  %2147 = vmatprep.subr.bf16.mxu1 %v7623_v42 }
 0x1e3   :  { %2105 = vmatpush1.bf16.msra.mxu0 %v7624_v31  ;;  %2148 = vmatpush1.bf16.msra.mxu1 %v7625_v24 }
 0x1e4   :  { %2106 = vmatprep.subr.bf16.mxu0 %v7626_v21  ;;  %2149 = vmatprep.subr.bf16.mxu1 %v7627_v23 }
 0x1e7   :  { %2107 = vmatpush1.bf16.msra.mxu0 %v7628_v34  ;;  %2150 = vmatpush1.bf16.msra.mxu1 %v7629_v19 }
 0x1e8   :  { %2108 = vmatprep.subr.bf16.mxu0 %v7630_v28  ;;  %2151 = vmatprep.subr.bf16.mxu1 %v7631_v8 }
 0x1eb   :  { %2109 = vmatpush1.bf16.msra.mxu0 %v7632_v10  ;;  %2152 = vmatpush1.bf16.msra.mxu1 %v7633_v43  ;;  %v7638_v43 = vld [vmem:[#allocation33_spill] sm:$0xff] }
 0x1ec   :  { %2198 = vmatprep.subr.bf16.mxu0 %v7634_v14  ;;  %2241 = vmatprep.subr.bf16.mxu1 %v7635_v16 }
 0x281   :  { %v1820_v15 = vpop.f32.mrb[4].mxu0  ;;  %v1863_v17 = vpop.f32.mrb[4].mxu1 }
 0x282   :  { %v4179_v36 = vadd.f32 %v1820_v15, %v7636_v32  ;;  %v1822_v18 = vpop.f32.mrb[5].mxu0  ;;  %v1865_v7 = vpop.f32.mrb[5].mxu1  ;;  %v4211_v14 = vadd.f32 %v1863_v17, %v7638_v43  ;;  %v7639_v15 = vld [vmem:[#allocation34_spill] sm:$0xff] }
 0x283   :  { %v4180_v39 = vadd.f32 %v1822_v18, %v7637_v26  ;;  %v1824_v42 = vpop.f32.mrb[6].mxu0  ;;  %v1867_v31 = vpop.f32.mrb[6].mxu1  ;;  %v4212_v18 = vadd.f32 %v1865_v7, %v7639_v15 }
 0x284   :  { %v4091_v24 = vmul.f32 -1.442695, %v4179_v36  ;;  %v4181_v21 = vadd.f32 %v1824_v42, %v7636_v32  ;;  %v1826_v23 = vpop.f32.mrb[7].mxu0  ;;  %v1869_v34 = vpop.f32.mrb[7].mxu1  ;;  %v4213_v16 = vadd.f32 %v1867_v31, %v7638_v43  ;;  %v4093_v36 = vmul.f32 -1.442695, %v4211_v14 }
 0x285   :  { %v4092_v19 = vmul.f32 -1.442695, %v4180_v39  ;;  %v4182_v28 = vadd.f32 %v1826_v23, %v7637_v26  ;;  %v4214_v39 = vadd.f32 %v1869_v34, %v7639_v15 }
 0x286   :  { %4600 = vpow2.f32 %v4091_v24  ;;  %v4094_v8 = vmul.f32 -1.442695, %v4181_v21  ;;  %v4096_v30 = vmul.f32 -1.442695, %v4213_v16 }
 0x287   :  { %v4095_v10 = vmul.f32 -1.442695, %v4182_v28  ;;  %4602 = vpow2.f32 %v4092_v19 }
 0x288   :  { %4604 = vpow2.f32 %v4094_v8 }
 0x289   :  { %4606 = vpow2.f32 %v4095_v10 }
 0x28a   :  { %4608 = vtanh.f32 %v4212_v18 }
 0x28b   :  { %4610 = vpow2.f32 %v4093_v36 }
 0x28c   :  { %4612 = vpow2.f32 %v4096_v30 }
 0x290   :  { %v4601_v42 = vpop.eup %4600 }
 0x291   :  { %v2002_v40 = vadd.f32 1.0, %v4601_v42  ;;  %v4603_v24 = vpop.eup %4602 }
 0x292   :  { %v4605_v21 = vpop.eup %4604  ;;  %v2003_v23 = vadd.f32 1.0, %v4603_v24 }
 0x293   :  { %4614 = vrcp.f32 %v2002_v40  ;;  %v2005_v17 = vadd.f32 1.0, %v4605_v21  ;;  %v4607_v19 = vpop.eup %4606 }
 0x294   :  { %4616 = vtanh.f32 %v4214_v39  ;;  %v2006_v31 = vadd.f32 1.0, %v4607_v19  ;;  %v4609_v7 = vpop.eup %4608 }
 0x295   :  { %4618 = vrcp.f32 %v2003_v23  ;;  %v4611_v28 = vpop.eup %4610 }
 0x296   :  { %4620 = vrcp.f32 %v2005_v17  ;;  %v4613_v8 = vpop.eup %4612  ;;  %v2004_v36 = vadd.f32 1.0, %v4611_v28 }
 0x297   :  { %4622 = vrcp.f32 %v2006_v31  ;;  %v2007_v39 = vadd.f32 1.0, %v4613_v8 }
 0x298   :  { %4624 = vrcp.f32 %v2004_v36 }
 0x29d   :  { %v4615_v10 = vpop.eup %4614 }
 0x29e   :  { %v4617_v14 = vpop.eup %4616  ;;  %v2024_v34 = vmul.f32 %v4615_v10, %v4609_v7 }
 0x29f   :  { %v4619_v16 = vpop.eup %4618 }
 0x2a0   :  { %v4621_v18 = vpop.eup %4620  ;;  %v2022_v30 = vmul.f32 %v4619_v16, %v5978_v25 }
 0x2a1   :  { %v2025_v40 = vmul.f32 %v4621_v18, %v4617_v14  ;;  %v4623_v42 = vpop.eup %4622  ;;  %v1924_v21 = vpop.f32.mrb[56].mxu0 }
 0x2a2   :  { %v6095_v24 = vadd.f32 %v2024_v34, %v2022_v30  ;;  %v1967_v23 = vpop.f32.mrb[56].mxu1  ;;  %v2023_v17 = vmul.f32 %v4623_v42, %v5985_v29  ;;  %v4263_v19 = vadd.f32 %v1924_v21, %v5973_v41  ;;  %v1926_v31 = vpop.f32.mrb[57].mxu0 }
 0x2a3   :  { %v1969_v35 = vpop.f32.mrb[57].mxu1  ;;  %v4264_v7 = vadd.f32 %v1926_v31, %v5976_v33  ;;  %v1928_v10 = vpop.f32.mrb[58].mxu0  ;;  %v4295_v42 = vadd.f32 %v1967_v23, %v5991_v38 }
 0x2a4   :  { %v1971_v28 = vpop.f32.mrb[58].mxu1  ;;  %4626 = vtanh.f32 %v6095_v24  ;;  %v6101_v25 = vadd.f32 %v2025_v40, %v2023_v17  ;;  %v4097_v14 = vmul.f32 -1.442695, %v4263_v19  ;;  %v4265_v8 = vadd.f32 %v1928_v10, %v5973_v41  ;;  %v1930_v34 = vpop.f32.mrb[59].mxu0 }
 0x2a5   :  { %v1973_v16 = vpop.f32.mrb[59].mxu1  ;;  %4628 = vrcp.f32 %v2007_v39  ;;  %v4098_v29 = vmul.f32 -1.442695, %v4264_v7  ;;  %v4266_v18 = vadd.f32 %v1930_v34, %v5976_v33  ;;  %v4297_v40 = vadd.f32 %v1971_v28, %v5991_v38  ;;  %v4625_v21 = vpop.eup %4624 }
 0x2a6   :  { %4630 = vtanh.f32 %v6101_v25  ;;  %v4100_v36 = vmul.f32 -1.442695, %v4265_v8  ;;  %v4296_v17 = vadd.f32 %v1969_v35, %v5994_v37  ;;  %v4099_v39 = vmul.f32 -1.442695, %v4295_v42 }
 0x2a7   :  { %4632 = vpow2.f32 %v4097_v14  ;;  %v4101_v30 = vmul.f32 -1.442695, %v4266_v18  ;;  %v4102_v7 = vmul.f32 -1.442695, %v4297_v40  ;;  %v4298_v14 = vadd.f32 %v1973_v16, %v5994_v37 }
 0x2a8   :  { %4634 = vpow2.f32 %v4098_v29 }
 0x2a9   :  { %4636 = vpow2.f32 %v4100_v36 }
 0x2aa   :  { %4638 = vpow2.f32 %v4101_v30 }
 0x2ab   :  { %4640 = vtanh.f32 %v4296_v17 }
 0x2ac   :  { %4642 = vpow2.f32 %v4099_v39  ;;  %v6245_v39 = vld [vmem:[%s7436_s3 + $0x6c] ss:$16 sps:$4 sm:$0xff]  }
 0x2ad   :  { %4644 = vpow2.f32 %v4102_v7  ;;  %v6257_v7 = vld [vmem:[%s7436_s3 + $0x68] ss:$16 sps:$4 sm:$0xff]  }
 0x2ae   :  { %v4627_v19 = vpop.eup %4626 }
 0x2af   :  { %v4629_v31 = vpop.eup %4628  ;;  %v6110_v8 = vmul.f32 %v4627_v19, %v4625_v21 }
 0x2b0   :  { %v4631_v10 = vpop.eup %4630 }
 0x2b1   :  { %v4633_v34 = vpop.eup %4632  ;;  %v6112_v29 = vmul.f32 %v4631_v10, %v4629_v31  ;;  %v6251_v31 = vld [vmem:[%s7436_s3 + $0x60] ss:$16 sps:$4 sm:$0xff]   ;;  %v6263_v10 = vld [vmem:[%s7436_s3 + $0x84] ss:$16 sps:$4 sm:$0xff]  }
 0x2b2   :  { %v2050_v23 = vadd.f32 1.0, %v4633_v34  ;;  %v4635_v28 = vpop.eup %4634  ;;  %v6269_v34 = vld [vmem:[%s7436_s3 + $0x8c] ss:$16 sps:$4 sm:$0xff]  }
 0x2b3   :  { %v2093_v35 = vpack.c.bf16 %v6112_v29, %v6110_v8  ;;  %v4637_v18 = vpop.eup %4636  ;;  %v2051_v36 = vadd.f32 1.0, %v4635_v28  ;;  %v6287_v28 = vld [vmem:[%s7436_s3 + $0xa4] ss:$16 sps:$4 sm:$0xff]  }
 0x2b4   :  { %4646 = vrcp.f32 %v2050_v23  ;;  %v2053_v30 = vadd.f32 1.0, %v4637_v18  ;;  %v4639_v42 = vpop.eup %4638  ;;  %v6281_v23 = vld [vmem:[%s7436_s3 + $0x88] ss:$16 sps:$4 sm:$0xff]   ;;  %7642 = vst [vmem:[#allocation6_spill] sm:$0xff] %v6287_v28  ;;  %v6299_v18 = vld [vmem:[%s7436_s3 + $0xa0] ss:$16 sps:$4 sm:$0xff]  }
 0x2b5   :  { %4648 = vtanh.f32 %v4298_v14  ;;  %2127 = vmatmul.mubr.bf16.vlgmr.msra.gmra.mrb[8].mxu0 %v2093_v35  ;;  %2170 = vmatmul.mubr.bf16.vlgmr.msra.gmra.mrb[8].mxu1 %v2093_v35  ;;  %v2054_v16 = vadd.f32 1.0, %v4639_v42  ;;  %v4641_v40 = vpop.eup %4640  ;;  %v6275_v14 = vld [vmem:[%s7436_s3 + $0x80] ss:$16 sps:$4 sm:$0xff]   ;;  %7641 = vst [vmem:[#allocation5_spill] sm:$0xff] %v6281_v23  ;;  %v6293_v35 = vld [vmem:[%s7436_s3 + $0xac] ss:$16 sps:$4 sm:$0xff]  }
 0x2b6   :  { %4650 = vrcp.f32 %v2051_v36  ;;  %2199 = vmatpush1.bf16.msra.mxu0 %v5720_v45  ;;  %2242 = vmatpush1.bf16.msra.mxu1 %v5725_v46  ;;  %v4643_v45 = vpop.eup %4642  ;;  %7640 = vst [vmem:[#allocation4_spill] sm:$0xff] %v6275_v14  ;;  %7643 = vst [vmem:[#allocation8_spill] sm:$0xff] %v6293_v35  ;;  %v6305_v36 = vld [vmem:[%s7436_s3 + $0xa8] ss:$16 sps:$4 sm:$0xff]   ;;  %v6317_v42 = vld [vmem:[%s7436_s3 + $0xcc] ss:$16 sps:$4 sm:$0xff]  }
 0x2b7   :  { %4652 = vrcp.f32 %v2053_v30  ;;  %2200 = vmatprep.subr.bf16.mxu0 %v5730_v47  ;;  %2243 = vmatprep.subr.bf16.mxu1 %v5735_v48  ;;  %v4645_v46 = vpop.eup %4644  ;;  %v2052_v17 = vadd.f32 1.0, %v4643_v45  ;;  %7644 = vst [vmem:[#allocation7_spill] sm:$0xff] %v6299_v18  ;;  %7645 = vst [vmem:[#allocation9_spill] sm:$0xff] %v6305_v36  ;;  %v6311_v30 = vld [vmem:[%s7436_s3 + $0xc4] ss:$16 sps:$4 sm:$0xff]  }
 0x2b8   :  { %2230 = vmatprep.mubr.bf16.mxu0 %v7599_v6  ;;  %2273 = vmatprep.mubr.bf16.mxu1 %v7599_v6  ;;  %4654 = vrcp.f32 %v2054_v16  ;;  %7646 = vst [vmem:[#allocation10_spill] sm:$0xff] %v6311_v30  ;;  %7647 = vst [vmem:[#allocation12_spill] sm:$0xff] %v6317_v42  ;;  %v6323_v16 = vld [vmem:[%s7436_s3 + $0xc0] ss:$16 sps:$4 sm:$0xff]   ;;  %v6335_v45 = vld [vmem:[%s7436_s3 + $0xe4] ss:$16 sps:$4 sm:$0xff]  }
 0x2b9   :  { %4656 = vrcp.f32 %v2052_v17  ;;  %7648 = vst [vmem:[#allocation11_spill] sm:$0xff] %v6323_v16  ;;  %7650 = vst [vmem:[#allocation14_spill] sm:$0xff] %v6335_v45 }
 0x2ba   :  { %2201 = vmatpush1.bf16.msra.mxu0 %v5743_v49  ;;  %2244 = vmatpush1.bf16.msra.mxu1 %v5750_v50 }
 0x2bb   :  { %2202 = vmatprep.subr.bf16.mxu0 %v5755_v51  ;;  %2245 = vmatprep.subr.bf16.mxu1 %v5761_v52 }
 0x2be   :  { %v4647_v21 = vpop.eup %4646  ;;  %2203 = vmatpush1.bf16.msra.mxu0 %v5769_v53  ;;  %2246 = vmatpush1.bf16.msra.mxu1 %v5776_v54  ;;  %v2055_v54 = vadd.f32 1.0, %v4645_v46  ;;  %v6341_v46 = vld [vmem:[%s7436_s3 + $0xec] ss:$16 sps:$4 sm:$0xff]  }
 0x2bf   :  { %v4649_v47 = vpop.eup %4648  ;;  %v2072_v48 = vmul.f32 %v4647_v21, %v4641_v40  ;;  %2204 = vmatprep.subr.bf16.mxu0 %v5781_v55  ;;  %2247 = vmatprep.subr.bf16.mxu1 %v5787_v56  ;;  %v6329_v40 = vld [vmem:[%s7436_s3 + $0xc8] ss:$16 sps:$4 sm:$0xff]   ;;  %7651 = vst [vmem:[#allocation16_spill] sm:$0xff] %v6341_v46  ;;  %v6347_v21 = vld [vmem:[%s7436_s3 + $0xe0] ss:$16 sps:$4 sm:$0xff]  }
 0x2c0   :  { %v4651_v49 = vpop.eup %4650  ;;  %7649 = vst [vmem:[#allocation13_spill] sm:$0xff] %v6329_v40  ;;  %7652 = vst [vmem:[#allocation15_spill] sm:$0xff] %v6347_v21 }
 0x2c1   :  { %v4653_v50 = vpop.eup %4652  ;;  %v2070_v51 = vmul.f32 %v4651_v49, %v6020_v44  ;;  %v6227_v44 = vld [vmem:[%s7436_s3 + $0x40] ss:$16 sps:$4 sm:$0xff]   ;;  %v6365_v49 = vld [vmem:[%s7437_s4 + $0xc] ss:$16 sps:$4 sm:$0xff]  }
 0x2c2   :  { %v2073_v19 = vmul.f32 %v4653_v50, %v4649_v47  ;;  %2205 = vmatpush1.bf16.msra.mxu0 %v5793_v57  ;;  %2248 = vmatpush1.bf16.msra.mxu1 %v5800_v58  ;;  %v4655_v52 = vpop.eup %4654  ;;  %v6353_v47 = vld [vmem:[%s7436_s3 + $0xe8] ss:$16 sps:$4 sm:$0xff]   ;;  %7655 = vst [vmem:[#allocation20_spill] sm:$0xff] %v6365_v49 }
 0x2c3   :  { %v6133_v53 = vadd.f32 %v2072_v48, %v2070_v51  ;;  %2206 = vmatprep.subr.bf16.mxu0 %v5805_v59  ;;  %2249 = vmatprep.subr.bf16.mxu1 %v5811_v60  ;;  %v2071_v55 = vmul.f32 %v4655_v52, %v6027_v22  ;;  %v4657_v57 = vpop.eup %4656  ;;  %v6233_v22 = vld [vmem:[%s7436_s3 + $0x48] ss:$16 sps:$4 sm:$0xff]   ;;  %7653 = vst [vmem:[#allocation17_spill] sm:$0xff] %v6353_v47  ;;  %v6359_v48 = vld [vmem:[%s7437_s4 + $0x4] ss:$16 sps:$4 sm:$0xff]  }
 0x2c4   :  { %7654 = vst [vmem:[#allocation18_spill] sm:$0xff] %v6359_v48 }
 0x2c5   :  { %4658 = vtanh.f32 %v6133_v53  ;;  %v6139_v56 = vadd.f32 %v2073_v19, %v2071_v55 }
 0x2c6   :  { %2207 = vmatpush1.bf16.msra.mxu0 %v5817_v61  ;;  %2250 = vmatpush1.bf16.msra.mxu1 %v5824_v62  ;;  %4660 = vrcp.f32 %v2055_v54 }
 0x2c7   :  { %2208 = vmatprep.subr.bf16.mxu0 %v5829_v63  ;;  %2251 = vmatprep.subr.bf16.mxu1 %v5835_v0  ;;  %4662 = vtanh.f32 %v6139_v56  ;;  %v6163_v63 = vld [vmem:[%s7436_s3 + $0x4] ss:$16 sps:$4 sm:$0xff]   ;;  %v6169_v0 = vld [vmem:[%s7436_s3 + $0xc] ss:$16 sps:$4 sm:$0xff]  }
 0x2ca   :  { %2209 = vmatpush1.bf16.msra.mxu0 %v5841_v1  ;;  %2252 = vmatpush1.bf16.msra.mxu1 %v5848_v2  ;;  %v6177_v1 = vld [vmem:[%s7436_s3] ss:$16 sps:$4 sm:$0xff]   ;;  %v6183_v2 = vld [vmem:[%s7436_s3 + $0x8] ss:$16 sps:$4 sm:$0xff]  }
 0x2cb   :  { %2210 = vmatprep.subr.bf16.mxu0 %v5853_v4  ;;  %2253 = vmatprep.subr.bf16.mxu1 %v5859_v5  ;;  %v6189_v4 = vld [vmem:[%s7436_s3 + $0x24] ss:$16 sps:$4 sm:$0xff]   ;;  %v6195_v5 = vld [vmem:[%s7436_s3 + $0x2c] ss:$16 sps:$4 sm:$0xff]  }
 0x2ce   :  { %2211 = vmatpush1.bf16.msra.mxu0 %v7607_v20  ;;  %2254 = vmatpush1.bf16.msra.mxu1 %v5872_v9  ;;  %v6203_v9 = vld [vmem:[%s7436_s3 + $0x20] ss:$16 sps:$4 sm:$0xff]   ;;  %v6239_v20 = vld [vmem:[%s7436_s3 + $0x64] ss:$16 sps:$4 sm:$0xff]  }
 0x2cf   :  { %2212 = vmatprep.subr.bf16.mxu0 %v5877_v11  ;;  %2255 = vmatprep.subr.bf16.mxu1 %v5883_v12  ;;  %v4659_v58 = vpop.eup %4658  ;;  %v6209_v11 = vld [vmem:[%s7436_s3 + $0x28] ss:$16 sps:$4 sm:$0xff]   ;;  %v6215_v12 = vld [vmem:[%s7436_s3 + $0x44] ss:$16 sps:$4 sm:$0xff]  }
 0x2d0   :  { %v4661_v59 = vpop.eup %4660  ;;  %v6156_v61 = vmul.f32 %v4659_v58, %v4657_v57 }
 0x2d1   :  { %v4663_v60 = vpop.eup %4662 }
 0x2d2   :  { %2213 = vmatpush1.bf16.msra.mxu0 %v5889_v13  ;;  %2256 = vmatpush1.bf16.msra.mxu1 %v5896_v3  ;;  %v6158_v62 = vmul.f32 %v4663_v60, %v4661_v59  ;;  %v6221_v13 = vld [vmem:[%s7436_s3 + $0x4c] ss:$16 sps:$4 sm:$0xff]  }
 0x2d3   :  { %2402 = vmatprep.subr.bf16.mxu0 %v6163_v63  ;;  %2445 = vmatprep.subr.bf16.mxu1 %v6169_v0 }
 0x2d4   :  { %v2197_v3 = vpack.c.bf16 %v6158_v62, %v6156_v61 }
 0x2d6   :  { %2231 = vmatmul.mubr.bf16.vlgmr.msra.gmra.mrb[52].mxu0 %v2197_v3  ;;  %2274 = vmatmul.mubr.bf16.vlgmr.msra.gmra.mrb[52].mxu1 %v2197_v3 }
 0x2d7   :  { %2403 = vmatpush1.bf16.msra.mxu0 %v6177_v1  ;;  %2446 = vmatpush1.bf16.msra.mxu1 %v6183_v2 }
 0x2d8   :  { %2404 = vmatprep.subr.bf16.mxu0 %v6189_v4  ;;  %2447 = vmatprep.subr.bf16.mxu1 %v6195_v5 }
 0x2d9   :  { %2434 = vmatprep.mubr.bf16.mxu0 %v7599_v6  ;;  %2477 = vmatprep.mubr.bf16.mxu1 %v7599_v6 }
 0x2db   :  { %2405 = vmatpush1.bf16.msra.mxu0 %v6203_v9  ;;  %2448 = vmatpush1.bf16.msra.mxu1 %v6209_v11 }
 0x2dc   :  { %2406 = vmatprep.subr.bf16.mxu0 %v6215_v12  ;;  %2449 = vmatprep.subr.bf16.mxu1 %v6221_v13 }
 0x2df   :  { %2407 = vmatpush1.bf16.msra.mxu0 %v6227_v44  ;;  %2450 = vmatpush1.bf16.msra.mxu1 %v6233_v22 }
 0x2e0   :  { %2408 = vmatprep.subr.bf16.mxu0 %v6239_v20  ;;  %2451 = vmatprep.subr.bf16.mxu1 %v6245_v39 }
 0x2e3   :  { %2409 = vmatpush1.bf16.msra.mxu0 %v6251_v31  ;;  %2452 = vmatpush1.bf16.msra.mxu1 %v6257_v7 }
 0x2e4   :  { %2410 = vmatprep.subr.bf16.mxu0 %v6263_v10  ;;  %2453 = vmatprep.subr.bf16.mxu1 %v6269_v34 }
 0x2e7   :  { %2411 = vmatpush1.bf16.msra.mxu0 %v6275_v14  ;;  %2454 = vmatpush1.bf16.msra.mxu1 %v6281_v23 }
 0x2e8   :  { %2412 = vmatprep.subr.bf16.mxu0 %v6287_v28  ;;  %2455 = vmatprep.subr.bf16.mxu1 %v6293_v35 }
 0x2eb   :  { %2413 = vmatpush1.bf16.msra.mxu0 %v6299_v18  ;;  %2456 = vmatpush1.bf16.msra.mxu1 %v6305_v36 }
 0x2ec   :  { %2414 = vmatprep.subr.bf16.mxu0 %v6311_v30  ;;  %2457 = vmatprep.subr.bf16.mxu1 %v6317_v42 }
 0x2ef   :  { %2415 = vmatpush1.bf16.msra.mxu0 %v6323_v16  ;;  %2458 = vmatpush1.bf16.msra.mxu1 %v6329_v40 }
 0x2f0   :  { %2416 = vmatprep.subr.bf16.mxu0 %v6335_v45  ;;  %2459 = vmatprep.subr.bf16.mxu1 %v6341_v46 }
 0x2f3   :  { %2417 = vmatpush1.bf16.msra.mxu0 %v6347_v21  ;;  %2460 = vmatpush1.bf16.msra.mxu1 %v6353_v47 }
 0x2f4   :  { %2506 = vmatprep.subr.bf16.mxu0 %v6359_v48  ;;  %2549 = vmatprep.subr.bf16.mxu1 %v6365_v49 }
 0x388   :  { %v2128_v50 = vpop.f32.mrb[8].mxu0  ;;  %v2171_v17 = vpop.f32.mrb[8].mxu1 }
 0x389   :  { %v4183_v51 = vadd.f32 %v2128_v50, %v7636_v32  ;;  %v2130_v19 = vpop.f32.mrb[9].mxu0  ;;  %v2173_v52 = vpop.f32.mrb[9].mxu1  ;;  %v4215_v50 = vadd.f32 %v2171_v17, %v7638_v43 }
 0x38a   :  { %v4184_v54 = vadd.f32 %v2130_v19, %v7637_v26  ;;  %v2132_v55 = vpop.f32.mrb[10].mxu0  ;;  %v2175_v57 = vpop.f32.mrb[10].mxu1  ;;  %v4216_v19 = vadd.f32 %v2173_v52, %v7639_v15 }
 0x38b   :  { %v4103_v58 = vmul.f32 -1.442695, %v4183_v51  ;;  %v4185_v59 = vadd.f32 %v2132_v55, %v7636_v32  ;;  %v2134_v60 = vpop.f32.mrb[11].mxu0  ;;  %v2177_v3 = vpop.f32.mrb[11].mxu1  ;;  %v4217_v46 = vadd.f32 %v2175_v57, %v7638_v43  ;;  %v4105_v51 = vmul.f32 -1.442695, %v4215_v50 }
 0x38c   :  { %v4104_v48 = vmul.f32 -1.442695, %v4184_v54  ;;  %v4186_v47 = vadd.f32 %v2134_v60, %v7637_v26  ;;  %v4218_v54 = vadd.f32 %v2177_v3, %v7639_v15 }
 0x38d   :  { %4664 = vpow2.f32 %v4103_v58  ;;  %v4106_v49 = vmul.f32 -1.442695, %v4185_v59  ;;  %v4108_v45 = vmul.f32 -1.442695, %v4217_v46 }
 0x38e   :  { %v4107_v21 = vmul.f32 -1.442695, %v4186_v47  ;;  %4666 = vpow2.f32 %v4104_v48 }
 0x38f   :  { %4668 = vpow2.f32 %v4106_v49 }
 0x390   :  { %4670 = vpow2.f32 %v4107_v21 }
 0x391   :  { %4672 = vtanh.f32 %v4216_v19 }
 0x392   :  { %4674 = vpow2.f32 %v4105_v51 }
 0x393   :  { %4676 = vpow2.f32 %v4108_v45 }
 0x397   :  { %v4665_v55 = vpop.eup %4664 }
 0x398   :  { %v2310_v32 = vadd.f32 1.0, %v4665_v55  ;;  %v4667_v58 = vpop.eup %4666 }
 0x399   :  { %v4669_v47 = vpop.eup %4668  ;;  %v2311_v48 = vadd.f32 1.0, %v4667_v58 }
 0x39a   :  { %4678 = vrcp.f32 %v2310_v32  ;;  %v2313_v17 = vadd.f32 1.0, %v4669_v47  ;;  %v4671_v49 = vpop.eup %4670 }
 0x39b   :  { %4680 = vtanh.f32 %v4218_v54  ;;  %v2314_v21 = vadd.f32 1.0, %v4671_v49  ;;  %v4673_v52 = vpop.eup %4672 }
 0x39c   :  { %4682 = vrcp.f32 %v2311_v48  ;;  %v4675_v46 = vpop.eup %4674 }
 0x39d   :  { %4684 = vrcp.f32 %v2313_v17  ;;  %v4677_v57 = vpop.eup %4676  ;;  %v2312_v19 = vadd.f32 1.0, %v4675_v46 }
 0x39e   :  { %4686 = vrcp.f32 %v2314_v21  ;;  %v2315_v54 = vadd.f32 1.0, %v4677_v57 }
 0x39f   :  { %4688 = vrcp.f32 %v2312_v19 }
 0x3a4   :  { %v4679_v59 = vpop.eup %4678 }
 0x3a5   :  { %v4681_v60 = vpop.eup %4680  ;;  %v2332_v3 = vmul.f32 %v4679_v59, %v4673_v52 }
 0x3a6   :  { %v4683_v50 = vpop.eup %4682 }
 0x3a7   :  { %v4685_v51 = vpop.eup %4684  ;;  %v2330_v45 = vmul.f32 %v4683_v50, %v6095_v24 }
 0x3a8   :  { %v2333_v32 = vmul.f32 %v4685_v51, %v4681_v60  ;;  %v4687_v55 = vpop.eup %4686 }
 0x3a9   :  { %v6377_v58 = vadd.f32 %v2332_v3, %v2330_v45  ;;  %v2331_v47 = vmul.f32 %v4687_v55, %v6101_v25  ;;  %v2232_v48 = vpop.f32.mrb[52].mxu0  ;;  %v2275_v17 = vpop.f32.mrb[52].mxu1 }
 0x3aa   :  { %v4259_v49 = vadd.f32 %v2232_v48, %v5973_v41  ;;  %v2234_v21 = vpop.f32.mrb[53].mxu0  ;;  %v2277_v52 = vpop.f32.mrb[53].mxu1  ;;  %v4291_v55 = vadd.f32 %v2275_v17, %v5991_v38  ;;  %v7656_v17 = vld [vmem:[#allocation37_spill] sm:$0xff] }
 0x3ab   :  { %4690 = vtanh.f32 %v6377_v58  ;;  %v6382_v46 = vadd.f32 %v2333_v32, %v2331_v47  ;;  %v4260_v24 = vadd.f32 %v2234_v21, %v5976_v33  ;;  %v2236_v59 = vpop.f32.mrb[54].mxu0  ;;  %v2279_v60 = vpop.f32.mrb[54].mxu1 }
 0x3ac   :  { %4692 = vrcp.f32 %v2315_v54  ;;  %v4109_v3 = vmul.f32 -1.442695, %v4259_v49  ;;  %v4261_v57 = vadd.f32 %v2236_v59, %v5973_v41  ;;  %v2238_v50 = vpop.f32.mrb[55].mxu0  ;;  %v2281_v25 = vpop.f32.mrb[55].mxu1  ;;  %v4293_v54 = vadd.f32 %v2279_v60, %v5991_v38 }
 0x3ad   :  { %4694 = vtanh.f32 %v6382_v46  ;;  %v4110_v19 = vmul.f32 -1.442695, %v4260_v24  ;;  %v4262_v51 = vadd.f32 %v2238_v50, %v5976_v33  ;;  %v4689_v47 = vpop.eup %4688  ;;  %v2080_v49 = vmax.f32 %v6000_v27, %v6110_v8 }
 0x3ae   :  { %4696 = vpow2.f32 %v4109_v3  ;;  %v4112_v45 = vmul.f32 -1.442695, %v4261_v57  ;;  %v4111_v21 = vmul.f32 -1.442695, %v4291_v55  ;;  %v4292_v50 = vadd.f32 %v2277_v52, %v5994_v37 }
 0x3af   :  { %4698 = vpow2.f32 %v4110_v19  ;;  %v4113_v32 = vmul.f32 -1.442695, %v4262_v51  ;;  %v2081_v51 = vmax.f32 %v7656_v17, %v6112_v29  ;;  %v4294_v27 = vadd.f32 %v2281_v25, %v5994_v37  ;;  %v6403_v29 = vld [vmem:[%s7437_s4] ss:$16 sps:$4 sm:$0xff]   ;;  %v6409_v25 = vld [vmem:[%s7437_s4 + $0x8] ss:$16 sps:$4 sm:$0xff]  }
 0x3b0   :  { %4700 = vpow2.f32 %v4112_v45  ;;  %v4114_v45 = vmul.f32 -1.442695, %v4293_v54  ;;  %v6453_v17 = vld [vmem:[%s7437_s4 + $0x40] ss:$16 sps:$4 sm:$0xff]  }
 0x3b1   :  { %4702 = vpow2.f32 %v4113_v32 }
 0x3b2   :  { %4704 = vpow2.f32 %v4111_v21  ;;  %v6435_v21 = vld [vmem:[%s7437_s4 + $0x28] ss:$16 sps:$4 sm:$0xff]  }
 0x3b3   :  { %4706 = vtanh.f32 %v4292_v50 }
 0x3b5   :  { %v4691_v48 = vpop.eup %4690 }
 0x3b6   :  { %v2338_v59 = vmul.f32 %v4691_v48, %v4689_v47  ;;  %v4693_v24 = vpop.eup %4692  ;;  %v6421_v48 = vld [vmem:[%s7437_s4 + $0x2c] ss:$16 sps:$4 sm:$0xff]  }
 0x3b7   :  { %v4695_v3 = vpop.eup %4694 }
 0x3b8   :  { %v6393_v57 = vmax.f32 %v2080_v49, %v2338_v59  ;;  %v4697_v19 = vpop.eup %4696  ;;  %v2339_v33 = vmul.f32 %v4695_v3, %v4693_v24  ;;  %v6429_v49 = vld [vmem:[%s7437_s4 + $0x20] ss:$16 sps:$4 sm:$0xff]   ;;  %v6447_v24 = vld [vmem:[%s7437_s4 + $0x4c] ss:$16 sps:$4 sm:$0xff]  }
 0x3b9   :  { %v2358_v41 = vadd.f32 1.0, %v4697_v19  ;;  %v4699_v60 = vpop.eup %4698 }
 0x3ba   :  { %v6398_v8 = vmax.f32 %v2081_v51, %v2339_v33  ;;  %v2401_v32 = vpack.c.bf16 %v2339_v33, %v2338_v59  ;;  %v2359_v52 = vadd.f32 1.0, %v4699_v60  ;;  %v4701_v55 = vpop.eup %4700  ;;  %v6415_v33 = vld [vmem:[%s7437_s4 + $0x24] ss:$16 sps:$4 sm:$0xff]   ;;  %v6459_v51 = vld [vmem:[%s7437_s4 + $0x48] ss:$16 sps:$4 sm:$0xff]  }
 0x3bb   :  { %4708 = vrcp.f32 %v2358_v41  ;;  %v2361_v47 = vadd.f32 1.0, %v4701_v55  ;;  %v4703_v41 = vpop.eup %4702  ;;  %v6441_v59 = vld [vmem:[%s7437_s4 + $0x44] ss:$16 sps:$4 sm:$0xff]  }
 0x3bc   :  { %4710 = vpow2.f32 %v4114_v45  ;;  %2435 = vmatmul.mubr.bf16.vlgmr.msra.gmra.mrb[12].mxu0 %v2401_v32  ;;  %2478 = vmatmul.mubr.bf16.vlgmr.msra.gmra.mrb[12].mxu1 %v2401_v32  ;;  %v2362_v54 = vadd.f32 1.0, %v4703_v41  ;;  %v4705_v50 = vpop.eup %4704  ;;  %v6471_v32 = vld [vmem:[%s7437_s4 + $0x6c] ss:$16 sps:$4 sm:$0xff]  }
 0x3bd   :  { %4712 = vrcp.f32 %v2359_v52  ;;  %2507 = vmatpush1.bf16.msra.mxu0 %v6403_v29  ;;  %2550 = vmatpush1.bf16.msra.mxu1 %v6409_v25  ;;  %v4707_v3 = vpop.eup %4706  ;;  %7657 = vst [vmem:[#allocation19_spill] sm:$0xff] %v6471_v32  ;;  %v2360_v55 = vadd.f32 1.0, %v4705_v50 }
 0x3be   :  { %4714 = vtanh.f32 %v4294_v27  ;;  %2508 = vmatprep.subr.bf16.mxu0 %v6415_v33  ;;  %2551 = vmatprep.subr.bf16.mxu1 %v6421_v48  ;;  %v6465_v27 = vld [vmem:[%s7437_s4 + $0x64] ss:$16 sps:$4 sm:$0xff]  }
 0x3bf   :  { %4716 = vrcp.f32 %v2361_v47  ;;  %2538 = vmatprep.mubr.bf16.mxu0 %v7599_v6  ;;  %2581 = vmatprep.mubr.bf16.mxu1 %v7599_v6 }
 0x3c0   :  { %4718 = vrcp.f32 %v2362_v54 }
 0x3c1   :  { %2509 = vmatpush1.bf16.msra.mxu0 %v6429_v49  ;;  %2552 = vmatpush1.bf16.msra.mxu1 %v6435_v21  ;;  %4720 = vrcp.f32 %v2360_v55 }
 0x3c2   :  { %2510 = vmatprep.subr.bf16.mxu0 %v6441_v59  ;;  %2553 = vmatprep.subr.bf16.mxu1 %v6447_v24 }
 0x3c5   :  { %v4709_v19 = vpop.eup %4708  ;;  %2511 = vmatpush1.bf16.msra.mxu0 %v6453_v17  ;;  %2554 = vmatpush1.bf16.msra.mxu1 %v6459_v51 }
 0x3c6   :  { %v4711_v45 = vpop.eup %4710  ;;  %v2380_v60 = vmul.f32 %v4709_v19, %v4707_v3  ;;  %2512 = vmatprep.subr.bf16.mxu0 %v6465_v27  ;;  %2555 = vmatprep.subr.bf16.mxu1 %v6471_v32  ;;  %v6478_v3 = vld [vmem:[%s7437_s4 + $0x60] ss:$16 sps:$4 sm:$0xff]   ;;  %v6484_v19 = vld [vmem:[%s7437_s4 + $0x68] ss:$16 sps:$4 sm:$0xff]  }
 0x3c7   :  { %v4713_v52 = vpop.eup %4712  ;;  %7658 = vst [vmem:[#allocation21_spill] sm:$0xff] %v6478_v3  ;;  %7659 = vst [vmem:[#allocation22_spill] sm:$0xff] %v6484_v19 }
 0x3c8   :  { %v4715_v47 = vpop.eup %4714  ;;  %v2378_v41 = vmul.f32 %v4713_v52, %v6133_v53  ;;  %v6492_v53 = vld [vmem:[%s7437_s4 + $0x84] ss:$16 sps:$4 sm:$0xff]   ;;  %v6498_v52 = vld [vmem:[%s7437_s4 + $0x8c] ss:$16 sps:$4 sm:$0xff]  }
 0x3c9   :  { %v4717_v54 = vpop.eup %4716  ;;  %2513 = vmatpush1.bf16.msra.mxu0 %v6478_v3  ;;  %2556 = vmatpush1.bf16.msra.mxu1 %v6484_v19  ;;  %v2363_v19 = vadd.f32 1.0, %v4711_v45  ;;  %v6526_v45 = vld [vmem:[%s7437_s4 + $0xac] ss:$16 sps:$4 sm:$0xff]  }
 0x3ca   :  { %v6487_v32 = vadd.f32 %v2380_v60, %v2378_v41  ;;  %v2381_v50 = vmul.f32 %v4717_v54, %v4715_v47  ;;  %2514 = vmatprep.subr.bf16.mxu0 %v6492_v53  ;;  %2557 = vmatprep.subr.bf16.mxu1 %v6498_v52  ;;  %v4719_v3 = vpop.eup %4718  ;;  %v6506_v47 = vld [vmem:[%s7437_s4 + $0x80] ss:$16 sps:$4 sm:$0xff]   ;;  %v6512_v41 = vld [vmem:[%s7437_s4 + $0x88] ss:$16 sps:$4 sm:$0xff]   ;;  %7664 = vst [vmem:[#allocation27_spill] sm:$0xff] %v6526_v45 }
 0x3cb   :  { %v2379_v60 = vmul.f32 %v4719_v3, %v6139_v56  ;;  %7660 = vst [vmem:[#allocation24_spill] sm:$0xff] %v6506_v47  ;;  %7661 = vst [vmem:[#allocation23_spill] sm:$0xff] %v6512_v41  ;;  %v6520_v56 = vld [vmem:[%s7437_s4 + $0xa4] ss:$16 sps:$4 sm:$0xff]   ;;  %v6533_v54 = vld [vmem:[%s7437_s4 + $0xa0] ss:$16 sps:$4 sm:$0xff]  }
 0x3cc   :  { %4722 = vtanh.f32 %v6487_v32  ;;  %7663 = vst [vmem:[#allocation26_spill] sm:$0xff] %v6520_v56  ;;  %7665 = vst [vmem:[#allocation28_spill] sm:$0xff] %v6533_v54  ;;  %v6539_v3 = vld [vmem:[%s7437_s4 + $0xa8] ss:$16 sps:$4 sm:$0xff]  }
 0x3cd   :  { %2515 = vmatpush1.bf16.msra.mxu0 %v6506_v47  ;;  %2558 = vmatpush1.bf16.msra.mxu1 %v6512_v41  ;;  %v6515_v55 = vadd.f32 %v2381_v50, %v2379_v60  ;;  %4724 = vrcp.f32 %v2363_v19  ;;  %7666 = vst [vmem:[#allocation29_spill] sm:$0xff] %v6539_v3  ;;  %v6545_v19 = vld [vmem:[%s7437_s4 + $0xc4] ss:$16 sps:$4 sm:$0xff]   ;;  %v6551_v50 = vld [vmem:[%s7437_s4 + $0xcc] ss:$16 sps:$4 sm:$0xff]   ;;  %v4721_v60 = vpop.eup %4720 }
 0x3ce   :  { %2516 = vmatprep.subr.bf16.mxu0 %v6520_v56  ;;  %2559 = vmatprep.subr.bf16.mxu1 %v6526_v45  ;;  %7667 = vst [vmem:[#allocation32_spill] sm:$0xff] %v6545_v19  ;;  %7668 = vst [vmem:[#allocation33_spill] sm:$0xff] %v6551_v50  ;;  %v6575_v45 = vld [vmem:[%s7437_s4 + $0xec] ss:$16 sps:$4 sm:$0xff]   ;;  %v6583_v47 = vld [vmem:[%s7437_s4 + $0xe0] ss:$16 sps:$4 sm:$0xff]  }
 0x3cf   :  { %7662 = vst [vmem:[#allocation25_spill] sm:$0xff] %v6515_v55  ;;  %4726 = vtanh.f32 %v6515_v55  ;;  %7672 = vst [vmem:[#allocation40_spill] sm:$0xff] %v6575_v45 }
 0x3d1   :  { %2517 = vmatpush1.bf16.msra.mxu0 %v6533_v54  ;;  %2560 = vmatpush1.bf16.msra.mxu1 %v6539_v3  ;;  %v6557_v54 = vld [vmem:[%s7437_s4 + $0xc0] ss:$16 sps:$4 sm:$0xff]   ;;  %v6563_v3 = vld [vmem:[%s7437_s4 + $0xc8] ss:$16 sps:$4 sm:$0xff]  }
 0x3d2   :  { %2518 = vmatprep.subr.bf16.mxu0 %v6545_v19  ;;  %2561 = vmatprep.subr.bf16.mxu1 %v6551_v50  ;;  %7669 = vst [vmem:[#allocation34_spill] sm:$0xff] %v6557_v54  ;;  %7670 = vst [vmem:[#allocation37_spill] sm:$0xff] %v6563_v3  ;;  %v6569_v50 = vld [vmem:[%s7437_s4 + $0xe4] ss:$16 sps:$4 sm:$0xff]  }
 0x3d3   :  { %7671 = vst [vmem:[#allocation39_spill] sm:$0xff] %v6569_v50 }
 0x3d5   :  { %2519 = vmatpush1.bf16.msra.mxu0 %v6557_v54  ;;  %2562 = vmatpush1.bf16.msra.mxu1 %v6563_v3  ;;  %v7673_v54 = vld [vmem:[#allocation30_spill] sm:$0xff] }
 0x3d6   :  { %v4723_v19 = vpop.eup %4722  ;;  %2520 = vmatprep.subr.bf16.mxu0 %v6569_v50  ;;  %2563 = vmatprep.subr.bf16.mxu1 %v6575_v45  ;;  %v2082_v56 = vmax.f32 %v7673_v54, %v6156_v61  ;;  %7674 = vst [vmem:[#allocation30_spill] sm:$0xff] %v6583_v47  ;;  %v6589_v50 = vld [vmem:[%s7437_s4 + $0xe8] ss:$16 sps:$4 sm:$0xff]   ;;  %v7675_v61 = vld [vmem:[#allocation38_spill] sm:$0xff] }
 0x3d7   :  { %v2386_v41 = vmul.f32 %v4723_v19, %v4721_v60  ;;  %v4725_v3 = vpop.eup %4724  ;;  %v2083_v54 = vmax.f32 %v7675_v61, %v6158_v62  ;;  %v7676_v62 = vld [vmem:[#allocation14_spill] sm:$0xff] }
 0x3d9   :  { %2521 = vmatpush1.bf16.msra.mxu0 %v6583_v47  ;;  %2564 = vmatpush1.bf16.msra.mxu1 %v6589_v50  ;;  %v6592_v45 = vmax.f32 %v2082_v56, %v2386_v41  ;;  %v4727_v55 = vpop.eup %4726  ;;  %v7680_v56 = vld [vmem:[#allocation18_spill] sm:$0xff] }
 0x3da   :  { %2710 = vmatprep.subr.bf16.mxu0 %v6163_v63  ;;  %2753 = vmatprep.subr.bf16.mxu1 %v6169_v0  ;;  %v2387_v19 = vmul.f32 %v4727_v55, %v4725_v3  ;;  %v7679_v55 = vld [vmem:[#allocation17_spill] sm:$0xff]  ;;  %v7681_v3 = vld [vmem:[#allocation20_spill] sm:$0xff] }
 0x3dc   :  { %v6598_v60 = vmax.f32 %v2083_v54, %v2387_v19  ;;  %v2505_v47 = vpack.c.bf16 %v2387_v19, %v2386_v41  ;;  %v7678_v41 = vld [vmem:[#allocation15_spill] sm:$0xff] }
 0x3dd   :  { %v7682_v19 = vld [vmem:[#allocation31_spill] sm:$0xff] }
 0x3de   :  { %2539 = vmatmul.mubr.bf16.vlgmr.msra.gmra.mrb[48].mxu0 %v2505_v47  ;;  %2582 = vmatmul.mubr.bf16.vlgmr.msra.gmra.mrb[48].mxu1 %v2505_v47  ;;  %v7677_v47 = vld [vmem:[#allocation16_spill] sm:$0xff] }
 0x3df   :  { %2711 = vmatpush1.bf16.msra.mxu0 %v6177_v1  ;;  %2754 = vmatpush1.bf16.msra.mxu1 %v6183_v2 }
 0x3e0   :  { %2712 = vmatprep.subr.bf16.mxu0 %v6189_v4  ;;  %2755 = vmatprep.subr.bf16.mxu1 %v6195_v5 }
 0x3e1   :  { %2742 = vmatprep.mubr.bf16.mxu0 %v7599_v6  ;;  %2785 = vmatprep.mubr.bf16.mxu1 %v7599_v6 }
 0x3e3   :  { %2713 = vmatpush1.bf16.msra.mxu0 %v6203_v9  ;;  %2756 = vmatpush1.bf16.msra.mxu1 %v6209_v11 }
 0x3e4   :  { %2714 = vmatprep.subr.bf16.mxu0 %v6215_v12  ;;  %2757 = vmatprep.subr.bf16.mxu1 %v6221_v13 }
 0x3e7   :  { %2715 = vmatpush1.bf16.msra.mxu0 %v6227_v44  ;;  %2758 = vmatpush1.bf16.msra.mxu1 %v6233_v22 }
 0x3e8   :  { %2716 = vmatprep.subr.bf16.mxu0 %v6239_v20  ;;  %2759 = vmatprep.subr.bf16.mxu1 %v6245_v39 }
 0x3eb   :  { %2717 = vmatpush1.bf16.msra.mxu0 %v6251_v31  ;;  %2760 = vmatpush1.bf16.msra.mxu1 %v6257_v7 }
 0x3ec   :  { %2718 = vmatprep.subr.bf16.mxu0 %v6263_v10  ;;  %2761 = vmatprep.subr.bf16.mxu1 %v6269_v34 }
 0x3ef   :  { %2719 = vmatpush1.bf16.msra.mxu0 %v6275_v14  ;;  %2762 = vmatpush1.bf16.msra.mxu1 %v6281_v23 }
 0x3f0   :  { %2720 = vmatprep.subr.bf16.mxu0 %v6287_v28  ;;  %2763 = vmatprep.subr.bf16.mxu1 %v6293_v35 }
 0x3f3   :  { %2721 = vmatpush1.bf16.msra.mxu0 %v6299_v18  ;;  %2764 = vmatpush1.bf16.msra.mxu1 %v6305_v36 }
 0x3f4   :  { %2722 = vmatprep.subr.bf16.mxu0 %v6311_v30  ;;  %2765 = vmatprep.subr.bf16.mxu1 %v6317_v42 }
 0x3f7   :  { %2723 = vmatpush1.bf16.msra.mxu0 %v6323_v16  ;;  %2766 = vmatpush1.bf16.msra.mxu1 %v6329_v40 }
 0x3f8   :  { %2724 = vmatprep.subr.bf16.mxu0 %v7676_v62  ;;  %2767 = vmatprep.subr.bf16.mxu1 %v7677_v47 }
 0x3fb   :  { %2725 = vmatpush1.bf16.msra.mxu0 %v7678_v41  ;;  %2768 = vmatpush1.bf16.msra.mxu1 %v7679_v55 }
 0x3fc   :  { %2814 = vmatprep.subr.bf16.mxu0 %v7680_v56  ;;  %2857 = vmatprep.subr.bf16.mxu1 %v7681_v3 }
 0x48f   :  { %v2436_v61 = vpop.f32.mrb[12].mxu0  ;;  %v2479_v54 = vpop.f32.mrb[12].mxu1 }
 0x490   :  { %v4187_v42 = vadd.f32 %v2436_v61, %v7682_v19  ;;  %v2438_v30 = vpop.f32.mrb[13].mxu0  ;;  %v2481_v16 = vpop.f32.mrb[13].mxu1  ;;  %v4219_v61 = vadd.f32 %v2479_v54, %v7638_v43 }
 0x491   :  { %v4188_v40 = vadd.f32 %v2438_v30, %v7637_v26  ;;  %v2440_v36 = vpop.f32.mrb[14].mxu0  ;;  %v2483_v62 = vpop.f32.mrb[14].mxu1  ;;  %v4220_v30 = vadd.f32 %v2481_v16, %v7639_v15 }
 0x492   :  { %v4115_v18 = vmul.f32 -1.442695, %v4187_v42  ;;  %v4189_v47 = vadd.f32 %v2440_v36, %v7682_v19  ;;  %v2442_v41 = vpop.f32.mrb[15].mxu0  ;;  %v2485_v35 = vpop.f32.mrb[15].mxu1  ;;  %v4221_v23 = vadd.f32 %v2483_v62, %v7638_v43  ;;  %v4117_v42 = vmul.f32 -1.442695, %v4219_v61 }
 0x493   :  { %v4116_v55 = vmul.f32 -1.442695, %v4188_v40  ;;  %v4190_v56 = vadd.f32 %v2442_v41, %v7637_v26  ;;  %v4222_v40 = vadd.f32 %v2485_v35, %v7639_v15 }
 0x494   :  { %4728 = vpow2.f32 %v4115_v18  ;;  %v4118_v3 = vmul.f32 -1.442695, %v4189_v47  ;;  %v4120_v14 = vmul.f32 -1.442695, %v4221_v23 }
 0x495   :  { %v4119_v28 = vmul.f32 -1.442695, %v4190_v56  ;;  %4730 = vpow2.f32 %v4116_v55 }
 0x496   :  { %4732 = vpow2.f32 %v4118_v3 }
 0x497   :  { %4734 = vpow2.f32 %v4119_v28 }
 0x498   :  { %4736 = vtanh.f32 %v4220_v30 }
 0x499   :  { %4738 = vpow2.f32 %v4117_v42 }
 0x49a   :  { %4740 = vpow2.f32 %v4120_v14 }
 0x49e   :  { %v4729_v36 = vpop.eup %4728 }
 0x49f   :  { %v2618_v19 = vadd.f32 1.0, %v4729_v36  ;;  %v4731_v18 = vpop.eup %4730 }
 0x4a0   :  { %v4733_v47 = vpop.eup %4732  ;;  %v2619_v41 = vadd.f32 1.0, %v4731_v18 }
 0x4a1   :  { %4742 = vrcp.f32 %v2618_v19  ;;  %v2621_v55 = vadd.f32 1.0, %v4733_v47  ;;  %v4735_v56 = vpop.eup %4734 }
 0x4a2   :  { %4744 = vtanh.f32 %v4222_v40  ;;  %v2622_v28 = vadd.f32 1.0, %v4735_v56  ;;  %v4737_v16 = vpop.eup %4736 }
 0x4a3   :  { %4746 = vrcp.f32 %v2619_v41  ;;  %v4739_v23 = vpop.eup %4738 }
 0x4a4   :  { %4748 = vrcp.f32 %v2621_v55  ;;  %v4741_v62 = vpop.eup %4740  ;;  %v2620_v30 = vadd.f32 1.0, %v4739_v23 }
 0x4a5   :  { %4750 = vrcp.f32 %v2622_v28  ;;  %v2623_v40 = vadd.f32 1.0, %v4741_v62  ;;  %v7685_v28 = vld [vmem:[#allocation35_spill] sm:$0xff] }
 0x4a6   :  { %4752 = vrcp.f32 %v2620_v30 }
 0x4ab   :  { %v4743_v3 = vpop.eup %4742 }
 0x4ac   :  { %v4745_v54 = vpop.eup %4744  ;;  %v2640_v35 = vmul.f32 %v4743_v3, %v4737_v16 }
 0x4ad   :  { %v4747_v61 = vpop.eup %4746 }
 0x4ae   :  { %v4749_v42 = vpop.eup %4748  ;;  %v2638_v14 = vmul.f32 %v4747_v61, %v6377_v58  ;;  %v7686_v58 = vld [vmem:[#allocation36_spill] sm:$0xff] }
 0x4af   :  { %v2641_v19 = vmul.f32 %v4749_v42, %v4745_v54  ;;  %v4751_v36 = vpop.eup %4750 }
 0x4b0   :  { %v6643_v18 = vadd.f32 %v2640_v35, %v2638_v14  ;;  %v2639_v47 = vmul.f32 %v4751_v36, %v6382_v46 }
 0x4b1   :  { %v2540_v41 = vpop.f32.mrb[48].mxu0  ;;  %v2583_v55 = vpop.f32.mrb[48].mxu1 }
 0x4b2   :  { %7683 = vst [vmem:[#allocation38_spill] sm:$0xff] %v6643_v18  ;;  %4754 = vtanh.f32 %v6643_v18  ;;  %v6647_v56 = vadd.f32 %v2641_v19, %v2639_v47  ;;  %v4255_v16 = vadd.f32 %v2540_v41, %v7685_v28  ;;  %v2542_v23 = vpop.f32.mrb[49].mxu0  ;;  %v2585_v3 = vpop.f32.mrb[49].mxu1 }
 0x4b3   :  { %4756 = vrcp.f32 %v2623_v40  ;;  %v4256_v54 = vadd.f32 %v2542_v23, %v7686_v58  ;;  %v2544_v61 = vpop.f32.mrb[50].mxu0  ;;  %v2587_v35 = vpop.f32.mrb[50].mxu1  ;;  %v4287_v40 = vadd.f32 %v2583_v55, %v5991_v38 }
 0x4b4   :  { %7684 = vst [vmem:[#allocation41_spill] sm:$0xff] %v6647_v56  ;;  %4758 = vtanh.f32 %v6647_v56  ;;  %v4121_v62 = vmul.f32 -1.442695, %v4255_v16  ;;  %v4257_v46 = vadd.f32 %v2544_v61, %v7685_v28  ;;  %v2546_v30 = vpop.f32.mrb[51].mxu0  ;;  %v2589_v42 = vpop.f32.mrb[51].mxu1  ;;  %v4289_v23 = vadd.f32 %v2587_v35, %v5991_v38 }
 0x4b5   :  { %v4122_v14 = vmul.f32 -1.442695, %v4256_v54  ;;  %v4258_v19 = vadd.f32 %v2546_v30, %v7686_v58  ;;  %v4753_v41 = vpop.eup %4752  ;;  %v4288_v16 = vadd.f32 %v2585_v3, %v5994_v37  ;;  %v4123_v54 = vmul.f32 -1.442695, %v4287_v40 }
 0x4b6   :  { %4760 = vpow2.f32 %v4121_v62  ;;  %v4124_v36 = vmul.f32 -1.442695, %v4257_v46  ;;  %v4126_v30 = vmul.f32 -1.442695, %v4289_v23  ;;  %v7702_v62 = vld [vmem:[#allocation40_spill] sm:$0xff] }
 0x4b7   :  { %v4125_v47 = vmul.f32 -1.442695, %v4258_v19  ;;  %4762 = vpow2.f32 %v4122_v14  ;;  %v4290_v14 = vadd.f32 %v2589_v42, %v5994_v37 }
 0x4b8   :  { %4764 = vpow2.f32 %v4124_v36 }
 0x4b9   :  { %4766 = vpow2.f32 %v4125_v47 }
 0x4ba   :  { %4768 = vtanh.f32 %v4288_v16 }
 0x4bb   :  { %4770 = vpow2.f32 %v4123_v54  ;;  %v7687_v54 = vld [vmem:[#allocation19_spill] sm:$0xff] }
 0x4bc   :  { %v4755_v18 = vpop.eup %4754  ;;  %4772 = vpow2.f32 %v4126_v30 }
 0x4bd   :  { %v6657_v61 = vmul.f32 %v4755_v18, %v4753_v41  ;;  %v4757_v28 = vpop.eup %4756 }
 0x4be   :  { %v4759_v56 = vpop.eup %4758 }
 0x4bf   :  { %v6661_v46 = vmul.f32 %v4759_v56, %v4757_v28 }
 0x4c0   :  { %v4761_v55 = vpop.eup %4760 }
 0x4c1   :  { %v2666_v35 = vadd.f32 1.0, %v4761_v55  ;;  %v2709_v18 = vpack.c.bf16 %v6661_v46, %v6657_v61  ;;  %v4763_v19 = vpop.eup %4762 }
 0x4c2   :  { %v4765_v36 = vpop.eup %4764  ;;  %v2667_v47 = vadd.f32 1.0, %v4763_v19 }
 0x4c3   :  { %4774 = vrcp.f32 %v2666_v35  ;;  %2743 = vmatmul.mubr.bf16.vlgmr.msra.gmra.mrb[16].mxu0 %v2709_v18  ;;  %2786 = vmatmul.mubr.bf16.vlgmr.msra.gmra.mrb[16].mxu1 %v2709_v18  ;;  %v2669_v56 = vadd.f32 1.0, %v4765_v36  ;;  %v4767_v28 = vpop.eup %4766  ;;  %v7688_v36 = vld [vmem:[#allocation21_spill] sm:$0xff] }
 0x4c4   :  { %4776 = vtanh.f32 %v4290_v14  ;;  %2815 = vmatpush1.bf16.msra.mxu0 %v6403_v29  ;;  %2858 = vmatpush1.bf16.msra.mxu1 %v6409_v25  ;;  %v2670_v42 = vadd.f32 1.0, %v4767_v28  ;;  %v4769_v40 = vpop.eup %4768 }
 0x4c5   :  { %4778 = vrcp.f32 %v2667_v47  ;;  %2816 = vmatprep.subr.bf16.mxu0 %v6415_v33  ;;  %2859 = vmatprep.subr.bf16.mxu1 %v6421_v48  ;;  %v4771_v41 = vpop.eup %4770  ;;  %v7689_v47 = vld [vmem:[#allocation22_spill] sm:$0xff] }
 0x4c6   :  { %4780 = vrcp.f32 %v2669_v56  ;;  %2846 = vmatprep.mubr.bf16.mxu0 %v7599_v6  ;;  %2889 = vmatprep.mubr.bf16.mxu1 %v7599_v6  ;;  %v4773_v23 = vpop.eup %4772  ;;  %v2668_v35 = vadd.f32 1.0, %v4771_v41  ;;  %v7691_v41 = vld [vmem:[#allocation24_spill] sm:$0xff] }
 0x4c7   :  { %4782 = vrcp.f32 %v2670_v42  ;;  %v2671_v3 = vadd.f32 1.0, %v4773_v23  ;;  %v7696_v23 = vld [vmem:[#allocation29_spill] sm:$0xff] }
 0x4c8   :  { %2817 = vmatpush1.bf16.msra.mxu0 %v6429_v49  ;;  %2860 = vmatpush1.bf16.msra.mxu1 %v6435_v21  ;;  %4784 = vrcp.f32 %v2668_v35  ;;  %v7697_v35 = vld [vmem:[#allocation32_spill] sm:$0xff] }
 0x4c9   :  { %2818 = vmatprep.subr.bf16.mxu0 %v6441_v59  ;;  %2861 = vmatprep.subr.bf16.mxu1 %v6447_v24 }
 0x4cc   :  { %2819 = vmatpush1.bf16.msra.mxu0 %v6453_v17  ;;  %2862 = vmatpush1.bf16.msra.mxu1 %v6459_v51 }
 0x4cd   :  { %v4775_v16 = vpop.eup %4774  ;;  %2820 = vmatprep.subr.bf16.mxu0 %v6465_v27  ;;  %2863 = vmatprep.subr.bf16.mxu1 %v7687_v54 }
 0x4ce   :  { %v4777_v30 = vpop.eup %4776  ;;  %v2688_v55 = vmul.f32 %v4775_v16, %v4769_v40  ;;  %v7690_v40 = vld [vmem:[#allocation25_spill] sm:$0xff] }
 0x4cf   :  { %v4779_v14 = vpop.eup %4778 }
 0x4d0   :  { %v4781_v18 = vpop.eup %4780  ;;  %v2686_v19 = vmul.f32 %v4779_v14, %v6487_v32  ;;  %2821 = vmatpush1.bf16.msra.mxu0 %v7688_v36  ;;  %2864 = vmatpush1.bf16.msra.mxu1 %v7689_v47  ;;  %v7692_v32 = vld [vmem:[#allocation23_spill] sm:$0xff] }
 0x4d1   :  { %v2689_v56 = vmul.f32 %v4781_v18, %v4777_v30  ;;  %2822 = vmatprep.subr.bf16.mxu0 %v6492_v53  ;;  %2865 = vmatprep.subr.bf16.mxu1 %v6498_v52  ;;  %v4783_v28 = vpop.eup %4782  ;;  %v7693_v30 = vld [vmem:[#allocation26_spill] sm:$0xff]  ;;  %v7694_v18 = vld [vmem:[#allocation27_spill] sm:$0xff] }
 0x4d2   :  { %v6687_v42 = vadd.f32 %v2688_v55, %v2686_v19  ;;  %v2687_v16 = vmul.f32 %v4783_v28, %v7690_v40  ;;  %v7695_v55 = vld [vmem:[#allocation28_spill] sm:$0xff]  ;;  %v7698_v19 = vld [vmem:[#allocation33_spill] sm:$0xff]  ;;  %v7699_v28 = vld [vmem:[#allocation34_spill] sm:$0xff] }
 0x4d3   :  { %v7700_v40 = vld [vmem:[#allocation37_spill] sm:$0xff] }
 0x4d4   :  { %4786 = vtanh.f32 %v6687_v42  ;;  %2823 = vmatpush1.bf16.msra.mxu0 %v7691_v41  ;;  %2866 = vmatpush1.bf16.msra.mxu1 %v7692_v32  ;;  %v6693_v14 = vadd.f32 %v2689_v56, %v2687_v16  ;;  %v4785_v56 = vpop.eup %4784  ;;  %v7701_v16 = vld [vmem:[#allocation39_spill] sm:$0xff] }
 0x4d5   :  { %2824 = vmatprep.subr.bf16.mxu0 %v7693_v30  ;;  %2867 = vmatprep.subr.bf16.mxu1 %v7694_v18  ;;  %4788 = vrcp.f32 %v2671_v3 }
 0x4d6   :  { %4790 = vtanh.f32 %v6693_v14 }
 0x4d8   :  { %2825 = vmatpush1.bf16.msra.mxu0 %v7695_v55  ;;  %2868 = vmatpush1.bf16.msra.mxu1 %v7696_v23  ;;  %v7703_v55 = vld [vmem:[#allocation30_spill] sm:$0xff] }
 0x4d9   :  { %2826 = vmatprep.subr.bf16.mxu0 %v7697_v35  ;;  %2869 = vmatprep.subr.bf16.mxu1 %v7698_v19 }
 0x4dc   :  { %2827 = vmatpush1.bf16.msra.mxu0 %v7699_v28  ;;  %2870 = vmatpush1.bf16.msra.mxu1 %v7700_v40 }
 0x4dd   :  { %2828 = vmatprep.subr.bf16.mxu0 %v7701_v16  ;;  %2871 = vmatprep.subr.bf16.mxu1 %v7702_v62 }
 0x4de   :  { %v4787_v3 = vpop.eup %4786 }
 0x4df   :  { %v6706_v18 = vmul.f32 %v4787_v3, %v4785_v56  ;;  %v4789_v30 = vpop.eup %4788 }
 0x4e0   :  { %2829 = vmatpush1.bf16.msra.mxu0 %v7703_v55  ;;  %2872 = vmatpush1.bf16.msra.mxu1 %v6589_v50  ;;  %v4791_v35 = vpop.eup %4790 }
 0x4e1   :  { %3018 = vmatprep.subr.bf16.mxu0 %v6163_v63  ;;  %3061 = vmatprep.subr.bf16.mxu1 %v6169_v0  ;;  %v6714_v40 = vmul.f32 %v4791_v35, %v4789_v30  ;;  %v7704_v63 = vld [vmem:[#allocation4_spill] sm:$0xff]  ;;  %v7705_v0 = vld [vmem:[#allocation5_spill] sm:$0xff]  ;;  %v7720_v30 = vld [vmem:[#allocation31_spill] sm:$0xff] }
 0x4e3   :  { %v2813_v56 = vpack.c.bf16 %v6714_v40, %v6706_v18 }
 0x4e5   :  { %2847 = vmatmul.mubr.bf16.vlgmr.msra.gmra.mrb[44].mxu0 %v2813_v56  ;;  %2890 = vmatmul.mubr.bf16.vlgmr.msra.gmra.mrb[44].mxu1 %v2813_v56 }
 0x4e6   :  { %3019 = vmatpush1.bf16.msra.mxu0 %v6177_v1  ;;  %3062 = vmatpush1.bf16.msra.mxu1 %v6183_v2  ;;  %v7706_v1 = vld [vmem:[#allocation6_spill] sm:$0xff]  ;;  %v7707_v2 = vld [vmem:[#allocation8_spill] sm:$0xff] }
 0x4e7   :  { %3020 = vmatprep.subr.bf16.mxu0 %v6189_v4  ;;  %3063 = vmatprep.subr.bf16.mxu1 %v6195_v5  ;;  %v7708_v4 = vld [vmem:[#allocation7_spill] sm:$0xff]  ;;  %v7709_v5 = vld [vmem:[#allocation9_spill] sm:$0xff] }
 0x4e8   :  { %3050 = vmatprep.mubr.bf16.mxu0 %v7599_v6  ;;  %3093 = vmatprep.mubr.bf16.mxu1 %v7599_v6 }
 0x4ea   :  { %3021 = vmatpush1.bf16.msra.mxu0 %v6203_v9  ;;  %3064 = vmatpush1.bf16.msra.mxu1 %v6209_v11  ;;  %v7710_v9 = vld [vmem:[#allocation10_spill] sm:$0xff]  ;;  %v7711_v11 = vld [vmem:[#allocation12_spill] sm:$0xff] }
 0x4eb   :  { %3022 = vmatprep.subr.bf16.mxu0 %v6215_v12  ;;  %3065 = vmatprep.subr.bf16.mxu1 %v6221_v13  ;;  %v7712_v12 = vld [vmem:[#allocation11_spill] sm:$0xff]  ;;  %v7713_v13 = vld [vmem:[#allocation13_spill] sm:$0xff] }
 0x4ee   :  { %3023 = vmatpush1.bf16.msra.mxu0 %v6227_v44  ;;  %3066 = vmatpush1.bf16.msra.mxu1 %v6233_v22  ;;  %v7714_v44 = vld [vmem:[#allocation14_spill] sm:$0xff]  ;;  %v7715_v22 = vld [vmem:[#allocation16_spill] sm:$0xff] }
 0x4ef   :  { %3024 = vmatprep.subr.bf16.mxu0 %v6239_v20  ;;  %3067 = vmatprep.subr.bf16.mxu1 %v6245_v39  ;;  %v7716_v20 = vld [vmem:[#allocation15_spill] sm:$0xff]  ;;  %v7717_v39 = vld [vmem:[#allocation17_spill] sm:$0xff] }
 0x4f2   :  { %3025 = vmatpush1.bf16.msra.mxu0 %v6251_v31  ;;  %3068 = vmatpush1.bf16.msra.mxu1 %v6257_v7  ;;  %v7718_v31 = vld [vmem:[#allocation18_spill] sm:$0xff]  ;;  %v7719_v7 = vld [vmem:[#allocation20_spill] sm:$0xff] }
 0x4f3   :  { %3026 = vmatprep.subr.bf16.mxu0 %v6263_v10  ;;  %3069 = vmatprep.subr.bf16.mxu1 %v6269_v34 }
 0x4f6   :  { %3027 = vmatpush1.bf16.msra.mxu0 %v7704_v63  ;;  %3070 = vmatpush1.bf16.msra.mxu1 %v7705_v0 }
 0x4f7   :  { %3028 = vmatprep.subr.bf16.mxu0 %v7706_v1  ;;  %3071 = vmatprep.subr.bf16.mxu1 %v7707_v2 }
 0x4fa   :  { %3029 = vmatpush1.bf16.msra.mxu0 %v7708_v4  ;;  %3072 = vmatpush1.bf16.msra.mxu1 %v7709_v5 }
 0x4fb   :  { %3030 = vmatprep.subr.bf16.mxu0 %v7710_v9  ;;  %3073 = vmatprep.subr.bf16.mxu1 %v7711_v11 }
 0x4fe   :  { %3031 = vmatpush1.bf16.msra.mxu0 %v7712_v12  ;;  %3074 = vmatpush1.bf16.msra.mxu1 %v7713_v13 }
 0x4ff   :  { %3032 = vmatprep.subr.bf16.mxu0 %v7714_v44  ;;  %3075 = vmatprep.subr.bf16.mxu1 %v7715_v22 }
 0x502   :  { %3033 = vmatpush1.bf16.msra.mxu0 %v7716_v20  ;;  %3076 = vmatpush1.bf16.msra.mxu1 %v7717_v39 }
 0x503   :  { %3122 = vmatprep.subr.bf16.mxu0 %v7718_v31  ;;  %3165 = vmatprep.subr.bf16.mxu1 %v7719_v7 }
 0x596   :  { %v2744_v10 = vpop.f32.mrb[16].mxu0  ;;  %v2787_v34 = vpop.f32.mrb[16].mxu1 }
 0x597   :  { %v4191_v35 = vadd.f32 %v2744_v10, %v7720_v30  ;;  %v2746_v3 = vpop.f32.mrb[17].mxu0  ;;  %v2789_v56 = vpop.f32.mrb[17].mxu1  ;;  %v4223_v22 = vadd.f32 %v2787_v34, %v7638_v43 }
 0x598   :  { %v4192_v63 = vadd.f32 %v2746_v3, %v7637_v26  ;;  %v2748_v0 = vpop.f32.mrb[18].mxu0  ;;  %v2791_v1 = vpop.f32.mrb[18].mxu1  ;;  %v4224_v39 = vadd.f32 %v2789_v56, %v7639_v15 }
 0x599   :  { %v4127_v2 = vmul.f32 -1.442695, %v4191_v35  ;;  %v4193_v4 = vadd.f32 %v2748_v0, %v7720_v30  ;;  %v2750_v5 = vpop.f32.mrb[19].mxu0  ;;  %v2793_v9 = vpop.f32.mrb[19].mxu1  ;;  %v4225_v20 = vadd.f32 %v2791_v1, %v7638_v43  ;;  %v4129_v31 = vmul.f32 -1.442695, %v4223_v22 }
 0x59a   :  { %v4128_v11 = vmul.f32 -1.442695, %v4192_v63  ;;  %v4194_v12 = vadd.f32 %v2750_v5, %v7637_v26  ;;  %v4226_v35 = vadd.f32 %v2793_v9, %v7639_v15 }
 0x59b   :  { %4792 = vpow2.f32 %v4127_v2  ;;  %v4130_v13 = vmul.f32 -1.442695, %v4193_v4  ;;  %v4132_v7 = vmul.f32 -1.442695, %v4225_v20 }
 0x59c   :  { %v4131_v44 = vmul.f32 -1.442695, %v4194_v12  ;;  %4794 = vpow2.f32 %v4128_v11 }
 0x59d   :  { %4796 = vpow2.f32 %v4130_v13 }
 0x59e   :  { %4798 = vpow2.f32 %v4131_v44 }
 0x59f   :  { %4800 = vtanh.f32 %v4224_v39  ;;  %v7721_v39 = vld [vmem:[#allocation38_spill] sm:$0xff] }
 0x5a0   :  { %4802 = vpow2.f32 %v4129_v31 }
 0x5a1   :  { %4804 = vpow2.f32 %v4132_v7 }
 0x5a5   :  { %v4793_v10 = vpop.eup %4792 }
 0x5a6   :  { %v2926_v3 = vadd.f32 1.0, %v4793_v10  ;;  %v4795_v63 = vpop.eup %4794 }
 0x5a7   :  { %v4797_v0 = vpop.eup %4796  ;;  %v2927_v2 = vadd.f32 1.0, %v4795_v63  ;;  %v7722_v63 = vld [vmem:[#allocation41_spill] sm:$0xff] }
 0x5a8   :  { %4806 = vrcp.f32 %v2926_v3  ;;  %v2929_v34 = vadd.f32 1.0, %v4797_v0  ;;  %v4799_v4 = vpop.eup %4798 }
 0x5a9   :  { %4808 = vtanh.f32 %v4226_v35  ;;  %v2930_v1 = vadd.f32 1.0, %v4799_v4  ;;  %v4801_v56 = vpop.eup %4800 }
 0x5aa   :  { %4810 = vrcp.f32 %v2927_v2  ;;  %v4803_v5 = vpop.eup %4802 }
 0x5ab   :  { %4812 = vrcp.f32 %v2929_v34  ;;  %v4805_v11 = vpop.eup %4804  ;;  %v2928_v22 = vadd.f32 1.0, %v4803_v5 }
 0x5ac   :  { %4814 = vrcp.f32 %v2930_v1  ;;  %v2931_v35 = vadd.f32 1.0, %v4805_v11  ;;  %v7723_v1 = vld [vmem:[#allocation35_spill] sm:$0xff] }
 0x5ad   :  { %4816 = vrcp.f32 %v2928_v22 }
 0x5b2   :  { %v4807_v12 = vpop.eup %4806 }
 0x5b3   :  { %v4809_v13 = vpop.eup %4808  ;;  %v2948_v9 = vmul.f32 %v4807_v12, %v4801_v56 }
 0x5b4   :  { %v4811_v44 = vpop.eup %4810 }
 0x5b5   :  { %v4813_v20 = vpop.eup %4812  ;;  %v2946_v31 = vmul.f32 %v4811_v44, %v7721_v39 }
 0x5b6   :  { %v2949_v7 = vmul.f32 %v4813_v20, %v4809_v13  ;;  %v4815_v10 = vpop.eup %4814 }
 0x5b7   :  { %v6763_v3 = vadd.f32 %v2948_v9, %v2946_v31  ;;  %v2947_v0 = vmul.f32 %v4815_v10, %v7722_v63 }
 0x5b8   :  { %v2848_v2 = vpop.f32.mrb[44].mxu0  ;;  %v2891_v34 = vpop.f32.mrb[44].mxu1 }
 0x5b9   :  { %4818 = vtanh.f32 %v6763_v3  ;;  %v6767_v4 = vadd.f32 %v2949_v7, %v2947_v0  ;;  %v4251_v56 = vadd.f32 %v2848_v2, %v7723_v1  ;;  %v2850_v5 = vpop.f32.mrb[45].mxu0  ;;  %v2893_v12 = vpop.f32.mrb[45].mxu1 }
 0x5ba   :  { %4820 = vrcp.f32 %v2931_v35  ;;  %v4252_v13 = vadd.f32 %v2850_v5, %v7686_v58  ;;  %v2852_v44 = vpop.f32.mrb[46].mxu0  ;;  %v2895_v9 = vpop.f32.mrb[46].mxu1  ;;  %v4283_v35 = vadd.f32 %v2891_v34, %v5991_v38 }
 0x5bb   :  { %4822 = vtanh.f32 %v6767_v4  ;;  %v4133_v11 = vmul.f32 -1.442695, %v4251_v56  ;;  %v4253_v22 = vadd.f32 %v2852_v44, %v7723_v1  ;;  %v2854_v20 = vpop.f32.mrb[47].mxu0  ;;  %v2897_v39 = vpop.f32.mrb[47].mxu1  ;;  %v4285_v2 = vadd.f32 %v2895_v9, %v5991_v38 }
 0x5bc   :  { %v4134_v31 = vmul.f32 -1.442695, %v4252_v13  ;;  %v4254_v7 = vadd.f32 %v2854_v20, %v7686_v58  ;;  %v4817_v0 = vpop.eup %4816  ;;  %v4284_v56 = vadd.f32 %v2893_v12, %v5994_v37  ;;  %v4135_v19 = vmul.f32 -1.442695, %v4283_v35 }
 0x5bd   :  { %4824 = vpow2.f32 %v4133_v11  ;;  %v4136_v10 = vmul.f32 -1.442695, %v4253_v22  ;;  %v4138_v1 = vmul.f32 -1.442695, %v4285_v2  ;;  %v7724_v11 = vmax.f32 %v6393_v57, %v6657_v61 }
 0x5be   :  { %v4137_v63 = vmul.f32 -1.442695, %v4254_v7  ;;  %4826 = vpow2.f32 %v4134_v31  ;;  %v4286_v31 = vadd.f32 %v2897_v39, %v5994_v37  ;;  %v7725_v12 = vmax.f32 %v6398_v8, %v6661_v46  ;;  %v7732_v39 = vld [vmem:[#allocation40_spill] sm:$0xff] }
 0x5bf   :  { %4828 = vpow2.f32 %v4136_v10 }
 0x5c0   :  { %4830 = vpow2.f32 %v4137_v63 }
 0x5c1   :  { %4832 = vtanh.f32 %v4284_v56  ;;  %v7733_v56 = vmax.f32 %v6592_v45, %v6706_v18  ;;  %v7734_v45 = vmax.f32 %v6598_v60, %v6714_v40  ;;  %v6865_v60 = vld [vmem:[%s7436_s3 + $0x24] ss:$16 sps:$4 sm:$0xff]   ;;  %v6871_v40 = vld [vmem:[%s7436_s3 + $0x2c] ss:$16 sps:$4 sm:$0xff]  }
 0x5c2   :  { %4834 = vpow2.f32 %v4135_v19 }
 0x5c3   :  { %v4819_v5 = vpop.eup %4818  ;;  %4836 = vpow2.f32 %v4138_v1 }
 0x5c4   :  { %v2954_v44 = vmul.f32 %v4819_v5, %v4817_v0  ;;  %v4821_v62 = vpop.eup %4820 }
 0x5c5   :  { %v4823_v13 = vpop.eup %4822 }
 0x5c6   :  { %v6780_v22 = vmax.f32 %v7724_v11, %v2954_v44  ;;  %v2955_v20 = vmul.f32 %v4823_v13, %v4821_v62  ;;  %v6853_v13 = vld [vmem:[%s7436_s3] ss:$16 sps:$4 sm:$0xff]   ;;  %v6859_v11 = vld [vmem:[%s7436_s3 + $0x8] ss:$16 sps:$4 sm:$0xff]  }
 0x5c7   :  { %v4825_v34 = vpop.eup %4824 }
 0x5c8   :  { %v2974_v9 = vadd.f32 1.0, %v4825_v34  ;;  %v6786_v7 = vmax.f32 %v7725_v12, %v2955_v20  ;;  %v3017_v10 = vpack.c.bf16 %v2955_v20, %v2954_v44  ;;  %v4827_v63 = vpop.eup %4826  ;;  %v6879_v20 = vld [vmem:[%s7436_s3 + $0x20] ss:$16 sps:$4 sm:$0xff]   ;;  %v6885_v34 = vld [vmem:[%s7436_s3 + $0x28] ss:$16 sps:$4 sm:$0xff]  }
 0x5c9   :  { %v4829_v35 = vpop.eup %4828  ;;  %v2975_v57 = vadd.f32 1.0, %v4827_v63  ;;  %v6903_v12 = vld [vmem:[%s7436_s3 + $0x40] ss:$16 sps:$4 sm:$0xff]   ;;  %v6915_v63 = vld [vmem:[%s7436_s3 + $0x64] ss:$16 sps:$4 sm:$0xff]  }
 0x5ca   :  { %4838 = vrcp.f32 %v2974_v9  ;;  %3051 = vmatmul.mubr.bf16.vlgmr.msra.gmra.mrb[20].mxu0 %v3017_v10  ;;  %3094 = vmatmul.mubr.bf16.vlgmr.msra.gmra.mrb[20].mxu1 %v3017_v10  ;;  %v2977_v61 = vadd.f32 1.0, %v4829_v35  ;;  %v4831_v62 = vpop.eup %4830  ;;  %v6897_v9 = vld [vmem:[%s7436_s3 + $0x4c] ss:$16 sps:$4 sm:$0xff]   ;;  %v6909_v10 = vld [vmem:[%s7436_s3 + $0x48] ss:$16 sps:$4 sm:$0xff]  }
 0x5cb   :  { %4840 = vtanh.f32 %v4286_v31  ;;  %3123 = vmatpush1.bf16.msra.mxu0 %v6403_v29  ;;  %3166 = vmatpush1.bf16.msra.mxu1 %v6409_v25  ;;  %v2978_v8 = vadd.f32 1.0, %v4831_v62  ;;  %v4833_v29 = vpop.eup %4832  ;;  %v6891_v31 = vld [vmem:[%s7436_s3 + $0x44] ss:$16 sps:$4 sm:$0xff]   ;;  %v6921_v35 = vld [vmem:[%s7436_s3 + $0x6c] ss:$16 sps:$4 sm:$0xff]  }
 0x5cc   :  { %4842 = vrcp.f32 %v2975_v57  ;;  %3124 = vmatprep.subr.bf16.mxu0 %v6415_v33  ;;  %3167 = vmatprep.subr.bf16.mxu1 %v6421_v48  ;;  %v4835_v25 = vpop.eup %4834  ;;  %v6927_v57 = vld [vmem:[%s7436_s3 + $0x60] ss:$16 sps:$4 sm:$0xff]   ;;  %v6939_v62 = vld [vmem:[%s7436_s3 + $0x84] ss:$16 sps:$4 sm:$0xff]  }
 0x5cd   :  { %4844 = vrcp.f32 %v2977_v61  ;;  %3154 = vmatprep.mubr.bf16.mxu0 %v7599_v6  ;;  %3197 = vmatprep.mubr.bf16.mxu1 %v7599_v6  ;;  %v4837_v33 = vpop.eup %4836  ;;  %v6933_v61 = vld [vmem:[%s7436_s3 + $0x68] ss:$16 sps:$4 sm:$0xff]  }
 0x5ce   :  { %4846 = vrcp.f32 %v2978_v8  ;;  %v6945_v8 = vld [vmem:[%s7436_s3 + $0x8c] ss:$16 sps:$4 sm:$0xff]  }
 0x5cf   :  { %3125 = vmatpush1.bf16.msra.mxu0 %v6429_v49  ;;  %3168 = vmatpush1.bf16.msra.mxu1 %v6435_v21  ;;  %v2976_v21 = vadd.f32 1.0, %v4835_v25  ;;  %v6957_v25 = vld [vmem:[%s7436_s3 + $0x88] ss:$16 sps:$4 sm:$0xff]  }
 0x5d0   :  { %3126 = vmatprep.subr.bf16.mxu0 %v6441_v59  ;;  %3169 = vmatprep.subr.bf16.mxu1 %v6447_v24 }
 0x5d1   :  { %4848 = vrcp.f32 %v2976_v21  ;;  %v6993_v21 = vld [vmem:[%s7436_s3 + $0xcc] ss:$16 sps:$4 sm:$0xff]  }
 0x5d3   :  { %3127 = vmatpush1.bf16.msra.mxu0 %v6453_v17  ;;  %3170 = vmatpush1.bf16.msra.mxu1 %v6459_v51 }
 0x5d4   :  { %v4839_v48 = vpop.eup %4838  ;;  %3128 = vmatprep.subr.bf16.mxu0 %v6465_v27  ;;  %3171 = vmatprep.subr.bf16.mxu1 %v7687_v54  ;;  %v2979_v27 = vadd.f32 1.0, %v4837_v33  ;;  %v6963_v33 = vld [vmem:[%s7436_s3 + $0xa4] ss:$16 sps:$4 sm:$0xff]  }
 0x5d5   :  { %v4841_v46 = vpop.eup %4840  ;;  %v2996_v49 = vmul.f32 %v4839_v48, %v4833_v29  ;;  %v6951_v29 = vld [vmem:[%s7436_s3 + $0x80] ss:$16 sps:$4 sm:$0xff]   ;;  %v6969_v48 = vld [vmem:[%s7436_s3 + $0xac] ss:$16 sps:$4 sm:$0xff]  }
 0x5d6   :  { %v4843_v19 = vpop.eup %4842 }
 0x5d7   :  { %v4845_v1 = vpop.eup %4844  ;;  %v2994_v59 = vmul.f32 %v4843_v19, %v6687_v42  ;;  %3129 = vmatpush1.bf16.msra.mxu0 %v7688_v36  ;;  %3172 = vmatpush1.bf16.msra.mxu1 %v7689_v47  ;;  %v7726_v47 = vld [vmem:[#allocation26_spill] sm:$0xff]  ;;  %v7729_v42 = vld [vmem:[#allocation32_spill] sm:$0xff] }
 0x5d8   :  { %v2997_v24 = vmul.f32 %v4845_v1, %v4841_v46  ;;  %3130 = vmatprep.subr.bf16.mxu0 %v6492_v53  ;;  %3173 = vmatprep.subr.bf16.mxu1 %v6498_v52  ;;  %v4847_v17 = vpop.eup %4846  ;;  %v7727_v53 = vld [vmem:[#allocation27_spill] sm:$0xff]  ;;  %v7728_v52 = vld [vmem:[#allocation28_spill] sm:$0xff] }
 0x5d9   :  { %v6807_v51 = vadd.f32 %v2996_v49, %v2994_v59  ;;  %v2995_v54 = vmul.f32 %v4847_v17, %v6693_v14  ;;  %v7730_v14 = vld [vmem:[#allocation33_spill] sm:$0xff]  ;;  %v6975_v46 = vld [vmem:[%s7436_s3 + $0xa0] ss:$16 sps:$4 sm:$0xff]   ;;  %v6987_v19 = vld [vmem:[%s7436_s3 + $0xc4] ss:$16 sps:$4 sm:$0xff]  }
 0x5da   :  { %v6981_v49 = vld [vmem:[%s7436_s3 + $0xa8] ss:$16 sps:$4 sm:$0xff]   ;;  %v6999_v1 = vld [vmem:[%s7436_s3 + $0xc0] ss:$16 sps:$4 sm:$0xff]   ;;  %v7017_v17 = vld [vmem:[%s7436_s3 + $0xec] ss:$16 sps:$4 sm:$0xff]  }
 0x5db   :  { %4850 = vtanh.f32 %v6807_v51  ;;  %3131 = vmatpush1.bf16.msra.mxu0 %v7691_v41  ;;  %3174 = vmatpush1.bf16.msra.mxu1 %v7692_v32  ;;  %v6813_v36 = vadd.f32 %v2997_v24, %v2995_v54  ;;  %v7731_v41 = vld [vmem:[#allocation37_spill] sm:$0xff]  ;;  %v4849_v32 = vpop.eup %4848  ;;  %v7011_v24 = vld [vmem:[%s7436_s3 + $0xe4] ss:$16 sps:$4 sm:$0xff]  }
 0x5dc   :  { %3132 = vmatprep.subr.bf16.mxu0 %v7726_v47  ;;  %3175 = vmatprep.subr.bf16.mxu1 %v7727_v53  ;;  %4852 = vrcp.f32 %v2979_v27  ;;  %v7005_v59 = vld [vmem:[%s7436_s3 + $0xc8] ss:$16 sps:$4 sm:$0xff]   ;;  %v7023_v27 = vld [vmem:[%s7436_s3 + $0xe0] ss:$16 sps:$4 sm:$0xff]   ;;  %v7035_v47 = vld [vmem:[%s7437_s4 + $0x4] ss:$16 sps:$4 sm:$0xff]  }
 0x5dd   :  { %4854 = vtanh.f32 %v6813_v36  ;;  %7735 = vst [vmem:[#allocation36_spill] sm:$0xff] %v7023_v27  ;;  %v7029_v54 = vld [vmem:[%s7436_s3 + $0xe8] ss:$16 sps:$4 sm:$0xff]   ;;  %7737 = vst [vmem:[#allocation21_spill] sm:$0xff] %v7035_v47  ;;  %v7041_v53 = vld [vmem:[%s7437_s4 + $0xc] ss:$16 sps:$4 sm:$0xff]  }
 0x5de   :  { %7736 = vst [vmem:[#allocation19_spill] sm:$0xff] %v7029_v54  ;;  %7738 = vst [vmem:[#allocation22_spill] sm:$0xff] %v7041_v53 }
 0x5df   :  { %3133 = vmatpush1.bf16.msra.mxu0 %v7728_v52  ;;  %3176 = vmatpush1.bf16.msra.mxu1 %v7696_v23 }
 0x5e0   :  { %3134 = vmatprep.subr.bf16.mxu0 %v7729_v42  ;;  %3177 = vmatprep.subr.bf16.mxu1 %v7730_v14 }
 0x5e3   :  { %3135 = vmatpush1.bf16.msra.mxu0 %v7699_v28  ;;  %3178 = vmatpush1.bf16.msra.mxu1 %v7731_v41  ;;  %v6836_v28 = vld [vmem:[%s7436_s3 + $0x4] ss:$16 sps:$4 sm:$0xff]  }
 0x5e4   :  { %3136 = vmatprep.subr.bf16.mxu0 %v7701_v16  ;;  %3179 = vmatprep.subr.bf16.mxu1 %v7732_v39  ;;  %v6842_v16 = vld [vmem:[%s7436_s3 + $0xc] ss:$16 sps:$4 sm:$0xff]  }
 0x5e5   :  { %v4851_v0 = vpop.eup %4850 }
 0x5e6   :  { %v3002_v2 = vmul.f32 %v4851_v0, %v4849_v32  ;;  %v4853_v5 = vpop.eup %4852 }
 0x5e7   :  { %3137 = vmatpush1.bf16.msra.mxu0 %v7703_v55  ;;  %3180 = vmatpush1.bf16.msra.mxu1 %v6589_v50  ;;  %v4855_v23 = vpop.eup %4854 }
 0x5e8   :  { %v6831_v44 = vmax.f32 %v7733_v56, %v3002_v2  ;;  %3326 = vmatprep.subr.bf16.mxu0 %v6836_v28  ;;  %3369 = vmatprep.subr.bf16.mxu1 %v6842_v16  ;;  %v3003_v50 = vmul.f32 %v4855_v23, %v4853_v5 }
 0x5ea   :  { %v6848_v18 = vmax.f32 %v7734_v45, %v3003_v50  ;;  %v3121_v55 = vpack.c.bf16 %v3003_v50, %v3002_v2 }
 0x5ec   :  { %3155 = vmatmul.mubr.bf16.vlgmr.msra.gmra.mrb[40].mxu0 %v3121_v55  ;;  %3198 = vmatmul.mubr.bf16.vlgmr.msra.gmra.mrb[40].mxu1 %v3121_v55 }
 0x5ed   :  { %3327 = vmatpush1.bf16.msra.mxu0 %v6853_v13  ;;  %3370 = vmatpush1.bf16.msra.mxu1 %v6859_v11 }
 0x5ee   :  { %3328 = vmatprep.subr.bf16.mxu0 %v6865_v60  ;;  %3371 = vmatprep.subr.bf16.mxu1 %v6871_v40 }
 0x5ef   :  { %3358 = vmatprep.mubr.bf16.mxu0 %v7599_v6  ;;  %3401 = vmatprep.mubr.bf16.mxu1 %v7599_v6 }
 0x5f1   :  { %3329 = vmatpush1.bf16.msra.mxu0 %v6879_v20  ;;  %3372 = vmatpush1.bf16.msra.mxu1 %v6885_v34 }
 0x5f2   :  { %3330 = vmatprep.subr.bf16.mxu0 %v6891_v31  ;;  %3373 = vmatprep.subr.bf16.mxu1 %v6897_v9 }
 0x5f5   :  { %3331 = vmatpush1.bf16.msra.mxu0 %v6903_v12  ;;  %3374 = vmatpush1.bf16.msra.mxu1 %v6909_v10 }
 0x5f6   :  { %3332 = vmatprep.subr.bf16.mxu0 %v6915_v63  ;;  %3375 = vmatprep.subr.bf16.mxu1 %v6921_v35 }
 0x5f9   :  { %3333 = vmatpush1.bf16.msra.mxu0 %v6927_v57  ;;  %3376 = vmatpush1.bf16.msra.mxu1 %v6933_v61 }
 0x5fa   :  { %3334 = vmatprep.subr.bf16.mxu0 %v6939_v62  ;;  %3377 = vmatprep.subr.bf16.mxu1 %v6945_v8 }
 0x5fd   :  { %3335 = vmatpush1.bf16.msra.mxu0 %v6951_v29  ;;  %3378 = vmatpush1.bf16.msra.mxu1 %v6957_v25 }
 0x5fe   :  { %3336 = vmatprep.subr.bf16.mxu0 %v6963_v33  ;;  %3379 = vmatprep.subr.bf16.mxu1 %v6969_v48 }
 0x601   :  { %3337 = vmatpush1.bf16.msra.mxu0 %v6975_v46  ;;  %3380 = vmatpush1.bf16.msra.mxu1 %v6981_v49 }
 0x602   :  { %3338 = vmatprep.subr.bf16.mxu0 %v6987_v19  ;;  %3381 = vmatprep.subr.bf16.mxu1 %v6993_v21 }
 0x605   :  { %3339 = vmatpush1.bf16.msra.mxu0 %v6999_v1  ;;  %3382 = vmatpush1.bf16.msra.mxu1 %v7005_v59 }
 0x606   :  { %3340 = vmatprep.subr.bf16.mxu0 %v7011_v24  ;;  %3383 = vmatprep.subr.bf16.mxu1 %v7017_v17 }
 0x609   :  { %3341 = vmatpush1.bf16.msra.mxu0 %v7023_v27  ;;  %3384 = vmatpush1.bf16.msra.mxu1 %v7029_v54 }
 0x60a   :  { %3430 = vmatprep.subr.bf16.mxu0 %v7035_v47  ;;  %3473 = vmatprep.subr.bf16.mxu1 %v7041_v53 }
 0x69d   :  { %v3052_v52 = vpop.f32.mrb[20].mxu0  ;;  %v3095_v42 = vpop.f32.mrb[20].mxu1 }
 0x69e   :  { %v4195_v14 = vadd.f32 %v3052_v52, %v7720_v30  ;;  %v3054_v41 = vpop.f32.mrb[21].mxu0  ;;  %v3097_v32 = vpop.f32.mrb[21].mxu1  ;;  %v4227_v52 = vadd.f32 %v3095_v42, %v7638_v43 }
 0x69f   :  { %v4196_v39 = vadd.f32 %v3054_v41, %v7637_v26  ;;  %v3056_v0 = vpop.f32.mrb[22].mxu0  ;;  %v3099_v2 = vpop.f32.mrb[22].mxu1  ;;  %v4228_v41 = vadd.f32 %v3097_v32, %v7639_v15 }
 0x6a0   :  { %v4139_v5 = vmul.f32 -1.442695, %v4195_v14  ;;  %v4197_v23 = vadd.f32 %v3056_v0, %v7720_v30  ;;  %v3058_v56 = vpop.f32.mrb[23].mxu0  ;;  %v3101_v50 = vpop.f32.mrb[23].mxu1  ;;  %v4229_v54 = vadd.f32 %v3099_v2, %v7638_v43  ;;  %v4141_v14 = vmul.f32 -1.442695, %v4227_v52 }
 0x6a1   :  { %v4140_v45 = vmul.f32 -1.442695, %v4196_v39  ;;  %v4198_v55 = vadd.f32 %v3058_v56, %v7637_v26  ;;  %v4230_v39 = vadd.f32 %v3101_v50, %v7639_v15 }
 0x6a2   :  { %4856 = vpow2.f32 %v4139_v5  ;;  %v4142_v53 = vmul.f32 -1.442695, %v4197_v23  ;;  %v4144_v27 = vmul.f32 -1.442695, %v4229_v54 }
 0x6a3   :  { %v4143_v47 = vmul.f32 -1.442695, %v4198_v55  ;;  %4858 = vpow2.f32 %v4140_v45 }
 0x6a4   :  { %4860 = vpow2.f32 %v4142_v53 }
 0x6a5   :  { %4862 = vpow2.f32 %v4143_v47 }
 0x6a6   :  { %4864 = vtanh.f32 %v4228_v41 }
 0x6a7   :  { %4866 = vpow2.f32 %v4141_v14 }
 0x6a8   :  { %4868 = vpow2.f32 %v4144_v27 }
 0x6ac   :  { %v4857_v0 = vpop.eup %4856 }
 0x6ad   :  { %v3234_v30 = vadd.f32 1.0, %v4857_v0  ;;  %v4859_v5 = vpop.eup %4858 }
 0x6ae   :  { %v4861_v23 = vpop.eup %4860  ;;  %v3235_v56 = vadd.f32 1.0, %v4859_v5 }
 0x6af   :  { %4870 = vrcp.f32 %v3234_v30  ;;  %v3237_v42 = vadd.f32 1.0, %v4861_v23  ;;  %v4863_v53 = vpop.eup %4862 }
 0x6b0   :  { %4872 = vtanh.f32 %v4230_v39  ;;  %v3238_v47 = vadd.f32 1.0, %v4863_v53  ;;  %v4865_v32 = vpop.eup %4864 }
 0x6b1   :  { %4874 = vrcp.f32 %v3235_v56  ;;  %v4867_v54 = vpop.eup %4866 }
 0x6b2   :  { %4876 = vrcp.f32 %v3237_v42  ;;  %v4869_v2 = vpop.eup %4868  ;;  %v3236_v41 = vadd.f32 1.0, %v4867_v54 }
 0x6b3   :  { %4878 = vrcp.f32 %v3238_v47  ;;  %v3239_v39 = vadd.f32 1.0, %v4869_v2  ;;  %v7740_v47 = vld [vmem:[#allocation35_spill] sm:$0xff] }
 0x6b4   :  { %4880 = vrcp.f32 %v3236_v41 }
 0x6b9   :  { %v4871_v45 = vpop.eup %4870 }
 0x6ba   :  { %v4873_v55 = vpop.eup %4872  ;;  %v3256_v50 = vmul.f32 %v4871_v45, %v4865_v32 }
 0x6bb   :  { %v4875_v52 = vpop.eup %4874 }
 0x6bc   :  { %v4877_v14 = vpop.eup %4876  ;;  %v3254_v27 = vmul.f32 %v4875_v52, %v6763_v3 }
 0x6bd   :  { %v3257_v30 = vmul.f32 %v4877_v14, %v4873_v55  ;;  %v4879_v0 = vpop.eup %4878 }
 0x6be   :  { %v7053_v5 = vadd.f32 %v3256_v50, %v3254_v27  ;;  %v3255_v23 = vmul.f32 %v4879_v0, %v6767_v4 }
 0x6bf   :  { %v3156_v56 = vpop.f32.mrb[40].mxu0  ;;  %v3199_v42 = vpop.f32.mrb[40].mxu1 }
 0x6c0   :  { %4882 = vtanh.f32 %v7053_v5  ;;  %v7057_v53 = vadd.f32 %v3257_v30, %v3255_v23  ;;  %v4247_v32 = vadd.f32 %v3156_v56, %v7740_v47  ;;  %v3158_v54 = vpop.f32.mrb[41].mxu0  ;;  %v3201_v45 = vpop.f32.mrb[41].mxu1 }
 0x6c1   :  { %4884 = vrcp.f32 %v3239_v39  ;;  %v4248_v3 = vadd.f32 %v3158_v54, %v7686_v58  ;;  %v3160_v55 = vpop.f32.mrb[42].mxu0  ;;  %v3203_v50 = vpop.f32.mrb[42].mxu1  ;;  %v4279_v39 = vadd.f32 %v3199_v42, %v5991_v38 }
 0x6c2   :  { %7739 = vst [vmem:[#allocation25_spill] sm:$0xff] %v7057_v53  ;;  %4886 = vtanh.f32 %v7057_v53  ;;  %v4145_v2 = vmul.f32 -1.442695, %v4247_v32  ;;  %v4249_v4 = vadd.f32 %v3160_v55, %v7740_v47  ;;  %v3162_v52 = vpop.f32.mrb[43].mxu0  ;;  %v3205_v41 = vpop.f32.mrb[43].mxu1  ;;  %v4281_v56 = vadd.f32 %v3203_v50, %v5991_v38 }
 0x6c3   :  { %v4146_v14 = vmul.f32 -1.442695, %v4248_v3  ;;  %v4250_v27 = vadd.f32 %v3162_v52, %v7686_v58  ;;  %v4881_v23 = vpop.eup %4880  ;;  %v4280_v32 = vadd.f32 %v3201_v45, %v5994_v37  ;;  %v4147_v3 = vmul.f32 -1.442695, %v4279_v39 }
 0x6c4   :  { %4888 = vpow2.f32 %v4145_v2  ;;  %v4148_v30 = vmul.f32 -1.442695, %v4249_v4  ;;  %v4150_v52 = vmul.f32 -1.442695, %v4281_v56  ;;  %v7093_v56 = vld [vmem:[%s7437_s4 + $0x24] ss:$16 sps:$4 sm:$0xff]  }
 0x6c5   :  { %v4149_v0 = vmul.f32 -1.442695, %v4250_v27  ;;  %4890 = vpow2.f32 %v4146_v14  ;;  %v4282_v14 = vadd.f32 %v3205_v41, %v5994_v37  ;;  %v7087_v41 = vld [vmem:[%s7437_s4 + $0x8] ss:$16 sps:$4 sm:$0xff]  }
 0x6c6   :  { %4892 = vpow2.f32 %v4148_v30 }
 0x6c7   :  { %4894 = vpow2.f32 %v4149_v0 }
 0x6c8   :  { %4896 = vtanh.f32 %v4280_v32 }
 0x6c9   :  { %4898 = vpow2.f32 %v4147_v3  ;;  %v7107_v3 = vld [vmem:[%s7437_s4 + $0x20] ss:$16 sps:$4 sm:$0xff]  }
 0x6ca   :  { %v4883_v54 = vpop.eup %4882  ;;  %4900 = vpow2.f32 %v4150_v52  ;;  %v7113_v52 = vld [vmem:[%s7437_s4 + $0x28] ss:$16 sps:$4 sm:$0xff]  }
 0x6cb   :  { %v7067_v55 = vmul.f32 %v4883_v54, %v4881_v23  ;;  %v4885_v47 = vpop.eup %4884  ;;  %v7099_v54 = vld [vmem:[%s7437_s4 + $0x2c] ss:$16 sps:$4 sm:$0xff]   ;;  %7741 = vst [vmem:[#allocation24_spill] sm:$0xff] %v7113_v52 }
 0x6cc   :  { %v4887_v53 = vpop.eup %4886 }
 0x6cd   :  { %v7071_v4 = vmul.f32 %v4887_v53, %v4885_v47  ;;  %v7081_v47 = vld [vmem:[%s7437_s4] ss:$16 sps:$4 sm:$0xff]  }
 0x6ce   :  { %v4889_v42 = vpop.eup %4888 }
 0x6cf   :  { %v3282_v50 = vadd.f32 1.0, %v4889_v42  ;;  %v3325_v27 = vpack.c.bf16 %v7071_v4, %v7067_v55  ;;  %v4891_v30 = vpop.eup %4890  ;;  %v7119_v42 = vld [vmem:[%s7437_s4 + $0x44] ss:$16 sps:$4 sm:$0xff]  }
 0x6d0   :  { %v4893_v0 = vpop.eup %4892  ;;  %v3283_v39 = vadd.f32 1.0, %v4891_v30  ;;  %7742 = vst [vmem:[#allocation23_spill] sm:$0xff] %v7119_v42 }
 0x6d1   :  { %4902 = vrcp.f32 %v3282_v50  ;;  %3359 = vmatmul.mubr.bf16.vlgmr.msra.gmra.mrb[24].mxu0 %v3325_v27  ;;  %3402 = vmatmul.mubr.bf16.vlgmr.msra.gmra.mrb[24].mxu1 %v3325_v27  ;;  %v3285_v53 = vadd.f32 1.0, %v4893_v0  ;;  %v4895_v23 = vpop.eup %4894  ;;  %v7131_v0 = vld [vmem:[%s7437_s4 + $0x40] ss:$16 sps:$4 sm:$0xff]  }
 0x6d2   :  { %4904 = vtanh.f32 %v4282_v14  ;;  %3431 = vmatpush1.bf16.msra.mxu0 %v7081_v47  ;;  %3474 = vmatpush1.bf16.msra.mxu1 %v7087_v41  ;;  %v3286_v32 = vadd.f32 1.0, %v4895_v23  ;;  %v7125_v14 = vld [vmem:[%s7437_s4 + $0x4c] ss:$16 sps:$4 sm:$0xff]   ;;  %v4897_v50 = vpop.eup %4896  ;;  %7744 = vst [vmem:[#allocation34_spill] sm:$0xff] %v7131_v0  ;;  %v7143_v23 = vld [vmem:[%s7437_s4 + $0x64] ss:$16 sps:$4 sm:$0xff]  }
 0x6d3   :  { %4906 = vrcp.f32 %v3283_v39  ;;  %3432 = vmatprep.subr.bf16.mxu0 %v7093_v56  ;;  %3475 = vmatprep.subr.bf16.mxu1 %v7099_v54  ;;  %7743 = vst [vmem:[#allocation29_spill] sm:$0xff] %v7125_v14  ;;  %v4899_v27 = vpop.eup %4898  ;;  %v7137_v39 = vld [vmem:[%s7437_s4 + $0x48] ss:$16 sps:$4 sm:$0xff]   ;;  %7746 = vst [vmem:[#allocation30_spill] sm:$0xff] %v7143_v23 }
 0x6d4   :  { %4908 = vrcp.f32 %v3285_v53  ;;  %3462 = vmatprep.mubr.bf16.mxu0 %v7599_v6  ;;  %3505 = vmatprep.mubr.bf16.mxu1 %v7599_v6  ;;  %v4901_v30 = vpop.eup %4900  ;;  %7745 = vst [vmem:[#allocation39_spill] sm:$0xff] %v7137_v39 }
 0x6d5   :  { %4910 = vrcp.f32 %v3286_v32  ;;  %v7149_v32 = vld [vmem:[%s7437_s4 + $0x6c] ss:$16 sps:$4 sm:$0xff]  }
 0x6d6   :  { %3433 = vmatpush1.bf16.msra.mxu0 %v7107_v3  ;;  %3476 = vmatpush1.bf16.msra.mxu1 %v7113_v52  ;;  %v7156_v52 = vld [vmem:[%s7437_s4 + $0x60] ss:$16 sps:$4 sm:$0xff]  }
 0x6d7   :  { %3434 = vmatprep.subr.bf16.mxu0 %v7119_v42  ;;  %3477 = vmatprep.subr.bf16.mxu1 %v7125_v14  ;;  %v3284_v14 = vadd.f32 1.0, %v4899_v27  ;;  %7747 = vst [vmem:[#allocation4_spill] sm:$0xff] %v7156_v52  ;;  %v7168_v27 = vld [vmem:[%s7437_s4 + $0x84] ss:$16 sps:$4 sm:$0xff]  }
 0x6d9   :  { %4912 = vrcp.f32 %v3284_v14  ;;  %v7211_v14 = vld [vmem:[%s7437_s4 + $0xa0] ss:$16 sps:$4 sm:$0xff]  }
 0x6da   :  { %3435 = vmatpush1.bf16.msra.mxu0 %v7131_v0  ;;  %3478 = vmatpush1.bf16.msra.mxu1 %v7137_v39  ;;  %7751 = vst [vmem:[#allocation7_spill] sm:$0xff] %v7211_v14 }
 0x6db   :  { %v4903_v53 = vpop.eup %4902  ;;  %3436 = vmatprep.subr.bf16.mxu0 %v7143_v23  ;;  %3479 = vmatprep.subr.bf16.mxu1 %v7149_v32  ;;  %v7162_v23 = vld [vmem:[%s7437_s4 + $0x68] ss:$16 sps:$4 sm:$0xff]  }
 0x6dc   :  { %v4905_v45 = vpop.eup %4904  ;;  %v3304_v2 = vmul.f32 %v4903_v53, %v4897_v50 }
 0x6dd   :  { %v4907_v0 = vpop.eup %4906 }
 0x6de   :  { %v4909_v39 = vpop.eup %4908  ;;  %v3302_v42 = vmul.f32 %v4907_v0, %v6807_v51  ;;  %3437 = vmatpush1.bf16.msra.mxu0 %v7156_v52  ;;  %3480 = vmatpush1.bf16.msra.mxu1 %v7162_v23  ;;  %v7174_v51 = vld [vmem:[%s7437_s4 + $0x8c] ss:$16 sps:$4 sm:$0xff]   ;;  %v3287_v52 = vadd.f32 1.0, %v4901_v30  ;;  %v7217_v30 = vld [vmem:[%s7437_s4 + $0xa8] ss:$16 sps:$4 sm:$0xff]  }
 0x6df   :  { %v3305_v50 = vmul.f32 %v4909_v39, %v4905_v45  ;;  %3438 = vmatprep.subr.bf16.mxu0 %v7168_v27  ;;  %7748 = vst [vmem:[#allocation5_spill] sm:$0xff] %v7174_v51  ;;  %3481 = vmatprep.subr.bf16.mxu1 %v7174_v51  ;;  %v4911_v0 = vpop.eup %4910  ;;  %v7184_v39 = vld [vmem:[%s7437_s4 + $0x80] ss:$16 sps:$4 sm:$0xff]   ;;  %v7190_v51 = vld [vmem:[%s7437_s4 + $0x88] ss:$16 sps:$4 sm:$0xff]   ;;  %7752 = vst [vmem:[#allocation9_spill] sm:$0xff] %v7217_v30 }
 0x6e0   :  { %v7177_v53 = vadd.f32 %v3304_v2, %v3302_v42  ;;  %v3303_v45 = vmul.f32 %v4911_v0, %v6813_v36  ;;  %v7198_v36 = vld [vmem:[%s7437_s4 + $0xa4] ss:$16 sps:$4 sm:$0xff]   ;;  %v7204_v42 = vld [vmem:[%s7437_s4 + $0xac] ss:$16 sps:$4 sm:$0xff]   ;;  %v7235_v0 = vld [vmem:[%s7437_s4 + $0xc0] ss:$16 sps:$4 sm:$0xff]  }
 0x6e1   :  { %7749 = vst [vmem:[#allocation6_spill] sm:$0xff] %v7198_v36  ;;  %7750 = vst [vmem:[#allocation8_spill] sm:$0xff] %v7204_v42 }
 0x6e2   :  { %4914 = vtanh.f32 %v7177_v53  ;;  %3439 = vmatpush1.bf16.msra.mxu0 %v7184_v39  ;;  %3482 = vmatpush1.bf16.msra.mxu1 %v7190_v51  ;;  %v7193_v2 = vadd.f32 %v3305_v50, %v3303_v45  ;;  %v7229_v50 = vld [vmem:[%s7437_s4 + $0xcc] ss:$16 sps:$4 sm:$0xff]   ;;  %7755 = vst [vmem:[#allocation11_spill] sm:$0xff] %v7235_v0  ;;  %v7241_v45 = vld [vmem:[%s7437_s4 + $0xc8] ss:$16 sps:$4 sm:$0xff]  }
 0x6e3   :  { %3440 = vmatprep.subr.bf16.mxu0 %v7198_v36  ;;  %3483 = vmatprep.subr.bf16.mxu1 %v7204_v42  ;;  %4916 = vrcp.f32 %v3287_v52  ;;  %v7223_v52 = vld [vmem:[%s7437_s4 + $0xc4] ss:$16 sps:$4 sm:$0xff]   ;;  %7754 = vst [vmem:[#allocation12_spill] sm:$0xff] %v7229_v50  ;;  %7756 = vst [vmem:[#allocation13_spill] sm:$0xff] %v7241_v45 }
 0x6e4   :  { %4918 = vtanh.f32 %v7193_v2  ;;  %7753 = vst [vmem:[#allocation10_spill] sm:$0xff] %v7223_v52 }
 0x6e6   :  { %3441 = vmatpush1.bf16.msra.mxu0 %v7211_v14  ;;  %3484 = vmatpush1.bf16.msra.mxu1 %v7217_v30  ;;  %v7247_v30 = vld [vmem:[%s7437_s4 + $0xe4] ss:$16 sps:$4 sm:$0xff]  }
 0x6e7   :  { %3442 = vmatprep.subr.bf16.mxu0 %v7223_v52  ;;  %3485 = vmatprep.subr.bf16.mxu1 %v7229_v50  ;;  %v4913_v52 = vpop.eup %4912  ;;  %7757 = vst [vmem:[#allocation14_spill] sm:$0xff] %v7247_v30  ;;  %v7253_v50 = vld [vmem:[%s7437_s4 + $0xec] ss:$16 sps:$4 sm:$0xff]  }
 0x6e8   :  { %7758 = vst [vmem:[#allocation16_spill] sm:$0xff] %v7253_v50 }
 0x6ea   :  { %3443 = vmatpush1.bf16.msra.mxu0 %v7235_v0  ;;  %3486 = vmatpush1.bf16.msra.mxu1 %v7241_v45  ;;  %v7261_v45 = vld [vmem:[%s7437_s4 + $0xe0] ss:$16 sps:$4 sm:$0xff]  }
 0x6eb   :  { %3444 = vmatprep.subr.bf16.mxu0 %v7247_v30  ;;  %3487 = vmatprep.subr.bf16.mxu1 %v7253_v50  ;;  %7759 = vst [vmem:[#allocation15_spill] sm:$0xff] %v7261_v45  ;;  %v7267_v30 = vld [vmem:[%s7437_s4 + $0xe8] ss:$16 sps:$4 sm:$0xff]  }
 0x6ec   :  { %v4915_v0 = vpop.eup %4914 }
 0x6ed   :  { %v7256_v14 = vmul.f32 %v4915_v0, %v4913_v52  ;;  %v4917_v42 = vpop.eup %4916 }
 0x6ee   :  { %3445 = vmatpush1.bf16.msra.mxu0 %v7261_v45  ;;  %3488 = vmatpush1.bf16.msra.mxu1 %v7267_v30  ;;  %v4919_v36 = vpop.eup %4918 }
 0x6ef   :  { %v3314_v52 = vmax.f32 %v6831_v44, %v7256_v14  ;;  %3634 = vmatprep.subr.bf16.mxu0 %v6836_v28  ;;  %3677 = vmatprep.subr.bf16.mxu1 %v6842_v16  ;;  %v7274_v0 = vmul.f32 %v4919_v36, %v4917_v42  ;;  %v7760_v28 = vld [vmem:[#allocation36_spill] sm:$0xff]  ;;  %v7761_v16 = vld [vmem:[#allocation19_spill] sm:$0xff] }
 0x6f1   :  { %v3315_v45 = vmax.f32 %v6848_v18, %v7274_v0  ;;  %v3429_v50 = vpack.c.bf16 %v7274_v0, %v7256_v14 }
 0x6f3   :  { %3463 = vmatmul.mubr.bf16.vlgmr.msra.gmra.mrb[36].mxu0 %v3429_v50  ;;  %3506 = vmatmul.mubr.bf16.vlgmr.msra.gmra.mrb[36].mxu1 %v3429_v50 }
 0x6f4   :  { %3635 = vmatpush1.bf16.msra.mxu0 %v6853_v13  ;;  %3678 = vmatpush1.bf16.msra.mxu1 %v6859_v11  ;;  %v7762_v13 = vld [vmem:[#allocation21_spill] sm:$0xff]  ;;  %v7763_v11 = vld [vmem:[#allocation22_spill] sm:$0xff] }
 0x6f5   :  { %3636 = vmatprep.subr.bf16.mxu0 %v6865_v60  ;;  %3679 = vmatprep.subr.bf16.mxu1 %v6871_v40 }
 0x6f6   :  { %3666 = vmatprep.mubr.bf16.mxu0 %v7599_v6  ;;  %3709 = vmatprep.mubr.bf16.mxu1 %v7599_v6 }
 0x6f8   :  { %3637 = vmatpush1.bf16.msra.mxu0 %v6879_v20  ;;  %3680 = vmatpush1.bf16.msra.mxu1 %v6885_v34  ;;  %v7764_v20 = vld [vmem:[#allocation31_spill] sm:$0xff] }
 0x6f9   :  { %3638 = vmatprep.subr.bf16.mxu0 %v6891_v31  ;;  %3681 = vmatprep.subr.bf16.mxu1 %v6897_v9 }
 0x6fc   :  { %3639 = vmatpush1.bf16.msra.mxu0 %v6903_v12  ;;  %3682 = vmatpush1.bf16.msra.mxu1 %v6909_v10 }
 0x6fd   :  { %3640 = vmatprep.subr.bf16.mxu0 %v6915_v63  ;;  %3683 = vmatprep.subr.bf16.mxu1 %v6921_v35 }
 0x700   :  { %3641 = vmatpush1.bf16.msra.mxu0 %v6927_v57  ;;  %3684 = vmatpush1.bf16.msra.mxu1 %v6933_v61 }
 0x701   :  { %3642 = vmatprep.subr.bf16.mxu0 %v6939_v62  ;;  %3685 = vmatprep.subr.bf16.mxu1 %v6945_v8 }
 0x704   :  { %3643 = vmatpush1.bf16.msra.mxu0 %v6951_v29  ;;  %3686 = vmatpush1.bf16.msra.mxu1 %v6957_v25 }
 0x705   :  { %3644 = vmatprep.subr.bf16.mxu0 %v6963_v33  ;;  %3687 = vmatprep.subr.bf16.mxu1 %v6969_v48 }
 0x708   :  { %3645 = vmatpush1.bf16.msra.mxu0 %v6975_v46  ;;  %3688 = vmatpush1.bf16.msra.mxu1 %v6981_v49 }
 0x709   :  { %3646 = vmatprep.subr.bf16.mxu0 %v6987_v19  ;;  %3689 = vmatprep.subr.bf16.mxu1 %v6993_v21 }
 0x70c   :  { %3647 = vmatpush1.bf16.msra.mxu0 %v6999_v1  ;;  %3690 = vmatpush1.bf16.msra.mxu1 %v7005_v59 }
 0x70d   :  { %3648 = vmatprep.subr.bf16.mxu0 %v7011_v24  ;;  %3691 = vmatprep.subr.bf16.mxu1 %v7017_v17 }
 0x710   :  { %3649 = vmatpush1.bf16.msra.mxu0 %v7760_v28  ;;  %3692 = vmatpush1.bf16.msra.mxu1 %v7761_v16 }
 0x711   :  { %3737 = vmatprep.subr.bf16.mxu0 %v7762_v13  ;;  %3780 = vmatprep.subr.bf16.mxu1 %v7763_v11 }
 0x7a4   :  { %v3360_v60 = vpop.f32.mrb[24].mxu0  ;;  %v3403_v40 = vpop.f32.mrb[24].mxu1 }
 0x7a5   :  { %v4199_v34 = vadd.f32 %v3360_v60, %v7764_v20  ;;  %v3362_v31 = vpop.f32.mrb[25].mxu0  ;;  %v3405_v9 = vpop.f32.mrb[25].mxu1  ;;  %v4231_v48 = vadd.f32 %v3403_v40, %v7638_v43 }
 0x7a6   :  { %v4200_v12 = vadd.f32 %v3362_v31, %v7637_v26  ;;  %v3364_v10 = vpop.f32.mrb[26].mxu0  ;;  %v3407_v63 = vpop.f32.mrb[26].mxu1  ;;  %v4232_v49 = vadd.f32 %v3405_v9, %v7639_v15 }
 0x7a7   :  { %v4151_v35 = vmul.f32 -1.442695, %v4199_v34  ;;  %v4201_v57 = vadd.f32 %v3364_v10, %v7764_v20  ;;  %v3366_v61 = vpop.f32.mrb[27].mxu0  ;;  %v3409_v62 = vpop.f32.mrb[27].mxu1  ;;  %v4233_v46 = vadd.f32 %v3407_v63, %v7638_v43  ;;  %v4153_v19 = vmul.f32 -1.442695, %v4231_v48 }
 0x7a8   :  { %v4152_v8 = vmul.f32 -1.442695, %v4200_v12  ;;  %v4202_v29 = vadd.f32 %v3366_v61, %v7637_v26  ;;  %v4234_v59 = vadd.f32 %v3409_v62, %v7639_v15 }
 0x7a9   :  { %4920 = vpow2.f32 %v4151_v35  ;;  %v4154_v25 = vmul.f32 -1.442695, %v4201_v57  ;;  %v4156_v21 = vmul.f32 -1.442695, %v4233_v46  ;;  %v7766_v46 = vld [vmem:[#allocation35_spill] sm:$0xff] }
 0x7aa   :  { %v4155_v33 = vmul.f32 -1.442695, %v4202_v29  ;;  %4922 = vpow2.f32 %v4152_v8  ;;  %v7765_v8 = vld [vmem:[#allocation25_spill] sm:$0xff] }
 0x7ab   :  { %4924 = vpow2.f32 %v4154_v25 }
 0x7ac   :  { %4926 = vpow2.f32 %v4155_v33 }
 0x7ad   :  { %4928 = vtanh.f32 %v4232_v49 }
 0x7ae   :  { %4930 = vpow2.f32 %v4153_v19 }
 0x7af   :  { %4932 = vpow2.f32 %v4156_v21 }
 0x7b3   :  { %v4921_v1 = vpop.eup %4920 }
 0x7b4   :  { %v3542_v24 = vadd.f32 1.0, %v4921_v1  ;;  %v4923_v17 = vpop.eup %4922 }
 0x7b5   :  { %v4925_v36 = vpop.eup %4924  ;;  %v3543_v42 = vadd.f32 1.0, %v4923_v17 }
 0x7b6   :  { %4934 = vrcp.f32 %v3542_v24  ;;  %v3545_v50 = vadd.f32 1.0, %v4925_v36  ;;  %v4927_v28 = vpop.eup %4926 }
 0x7b7   :  { %4936 = vtanh.f32 %v4234_v59  ;;  %v3546_v16 = vadd.f32 1.0, %v4927_v28  ;;  %v4929_v13 = vpop.eup %4928 }
 0x7b8   :  { %4938 = vrcp.f32 %v3543_v42  ;;  %v4931_v11 = vpop.eup %4930 }
 0x7b9   :  { %4940 = vrcp.f32 %v3545_v50  ;;  %v4933_v60 = vpop.eup %4932  ;;  %v3544_v12 = vadd.f32 1.0, %v4931_v11 }
 0x7ba   :  { %4942 = vrcp.f32 %v3546_v16  ;;  %v3547_v62 = vadd.f32 1.0, %v4933_v60 }
 0x7bb   :  { %4944 = vrcp.f32 %v3544_v12 }
 0x7c0   :  { %v4935_v40 = vpop.eup %4934 }
 0x7c1   :  { %v4937_v34 = vpop.eup %4936  ;;  %v3564_v31 = vmul.f32 %v4935_v40, %v4929_v13 }
 0x7c2   :  { %v4939_v9 = vpop.eup %4938 }
 0x7c3   :  { %v4941_v10 = vpop.eup %4940  ;;  %v3562_v63 = vmul.f32 %v4939_v9, %v7053_v5 }
 0x7c4   :  { %v3565_v35 = vmul.f32 %v4941_v10, %v4937_v34  ;;  %v4943_v57 = vpop.eup %4942 }
 0x7c5   :  { %v7323_v61 = vadd.f32 %v3564_v31, %v3562_v63  ;;  %v3563_v29 = vmul.f32 %v4943_v57, %v7765_v8  ;;  %v4945_v60 = vpop.eup %4944  ;;  %v7767_v57 = vmax.f32 %v6780_v22, %v7067_v55 }
 0x7c6   :  { %v3464_v25 = vpop.f32.mrb[36].mxu0  ;;  %v3507_v33 = vpop.f32.mrb[36].mxu1 }
 0x7c7   :  { %4946 = vtanh.f32 %v7323_v61  ;;  %v7327_v48 = vadd.f32 %v3565_v35, %v3563_v29  ;;  %v4243_v49 = vadd.f32 %v3464_v25, %v7766_v46  ;;  %v3466_v19 = vpop.f32.mrb[37].mxu0  ;;  %v3509_v21 = vpop.f32.mrb[37].mxu1  ;;  %v4275_v11 = vadd.f32 %v3507_v33, %v5991_v38 }
 0x7c8   :  { %4948 = vrcp.f32 %v3547_v62  ;;  %v4244_v5 = vadd.f32 %v3466_v19, %v7686_v58  ;;  %v3468_v1 = vpop.f32.mrb[38].mxu0  ;;  %v3511_v59 = vpop.f32.mrb[38].mxu1  ;;  %v4276_v31 = vadd.f32 %v3509_v21, %v5994_v37 }
 0x7c9   :  { %4950 = vtanh.f32 %v7327_v48  ;;  %v4157_v24 = vmul.f32 -1.442695, %v4243_v49  ;;  %v4245_v17 = vadd.f32 %v3468_v1, %v7766_v46  ;;  %v3470_v36 = vpop.f32.mrb[39].mxu0  ;;  %v3513_v42 = vpop.f32.mrb[39].mxu1  ;;  %v4277_v40 = vadd.f32 %v3511_v59, %v5991_v38 }
 0x7ca   :  { %v4158_v50 = vmul.f32 -1.442695, %v4244_v5  ;;  %v4246_v28 = vadd.f32 %v3470_v36, %v7686_v58  ;;  %v4159_v10 = vmul.f32 -1.442695, %v4275_v11  ;;  %v4278_v25 = vadd.f32 %v3513_v42, %v5994_v37  ;;  %v7772_v36 = vld [vmem:[#allocation34_spill] sm:$0xff] }
 0x7cb   :  { %4952 = vpow2.f32 %v4157_v24  ;;  %v4160_v16 = vmul.f32 -1.442695, %v4245_v17  ;;  %v4162_v35 = vmul.f32 -1.442695, %v4277_v40  ;;  %v7768_v49 = vmax.f32 %v6786_v7, %v7071_v4  ;;  %v7769_v4 = vld [vmem:[#allocation24_spill] sm:$0xff] }
 0x7cc   :  { %v4161_v13 = vmul.f32 -1.442695, %v4246_v28  ;;  %4954 = vpow2.f32 %v4158_v50  ;;  %v7774_v50 = vld [vmem:[#allocation30_spill] sm:$0xff] }
 0x7cd   :  { %4956 = vpow2.f32 %v4160_v16 }
 0x7ce   :  { %4958 = vpow2.f32 %v4161_v13 }
 0x7cf   :  { %4960 = vtanh.f32 %v4276_v31 }
 0x7d0   :  { %4962 = vpow2.f32 %v4159_v10  ;;  %v7779_v10 = vld [vmem:[#allocation7_spill] sm:$0xff] }
 0x7d1   :  { %v4947_v34 = vpop.eup %4946  ;;  %4964 = vpow2.f32 %v4162_v35  ;;  %v7782_v35 = vld [vmem:[#allocation12_spill] sm:$0xff] }
 0x7d2   :  { %v3570_v9 = vmul.f32 %v4947_v34, %v4945_v60  ;;  %v4949_v12 = vpop.eup %4948  ;;  %v7775_v60 = vld [vmem:[#allocation4_spill] sm:$0xff]  ;;  %v7776_v34 = vld [vmem:[#allocation5_spill] sm:$0xff] }
 0x7d3   :  { %v4951_v63 = vpop.eup %4950 }
 0x7d4   :  { %v7340_v62 = vmax.f32 %v7767_v57, %v3570_v9  ;;  %v3571_v8 = vmul.f32 %v4951_v63, %v4949_v12  ;;  %v7780_v63 = vld [vmem:[#allocation9_spill] sm:$0xff] }
 0x7d5   :  { %v4953_v29 = vpop.eup %4952 }
 0x7d6   :  { %v3590_v33 = vadd.f32 1.0, %v4953_v29  ;;  %v7346_v19 = vmax.f32 %v7768_v49, %v3571_v8  ;;  %v3633_v21 = vpack.c.bf16 %v3571_v8, %v3570_v9  ;;  %v4955_v5 = vpop.eup %4954  ;;  %v7785_v8 = vld [vmem:[#allocation14_spill] sm:$0xff]  ;;  %v7786_v29 = vld [vmem:[#allocation16_spill] sm:$0xff] }
 0x7d7   :  { %v4957_v1 = vpop.eup %4956  ;;  %v3591_v22 = vadd.f32 1.0, %v4955_v5 }
 0x7d8   :  { %4966 = vrcp.f32 %v3590_v33  ;;  %3667 = vmatmul.mubr.bf16.vlgmr.msra.gmra.mrb[28].mxu0 %v3633_v21  ;;  %3710 = vmatmul.mubr.bf16.vlgmr.msra.gmra.mrb[28].mxu1 %v3633_v21  ;;  %v3593_v55 = vadd.f32 1.0, %v4957_v1  ;;  %v4959_v59 = vpop.eup %4958  ;;  %v7787_v21 = vld [vmem:[#allocation15_spill] sm:$0xff] }
 0x7d9   :  { %4968 = vtanh.f32 %v4278_v25  ;;  %3738 = vmatpush1.bf16.msra.mxu0 %v7081_v47  ;;  %3781 = vmatpush1.bf16.msra.mxu1 %v7087_v41  ;;  %v3594_v7 = vadd.f32 1.0, %v4959_v59  ;;  %v7770_v47 = vld [vmem:[#allocation23_spill] sm:$0xff]  ;;  %v7771_v41 = vld [vmem:[#allocation29_spill] sm:$0xff]  ;;  %v4961_v24 = vpop.eup %4960 }
 0x7da   :  { %4970 = vrcp.f32 %v3591_v22  ;;  %3739 = vmatprep.subr.bf16.mxu0 %v7093_v56  ;;  %3782 = vmatprep.subr.bf16.mxu1 %v7099_v54  ;;  %v4963_v17 = vpop.eup %4962  ;;  %v7773_v54 = vld [vmem:[#allocation39_spill] sm:$0xff] }
 0x7db   :  { %4972 = vrcp.f32 %v3593_v55  ;;  %3769 = vmatprep.mubr.bf16.mxu0 %v7599_v6  ;;  %3812 = vmatprep.mubr.bf16.mxu1 %v7599_v6  ;;  %v4965_v56 = vpop.eup %4964  ;;  %v3592_v16 = vadd.f32 1.0, %v4963_v17 }
 0x7dc   :  { %4974 = vrcp.f32 %v3594_v7 }
 0x7dd   :  { %3740 = vmatpush1.bf16.msra.mxu0 %v7107_v3  ;;  %3783 = vmatpush1.bf16.msra.mxu1 %v7769_v4  ;;  %4976 = vrcp.f32 %v3592_v16 }
 0x7de   :  { %3741 = vmatprep.subr.bf16.mxu0 %v7770_v47  ;;  %3784 = vmatprep.subr.bf16.mxu1 %v7771_v41 }
 0x7e1   :  { %3742 = vmatpush1.bf16.msra.mxu0 %v7772_v36  ;;  %3785 = vmatpush1.bf16.msra.mxu1 %v7773_v54 }
 0x7e2   :  { %v4967_v42 = vpop.eup %4966  ;;  %3743 = vmatprep.subr.bf16.mxu0 %v7774_v50  ;;  %3786 = vmatprep.subr.bf16.mxu1 %v7149_v32  ;;  %v3595_v32 = vadd.f32 1.0, %v4965_v56 }
 0x7e3   :  { %v4969_v6 = vpop.eup %4968  ;;  %v3612_v3 = vmul.f32 %v4967_v42, %v4961_v24 }
 0x7e4   :  { %v4971_v28 = vpop.eup %4970 }
 0x7e5   :  { %v4973_v13 = vpop.eup %4972  ;;  %v3610_v11 = vmul.f32 %v4971_v28, %v7177_v53  ;;  %3744 = vmatpush1.bf16.msra.mxu0 %v7775_v60  ;;  %3787 = vmatpush1.bf16.msra.mxu1 %v7162_v23  ;;  %v7777_v23 = vld [vmem:[#allocation6_spill] sm:$0xff] }
 0x7e6   :  { %v3613_v40 = vmul.f32 %v4973_v13, %v4969_v6  ;;  %3745 = vmatprep.subr.bf16.mxu0 %v7168_v27  ;;  %3788 = vmatprep.subr.bf16.mxu1 %v7776_v34  ;;  %v4975_v31 = vpop.eup %4974  ;;  %v7778_v27 = vld [vmem:[#allocation8_spill] sm:$0xff] }
 0x7e7   :  { %v7367_v9 = vadd.f32 %v3612_v3, %v3610_v11  ;;  %v3611_v12 = vmul.f32 %v4975_v31, %v7193_v2  ;;  %v7781_v2 = vld [vmem:[#allocation10_spill] sm:$0xff]  ;;  %v4977_v57 = vpop.eup %4976 }
 0x7e9   :  { %4978 = vtanh.f32 %v7367_v9  ;;  %3746 = vmatpush1.bf16.msra.mxu0 %v7184_v39  ;;  %3789 = vmatpush1.bf16.msra.mxu1 %v7190_v51  ;;  %v7373_v53 = vadd.f32 %v3613_v40, %v3611_v12  ;;  %v7783_v39 = vld [vmem:[#allocation11_spill] sm:$0xff]  ;;  %v7784_v51 = vld [vmem:[#allocation13_spill] sm:$0xff] }
 0x7ea   :  { %3747 = vmatprep.subr.bf16.mxu0 %v7777_v23  ;;  %3790 = vmatprep.subr.bf16.mxu1 %v7778_v27  ;;  %4980 = vrcp.f32 %v3595_v32 }
 0x7eb   :  { %4982 = vtanh.f32 %v7373_v53 }
 0x7ed   :  { %3748 = vmatpush1.bf16.msra.mxu0 %v7779_v10  ;;  %3791 = vmatpush1.bf16.msra.mxu1 %v7780_v63 }
 0x7ee   :  { %3749 = vmatprep.subr.bf16.mxu0 %v7781_v2  ;;  %3792 = vmatprep.subr.bf16.mxu1 %v7782_v35 }
 0x7f1   :  { %3750 = vmatpush1.bf16.msra.mxu0 %v7783_v39  ;;  %3793 = vmatpush1.bf16.msra.mxu1 %v7784_v51 }
 0x7f2   :  { %3751 = vmatprep.subr.bf16.mxu0 %v7785_v8  ;;  %3794 = vmatprep.subr.bf16.mxu1 %v7786_v29 }
 0x7f3   :  { %v4979_v25 = vpop.eup %4978 }
 0x7f4   :  { %v3618_v33 = vmul.f32 %v4979_v25, %v4977_v57  ;;  %v4981_v49 = vpop.eup %4980 }
 0x7f5   :  { %3752 = vmatpush1.bf16.msra.mxu0 %v7787_v21  ;;  %3795 = vmatpush1.bf16.msra.mxu1 %v7267_v30  ;;  %v4983_v5 = vpop.eup %4982 }
 0x7f6   :  { %v7391_v1 = vmax.f32 %v3314_v52, %v3618_v33  ;;  %v3619_v22 = vmul.f32 %v4983_v5, %v4981_v49 }
 0x7f8   :  { %v7396_v55 = vmax.f32 %v3315_v45, %v3619_v22  ;;  %v3736_v59 = vpack.c.bf16 %v3619_v22, %v3618_v33 }
 0x7fa   :  { %3770 = vmatmul.mubr.bf16.vlgmr.msra.gmra.mrb[32].mxu0 %v3736_v59  ;;  %3813 = vmatmul.mubr.bf16.vlgmr.msra.gmra.mrb[32].mxu1 %v3736_v59 }
 0x8ab   :  { %v3668_v7 = vpop.f32.mrb[28].mxu0  ;;  %v3711_v4 = vpop.f32.mrb[28].mxu1 }
 0x8ac   :  { %v4203_v47 = vadd.f32 %v3668_v7, %v7764_v20  ;;  %v3670_v30 = vpop.f32.mrb[29].mxu0  ;;  %v3713_v41 = vpop.f32.mrb[29].mxu1  ;;  %v4235_v42 = vadd.f32 %v3711_v4, %v7638_v43 }
 0x8ad   :  { %v4204_v24 = vadd.f32 %v3670_v30, %v7637_v26  ;;  %v3672_v44 = vpop.f32.mrb[30].mxu0  ;;  %v3715_v14 = vpop.f32.mrb[30].mxu1  ;;  %v4236_v6 = vadd.f32 %v3713_v41, %v7639_v15 }
 0x8ae   :  { %v4163_v52 = vmul.f32 -1.442695, %v4203_v47  ;;  %v4205_v17 = vadd.f32 %v3672_v44, %v7764_v20  ;;  %v3674_v56 = vpop.f32.mrb[31].mxu0  ;;  %v3717_v18 = vpop.f32.mrb[31].mxu1  ;;  %v4237_v50 = vadd.f32 %v3715_v14, %v7638_v43  ;;  %v4165_v3 = vmul.f32 -1.442695, %v4235_v42 }
 0x8af   :  { %v4164_v45 = vmul.f32 -1.442695, %v4204_v24  ;;  %v4206_v0 = vadd.f32 %v3674_v56, %v7637_v26  ;;  %v4238_v16 = vadd.f32 %v3717_v18, %v7639_v15 }
 0x8b0   :  { %4984 = vpow2.f32 %v4163_v52  ;;  %v4166_v36 = vmul.f32 -1.442695, %v4205_v17  ;;  %v4168_v28 = vmul.f32 -1.442695, %v4237_v50 }
 0x8b1   :  { %v4167_v54 = vmul.f32 -1.442695, %v4206_v0  ;;  %4986 = vpow2.f32 %v4164_v45 }
 0x8b2   :  { %4988 = vpow2.f32 %v4166_v36 }
 0x8b3   :  { %4990 = vpow2.f32 %v4167_v54 }
 0x8b4   :  { %4992 = vtanh.f32 %v4236_v6 }
 0x8b5   :  { %4994 = vpow2.f32 %v4165_v3 }
 0x8b6   :  { %4996 = vpow2.f32 %v4168_v28 }
 0x8ba   :  { %v4985_v20 = vpop.eup %4984 }
 0x8bb   :  { %v3849_v13 = vadd.f32 1.0, %v4985_v20  ;;  %v4987_v26 = vpop.eup %4986 }
 0x8bc   :  { %v4989_v11 = vpop.eup %4988  ;;  %v3850_v60 = vadd.f32 1.0, %v4987_v26 }
 0x8bd   :  { %4998 = vrcp.f32 %v3849_v13  ;;  %v3852_v40 = vadd.f32 1.0, %v4989_v11  ;;  %v4991_v34 = vpop.eup %4990 }
 0x8be   :  { %5000 = vtanh.f32 %v4238_v16  ;;  %v3853_v43 = vadd.f32 1.0, %v4991_v34  ;;  %v4993_v31 = vpop.eup %4992 }
 0x8bf   :  { %5002 = vrcp.f32 %v3850_v60  ;;  %v4995_v32 = vpop.eup %4994 }
 0x8c0   :  { %5004 = vrcp.f32 %v3852_v40  ;;  %v4997_v12 = vpop.eup %4996  ;;  %v3851_v63 = vadd.f32 1.0, %v4995_v32 }
 0x8c1   :  { %5006 = vrcp.f32 %v3853_v43  ;;  %v3854_v8 = vadd.f32 1.0, %v4997_v12 }
 0x8c2   :  { %5008 = vrcp.f32 %v3851_v63 }
 0x8c7   :  { %v4999_v23 = vpop.eup %4998 }
 0x8c8   :  { %v5001_v27 = vpop.eup %5000  ;;  %v3871_v15 = vmul.f32 %v4999_v23, %v4993_v31 }
 0x8c9   :  { %v5003_v10 = vpop.eup %5002 }
 0x8ca   :  { %v5005_v2 = vpop.eup %5004  ;;  %v3869_v35 = vmul.f32 %v5003_v10, %v7323_v61 }
 0x8cb   :  { %v3872_v39 = vmul.f32 %v5005_v2, %v5001_v27  ;;  %v5007_v51 = vpop.eup %5006 }
 0x8cc   :  { %v3873_v57 = vadd.f32 %v3871_v15, %v3869_v35  ;;  %v3870_v29 = vmul.f32 %v5007_v51, %v7327_v48  ;;  %v5009_v17 = vpop.eup %5008 }
 0x8cd   :  { %v3771_v25 = vpop.f32.mrb[32].mxu0  ;;  %v3814_v33 = vpop.f32.mrb[32].mxu1 }
 0x8ce   :  { %5010 = vtanh.f32 %v3873_v57  ;;  %v3874_v49 = vadd.f32 %v3872_v39, %v3870_v29  ;;  %v4239_v21 = vadd.f32 %v3771_v25, %v7766_v46  ;;  %v3773_v5 = vpop.f32.mrb[33].mxu0  ;;  %v3816_v22 = vpop.f32.mrb[33].mxu1  ;;  %v4271_v52 = vadd.f32 %v3814_v33, %v5991_v38 }
 0x8cf   :  { %5012 = vrcp.f32 %v3854_v8  ;;  %v4240_v59 = vadd.f32 %v3773_v5, %v7686_v58  ;;  %v3775_v7 = vpop.f32.mrb[34].mxu0  ;;  %v3818_v61 = vpop.f32.mrb[34].mxu1  ;;  %v4272_v45 = vadd.f32 %v3816_v22, %v5994_v37 }
 0x8d0   :  { %5014 = vtanh.f32 %v3874_v49  ;;  %v4169_v4 = vmul.f32 -1.442695, %v4239_v21  ;;  %v4241_v47 = vadd.f32 %v3775_v7, %v7766_v46  ;;  %v3777_v30 = vpop.f32.mrb[35].mxu0  ;;  %v3820_v41 = vpop.f32.mrb[35].mxu1  ;;  %v4273_v56 = vadd.f32 %v3818_v61, %v5991_v38 }
 0x8d1   :  { %v4170_v48 = vmul.f32 -1.442695, %v4240_v59  ;;  %v4242_v24 = vadd.f32 %v3777_v30, %v7686_v58  ;;  %v4171_v36 = vmul.f32 -1.442695, %v4271_v52  ;;  %v4274_v38 = vadd.f32 %v3820_v41, %v5994_v37 }
 0x8d2   :  { %5016 = vpow2.f32 %v4169_v4  ;;  %v4172_v44 = vmul.f32 -1.442695, %v4241_v47  ;;  %v4174_v42 = vmul.f32 -1.442695, %v4273_v56 }
 0x8d3   :  { %v4173_v14 = vmul.f32 -1.442695, %v4242_v24  ;;  %5018 = vpow2.f32 %v4170_v48 }
 0x8d4   :  { %5020 = vpow2.f32 %v4172_v44 }
 0x8d5   :  { %5022 = vpow2.f32 %v4173_v14 }
 0x8d6   :  { %5024 = vtanh.f32 %v4272_v45 }
 0x8d8   :  { %v5011_v18 = vpop.eup %5010 }
 0x8d9   :  { %v3877_v46 = vmul.f32 %v5011_v18, %v5009_v17  ;;  %v5013_v0 = vpop.eup %5012 }
 0x8da   :  { %v5015_v54 = vpop.eup %5014 }
 0x8db   :  { %v3927_v58 = vmax.f32 %v7340_v62, %v3877_v46  ;;  %v3878_v50 = vmul.f32 %v5015_v54, %v5013_v0 }
 0x8dc   :  { %v5017_v6 = vpop.eup %5016 }
 0x8dd   :  { %5026 = vtanh.f32 %v3927_v58  ;;  %v3928_v3 = vmax.f32 %v7346_v19, %v3878_v50  ;;  %v3897_v28 = vadd.f32 1.0, %v5017_v6  ;;  %v5019_v20 = vpop.eup %5018 }
 0x8de   :  { %5028 = vpow2.f32 %v4171_v36  ;;  %v5021_v16 = vpop.eup %5020  ;;  %v3898_v13 = vadd.f32 1.0, %v5019_v20 }
 0x8df   :  { %5030 = vpow2.f32 %v4174_v42  ;;  %v3900_v26 = vadd.f32 1.0, %v5021_v16  ;;  %v5023_v11 = vpop.eup %5022 }
 0x8e0   :  { %5032 = vtanh.f32 %v3928_v3  ;;  %v3901_v62 = vadd.f32 1.0, %v5023_v11  ;;  %v5025_v60 = vpop.eup %5024 }
 0x8e1   :  { %5034 = vrcp.f32 %v3897_v28 }
 0x8e2   :  { %5036 = vtanh.f32 %v4274_v38 }
 0x8e3   :  { %5038 = vrcp.f32 %v3898_v13 }
 0x8e4   :  { %5040 = vrcp.f32 %v3900_v26 }
 0x8e5   :  { %5042 = vrcp.f32 %v3901_v62 }
 0x8e7   :  { %v5027_v40 = vpop.eup %5026 }
 0x8e8   :  { %v5029_v19 = vpop.eup %5028  ;;  %3935 = vst [vmem:[%s7439_s5] sm:$0xff] %v5027_v40 }
 0x8e9   :  { %v5031_v37 = vpop.eup %5030  ;;  %v3899_v23 = vadd.f32 1.0, %v5029_v19 }
 0x8ea   :  { %v5033_v34 = vpop.eup %5032  ;;  %v3902_v35 = vadd.f32 1.0, %v5031_v37 }
 0x8eb   :  { %v5035_v43 = vpop.eup %5034  ;;  %3937 = vst [vmem:[%s7439_s5 + $0x10] sm:$0xff] %v5033_v34  ;;  %5044 = vrcp.f32 %v3899_v23 }
 0x8ec   :  { %v5037_v31 = vpop.eup %5036  ;;  %v3919_v32 = vmul.f32 %v5035_v43, %v5025_v60 }
 0x8ed   :  { %v5039_v12 = vpop.eup %5038 }
 0x8ee   :  { %v5041_v27 = vpop.eup %5040  ;;  %v3917_v15 = vmul.f32 %v5039_v12, %v7367_v9 }
 0x8ef   :  { %v3920_v10 = vmul.f32 %v5041_v27, %v5037_v31  ;;  %v5043_v63 = vpop.eup %5042 }
 0x8f0   :  { %v3921_v2 = vadd.f32 %v3919_v32, %v3917_v15  ;;  %v3918_v39 = vmul.f32 %v5043_v63, %v7373_v53 }
 0x8f2   :  { %5046 = vtanh.f32 %v3921_v2  ;;  %v3922_v51 = vadd.f32 %v3920_v10, %v3918_v39 }
 0x8f3   :  { %5048 = vrcp.f32 %v3902_v35 }
 0x8f4   :  { %5050 = vtanh.f32 %v3922_v51 }
 0x8f5   :  { %v5045_v57 = vpop.eup %5044 }
 0x8fc   :  { %v5047_v8 = vpop.eup %5046 }
 0x8fd   :  { %v3925_v29 = vmul.f32 %v5047_v8, %v5045_v57  ;;  %v5049_v25 = vpop.eup %5048 }
 0x8fe   :  { %v5051_v33 = vpop.eup %5050 }
 0x8ff   :  { %v3929_v49 = vmax.f32 %v7391_v1, %v3925_v29  ;;  %v3926_v21 = vmul.f32 %v5051_v33, %v5049_v25 }
 0x901   :  { %5052 = vtanh.f32 %v3929_v49  ;;  %v3930_v9 = vmax.f32 %v7396_v55, %v3926_v21 }
 0x903   :  { %5054 = vtanh.f32 %v3930_v9 }
 0x90b   :  { %v5053_v5 = vpop.eup %5052 }
 0x90c   :  { %3936 = vst [vmem:[%s7439_s5 + $0x8] sm:$0xff] %v5053_v5 }
 0x90d   :  { %v5055_v53 = vpop.eup %5054 }
 0x90e   :  { %3938 = vst [vmem:[%s7439_s5 + $0x18] sm:$0xff] %v5055_v53 }

</bundles_post_ra>
